<compile_context>
chip_gen: v5e
topology: v5e:2x2
jax: 0.10.0
libtpu: 0.0.40
codegen_flags: <defaults>
</compile_context>

<pallas_src>
import functools

import jax
import jax.numpy as jnp
from jax.experimental import pallas as pl
from jax.experimental.pallas import tpu as pltpu


def _round_up(x, m):
    return ((x + m - 1) // m) * m


def _maxpool_2x2(y, H, W, C):
    """2x2 stride-2 max pool of an (H, W, C) f32 map (odd dims floored like nn.MaxPool2d)."""
    H2, W2 = H // 2, W // 2
    if H2 * 2 != H or W2 * 2 != W:
        y = y[:H2 * 2, :W2 * 2, :]
    y = jnp.max(y.reshape(H2, 2, W2 * 2, C), axis=1)   # pool H: untiled dim, pure VALU max
    # TODO(synk): the W pool regroups sublane pairs (small relayout); switch to even/odd
    # strided slices once strided value slices are guaranteed to lower in Mosaic.
    y = jnp.max(y.reshape(H2, W2, 2, C), axis=2)
    return y                                            # (H2, W2, C)


def _conv3x3_64(xpad, w_ref, b_ref, Hout, Wout):
    """3x3 'SAME' conv of a zero-padded (Hout+2, Wout+2, 64) bf16 map, as 9 accumulating
    K=64 MXU matmuls (no 9x-wide im2col slab), + folded BN bias + ReLU, f32 accumulate."""
    acc = jnp.zeros((Hout * Wout, 64), jnp.float32)
    for tap in range(9):
        dt, dm = divmod(tap, 3)
        sl = xpad[dt:dt + Hout, dm:dm + Wout, :].reshape(Hout * Wout, 64)
        acc = acc + jnp.dot(sl, w_ref[tap], preferred_element_type=jnp.float32)
    y = jnp.maximum(acc + b_ref[...], 0.0)
    return y.reshape(Hout, Wout, 64)


# ----------------------------------------------------------------------------
# Kernel 1: fused features = 3 x (Conv2d 3x3 pad=1 + BN(eval) + ReLU + MaxPool 2x2)
# ----------------------------------------------------------------------------
def _features_kernel(x_ref, w1_ref, b1_ref, w2_ref, b2_ref, w3_ref, b3_ref,
                     o_ref, pad2_ref, pad3_ref, *, T, M):
    # x_ref  : (1, T+2, M+2) bf16   zero-padded, time-major spectrogram (one example)
    # w1_ref : (9, 64) f32; b1_ref: (1, 64) f32          layer-1 (Cin=1)
    # w2_ref, w3_ref: (9, 64, 64) bf16; b2_ref, b3_ref: (1, 64) f32
    # o_ref  : (1, T8, M8, 64) bf16   (time, mel, channel) pooled features
    # pad2_ref / pad3_ref: zero-bordered VMEM scratch = padded layer-2/3 inputs.
    T2, M2 = T // 2, M // 2
    T4, M4 = T2 // 2, M2 // 2

    # Zero borders for the in-VMEM 'SAME' padding of layers 2/3.  Re-zeroed every grid
    # step (cheap) so the kernel stays correct when the batch axis is split across cores.
    pad2_ref[...] = jnp.zeros(pad2_ref.shape, pad2_ref.dtype)
    pad3_ref[...] = jnp.zeros(pad3_ref.shape, pad3_ref.dtype)

    # ---- layer 1: Conv2d(1->64) as 9 shifted VPU broadcast-FMAs (f32 epilogue) ----
    xpe = x_ref[0].astype(jnp.float32)[:, :, None]            # (T+2, M+2, 1)
    acc1 = jnp.zeros((T, M, 64), jnp.float32)
    for tap in range(9):
        dt, dm = divmod(tap, 3)
        acc1 = acc1 + xpe[dt:dt + T, dm:dm + M, :] * w1_ref[tap]
    y1 = jnp.maximum(acc1 + b1_ref[...], 0.0)
    pad2_ref[1:T2 + 1, 1:M2 + 1, :] = _maxpool_2x2(y1, T, M, 64).astype(pad2_ref.dtype)

    # ---- layer 2: Conv2d(64->64) ----
    y2 = _conv3x3_64(pad2_ref[...], w2_ref, b2_ref, T2, M2)
    pad3_ref[1:T4 + 1, 1:M4 + 1, :] = _maxpool_2x2(y2, T2, M2, 64).astype(pad3_ref.dtype)

    # ---- layer 3: Conv2d(64->64) ----
    y3 = _conv3x3_64(pad3_ref[...], w3_ref, b3_ref, T4, M4)
    o_ref[0] = _maxpool_2x2(y3, T4, M4, 64).astype(o_ref.dtype)


def features_fused(x_tm, params):
    """x_tm: (B, T, n_mels) bf16 time-major spectrogram -> (B, T//8, n_mels//8, 64) bf16."""
    B, T, M = x_tm.shape
    T2, M2 = T // 2, M // 2
    T4, M4 = T2 // 2, M2 // 2
    T8, M8 = T4 // 2, M4 // 2
    # Single tiny host-side pad of the raw 1-channel input; layers 2/3 are padded in VMEM.
    xp = jnp.pad(x_tm, ((0, 0), (1, 1), (1, 1)))
    kern = functools.partial(_features_kernel, T=T, M=M)
    return pl.pallas_call(
        kern,
        out_shape=jax.ShapeDtypeStruct((B, T8, M8, 64), jnp.bfloat16),
        grid=(B,),
        in_specs=[
            pl.BlockSpec((1, T + 2, M + 2), lambda b: (b, 0, 0)),
            pl.BlockSpec((9, 64), lambda b: (0, 0)),
            pl.BlockSpec((1, 64), lambda b: (0, 0)),
            pl.BlockSpec((9, 64, 64), lambda b: (0, 0, 0)),
            pl.BlockSpec((1, 64), lambda b: (0, 0)),
            pl.BlockSpec((9, 64, 64), lambda b: (0, 0, 0)),
            pl.BlockSpec((1, 64), lambda b: (0, 0)),
        ],
        out_specs=pl.BlockSpec((1, T8, M8, 64), lambda b: (b, 0, 0, 0)),
        scratch_shapes=[
            pltpu.VMEM((T2 + 2, M2 + 2, 64), jnp.bfloat16),
            pltpu.VMEM((T4 + 2, M4 + 2, 64), jnp.bfloat16),
        ],
        compiler_params=pltpu.CompilerParams(dimension_semantics=("parallel",)),
    )(xp, params["w0"], params["bias0"], params["w1"], params["bias1"],
      params["w2"], params["bias2"])


# ----------------------------------------------------------------------------
# Kernel 2: fc head = Linear -> ReLU -> (Dropout p=0.3: identity in eval) -> Linear -> ReLU
# ----------------------------------------------------------------------------
def _mlp_kernel(x_ref, w1_ref, b1_ref, w2_ref, b2_ref, o_ref):
    h = jnp.dot(x_ref[...], w1_ref[...], preferred_element_type=jnp.float32) + b1_ref[...]
    h = jnp.maximum(h, 0.0)                                     # bias + ReLU in f32
    y = jnp.dot(h.astype(w2_ref.dtype), w2_ref[...],
                preferred_element_type=jnp.float32) + b2_ref[...]
    o_ref[...] = jnp.maximum(y, 0.0).astype(o_ref.dtype)


def mlp(x, w1, b1, w2, b2, block_rows=512):
    """x: (N, Din) bf16; w1/b1: (Din, dp)/(1, dp); w2/b2: (dp, dp)/(1, dp) -> (N, dp) bf16.

    block_rows=512 targets v5e/v6e (128 MiB VMEM); drop to <=256 on v7x (64 MiB VMEM)."""
    N, Din = x.shape
    dp = w1.shape[-1]
    tm = min(block_rows, _round_up(max(N, 1), 8))
    n_pad = _round_up(N, tm)
    if n_pad != N:
        x = jnp.pad(x, ((0, n_pad - N), (0, 0)))

    wbytes = w1.size * w1.dtype.itemsize + w2.size * w2.dtype.itemsize
    # Large fc heads (d ~ 2-3k): keep the resident weights single-buffered so the (dp,dp)
    # matrix is not duplicated by the pipeline (critical on v7x's 64 MiB VMEM).
    single_buf_w = wbytes > (4 << 20)

    def _wspec(shape, imap):
        if single_buf_w:
            return pl.BlockSpec(shape, imap, pipeline_mode=pl.Buffered(1))
        return pl.BlockSpec(shape, imap)

    bufs = 1 if single_buf_w else 2
    vmem_need = (2 * tm * Din * x.dtype.itemsize + 2 * tm * dp * 2
                 + bufs * wbytes + 4 * dp * 4 * 2)
    cp = {"dimension_semantics": ("parallel",)}
    if vmem_need > (24 << 20):
        cp["vmem_limit_bytes"] = min(int(vmem_need * 1.25) + (8 << 20), 96 << 20)

    out = pl.pallas_call(
        _mlp_kernel,
        out_shape=jax.ShapeDtypeStruct((n_pad, dp), jnp.bfloat16),
        grid=(n_pad // tm,),
        in_specs=[
            pl.BlockSpec((tm, Din), lambda i: (i, 0)),          # row tile of activations
            _wspec((Din, dp), lambda i: (0, 0)),                # weights stay resident
            _wspec((1, dp), lambda i: (0, 0)),
            _wspec((dp, dp), lambda i: (0, 0)),
            _wspec((1, dp), lambda i: (0, 0)),
        ],
        out_specs=pl.BlockSpec((tm, dp), lambda i: (i, 0)),
        compiler_params=pltpu.CompilerParams(**cp),
    )(x, w1, b1, w2, b2)
    return out[:N]


# ----------------------------------------------------------------------------
# Full forward pass (layout plumbing in plain JAX, all compute in Pallas)
# ----------------------------------------------------------------------------
def audio_ntt2020_task6_forward(x_nchw, params, d):
    """x_nchw: (B, 1, n_mels, T), same layout as the PyTorch module. Returns (B, T//8, d)."""
    # Time-major single-channel layout (B, T, n_mels).  The 3x3/2x2 stack is symmetric in
    # its two spatial axes (weights are tap-transposed on the host), so the fused conv
    # kernel directly emits the (time, mel-major, channel-minor) feature ordering of
    # PyTorch's permute(0,3,2,1)+reshape — no HBM transpose before the fc head.
    x_tm = jnp.transpose(x_nchw[:, 0, :, :], (0, 2, 1)).astype(jnp.bfloat16)
    feat4 = features_fused(x_tm, params)                        # (B, T8, M8, 64) bf16
    B, T8, M8, C = feat4.shape
    feat = feat4.reshape(B * T8, M8 * C)                        # free: contiguous rows
    emb = mlp(feat, params["fc_w1"], params["fc_b1"], params["fc_w2"], params["fc_b2"])
    return emb[:, :d].reshape(B, T8, d)


# ----------------------------------------------------------------------------
# Deterministic synthetic parameters (matching module __init__ shapes)
# ----------------------------------------------------------------------------
def make_params(key, n_mels, d):
    """`params` is the kernel-ready (BN-folded, tap-transposed, bf16) set; `raw` keeps the
    f32 originals for the pure-JAX reference."""
    eps = 1e-5
    raw, params = {}, {}
    cins = [1, 64, 64]
    for i in range(3):
        key, k1, k2, k3, k4, k5 = jax.random.split(key, 6)
        cin = cins[i]
        conv_w = 0.1 * jax.random.normal(k1, (3, 3, cin, 64), jnp.float32)   # (mel, time, in, out)
        conv_b = 0.1 * jax.random.normal(k2, (64,), jnp.float32)
        gamma = 1.0 + 0.1 * jax.random.normal(k3, (64,), jnp.float32)
        beta = 0.1 * jax.random.normal(k4, (64,), jnp.float32)
        mean = 0.1 * jax.random.normal(k5, (64,), jnp.float32)
        var = jnp.full((64,), 1.0, jnp.float32)
        raw.update({f"conv_w{i}": conv_w, f"conv_b{i}": conv_b, f"bn_g{i}": gamma,
                    f"bn_b{i}": beta, f"bn_m{i}": mean, f"bn_v{i}": var})
        # Fold BN(eval) scale into the conv weights, everything else into one bias, and
        # transpose the spatial taps to the kernel's time-major ordering (tap = dt*3+dm).
        scale = gamma / jnp.sqrt(var + eps)
        w_k = jnp.transpose(conv_w * scale, (1, 0, 2, 3)).reshape(9, cin, 64)
        if i == 0:
            params["w0"] = w_k[:, 0, :].astype(jnp.float32)      # (9, 64) f32: VPU path
        else:
            params[f"w{i}"] = w_k.astype(jnp.bfloat16)           # (9, 64, 64): MXU path
        params[f"bias{i}"] = (beta + scale * (conv_b - mean)).reshape(1, 64)   # f32

    din = 64 * (n_mels // 8)
    dp = _round_up(d, 128)          # lane-dense fc width (zero-padded, sliced at the end)
    key, k1, k2, k3, k4 = jax.random.split(key, 5)
    fc_w1 = 0.1 * jax.random.normal(k1, (din, d), jnp.float32)
    fc_b1 = 0.1 * jax.random.normal(k2, (d,), jnp.float32)
    fc_w2 = 0.1 * jax.random.normal(k3, (d, d), jnp.float32)
    fc_b2 = 0.1 * jax.random.normal(k4, (d,), jnp.float32)
    raw.update({"fc_w1": fc_w1, "fc_b1": fc_b1, "fc_w2": fc_w2, "fc_b2": fc_b2})
    params["fc_w1"] = jnp.pad(fc_w1, ((0, 0), (0, dp - d))).astype(jnp.bfloat16)
    params["fc_b1"] = jnp.pad(fc_b1, (0, dp - d)).reshape(1, dp)
    params["fc_w2"] = jnp.pad(fc_w2, ((0, dp - d), (0, dp - d))).astype(jnp.bfloat16)
    params["fc_b2"] = jnp.pad(fc_b2, (0, dp - d)).reshape(1, dp)
    return params, raw


# Pure-JAX f32 reference (correctness sanity only)
def reference_forward(x_nchw, raw, d):
    x = jnp.transpose(x_nchw, (0, 2, 3, 1)).astype(jnp.float32)
    for i in range(3):
        y = jax.lax.conv_general_dilated(
            x, raw[f"conv_w{i}"], (1, 1), "SAME",
            dimension_numbers=("NHWC", "HWIO", "NHWC")) + raw[f"conv_b{i}"]
        y = (y - raw[f"bn_m{i}"]) / jnp.sqrt(raw[f"bn_v{i}"] + 1e-5) * raw[f"bn_g{i}"] + raw[f"bn_b{i}"]
        y = jnp.maximum(y, 0.0)
        B, H, W, C = y.shape
        x = y.reshape(B, H // 2, 2, W // 2, 2, C).max(axis=(2, 4))
    B, D_, T_, C = x.shape
    feat = jnp.transpose(x, (0, 2, 1, 3)).reshape(B, T_, D_ * C)
    h = jnp.maximum(feat @ raw["fc_w1"] + raw["fc_b1"], 0.0)
    return jnp.maximum(h @ raw["fc_w2"] + raw["fc_b2"], 0.0)


if __name__ == "__main__":
    n_mels, T, B, d = 16, 16, 2, 32
    key = jax.random.PRNGKey(0)
    key, kx = jax.random.split(key)
    x = jax.random.normal(kx, (B, 1, n_mels, T), jnp.float32)   # NCHW like PyTorch

    params, raw = make_params(key, n_mels, d)

    out = jax.block_until_ready(audio_ntt2020_task6_forward(x, params, d))
    ref = reference_forward(x, raw, d)

    assert out.shape == (B, T // 8, d), out.shape
    # bf16 matmul inputs / bf16 output (f32 accumulation) -> loosened tolerance vs f32 ref.
    err = jnp.abs(out.astype(jnp.float32) - ref)
    assert float(jnp.max(err)) < 0.25 and float(jnp.mean(err)) < 0.03, (
        float(jnp.max(err)), float(jnp.mean(err)))
    print("KERNEL_OK")
</pallas_src>

<mosaic_0001>
module attributes {stable_mosaic.version = 11 : i64} {
  func.func @_features_kernel(%arg0: i32, %arg1: memref<1x18x18xbf16, #tpu.memory_space<vmem>>, %arg2: memref<9x64xf32, #tpu.memory_space<vmem>>, %arg3: memref<1x64xf32, #tpu.memory_space<vmem>>, %arg4: memref<9x64x64xbf16, #tpu.memory_space<vmem>>, %arg5: memref<1x64xf32, #tpu.memory_space<vmem>>, %arg6: memref<9x64x64xbf16, #tpu.memory_space<vmem>>, %arg7: memref<1x64xf32, #tpu.memory_space<vmem>>, %arg8: memref<1x2x2x64xbf16, #tpu.memory_space<vmem>>, %arg9: memref<10x10x64xbf16, #tpu.memory_space<vmem>>, %arg10: memref<6x6x64xbf16, #tpu.memory_space<vmem>>) attributes {dimension_semantics = [#tpu.dimension_semantics<parallel>], iteration_bounds = array<i64: 2>, scalar_prefetch = 0 : i64, scratch_operands = 2 : i64, tpu.core_type = #tpu.core_type<tc>, window_params = [{transform_indices = @transform_0, window_bounds = array<i64: 1, 18, 18>}, {pipeline_mode = #tpu.pipeline_mode<synchronous>, transform_indices = @transform_1, window_bounds = array<i64: 9, 64>}, {pipeline_mode = #tpu.pipeline_mode<synchronous>, transform_indices = @transform_2, window_bounds = array<i64: 1, 64>}, {pipeline_mode = #tpu.pipeline_mode<synchronous>, transform_indices = @transform_3, window_bounds = array<i64: 9, 64, 64>}, {pipeline_mode = #tpu.pipeline_mode<synchronous>, transform_indices = @transform_4, window_bounds = array<i64: 1, 64>}, {pipeline_mode = #tpu.pipeline_mode<synchronous>, transform_indices = @transform_5, window_bounds = array<i64: 9, 64, 64>}, {pipeline_mode = #tpu.pipeline_mode<synchronous>, transform_indices = @transform_6, window_bounds = array<i64: 1, 64>}, {transform_indices = @transform_7, window_bounds = array<i64: 1, 2, 2, 64>}]} {
    %cst = arith.constant 0.000000e+00 : bf16
    %0 = vector.broadcast %cst : bf16 to vector<10x10x64xbf16>
    %c0 = arith.constant 0 : index
    %c0_0 = arith.constant 0 : index
    %c0_1 = arith.constant 0 : index
    %1 = vector.load %arg9[%c0, %c0_0, %c0_1] : memref<10x10x64xbf16, #tpu.memory_space<vmem>>, vector<10x10x64xbf16>
    tpu.vector_store %arg9[%c0, %c0_0, %c0_1], %0 {strides = array<i32>} : memref<10x10x64xbf16, #tpu.memory_space<vmem>>, vector<10x10x64xbf16>,
    %cst_2 = arith.constant 0.000000e+00 : bf16
    %2 = vector.broadcast %cst_2 : bf16 to vector<6x6x64xbf16>
    %c0_3 = arith.constant 0 : index
    %c0_4 = arith.constant 0 : index
    %c0_5 = arith.constant 0 : index
    %3 = vector.load %arg10[%c0_3, %c0_4, %c0_5] : memref<6x6x64xbf16, #tpu.memory_space<vmem>>, vector<6x6x64xbf16>
    tpu.vector_store %arg10[%c0_3, %c0_4, %c0_5], %2 {strides = array<i32>} : memref<6x6x64xbf16, #tpu.memory_space<vmem>>, vector<6x6x64xbf16>,
    %c0_6 = arith.constant 0 : index
    %c0_7 = arith.constant 0 : index
    %c0_8 = arith.constant 0 : index
    %4 = vector.load %arg1[%c0_6, %c0_7, %c0_8] : memref<1x18x18xbf16, #tpu.memory_space<vmem>>, vector<1x18x18xbf16>
    %5 = vector.shape_cast %4 : vector<1x18x18xbf16> to vector<18x18xbf16>
    %6 = arith.extf %5 : vector<18x18xbf16> to vector<18x18xf32>
    %7 = vector.shape_cast %6 : vector<18x18xf32> to vector<18x18x1xf32>
    %cst_9 = arith.constant 0.000000e+00 : f32
    %8 = vector.broadcast %cst_9 : f32 to vector<16x16x64xf32>
    %9 = vector.extract_strided_slice %7 {offsets = [0, 0, 0], sizes = [16, 16, 1], strides = [1, 1, 1]} : vector<18x18x1xf32> to vector<16x16x1xf32>
    %c0_10 = arith.constant 0 : index
    %c0_11 = arith.constant 0 : index
    %10 = vector.load %arg2[%c0_10, %c0_11] : memref<9x64xf32, #tpu.memory_space<vmem>>, vector<1x64xf32>
    %11 = vector.shape_cast %10 : vector<1x64xf32> to vector<64xf32>
    %12 = vector.shape_cast %11 : vector<64xf32> to vector<1x1x64xf32>
    %13 = vector.broadcast %9 : vector<16x16x1xf32> to vector<16x16x64xf32>
    %14 = vector.broadcast %12 : vector<1x1x64xf32> to vector<16x16x64xf32>
    %15 = arith.mulf %13, %14 : vector<16x16x64xf32>
    %16 = arith.addf %8, %15 : vector<16x16x64xf32>
    %17 = vector.extract_strided_slice %7 {offsets = [0, 1, 0], sizes = [16, 16, 1], strides = [1, 1, 1]} : vector<18x18x1xf32> to vector<16x16x1xf32>
    %c1 = arith.constant 1 : index
    %c0_12 = arith.constant 0 : index
    %18 = vector.load %arg2[%c1, %c0_12] : memref<9x64xf32, #tpu.memory_space<vmem>>, vector<1x64xf32>
    %19 = vector.shape_cast %18 : vector<1x64xf32> to vector<64xf32>
    %20 = vector.shape_cast %19 : vector<64xf32> to vector<1x1x64xf32>
    %21 = vector.broadcast %17 : vector<16x16x1xf32> to vector<16x16x64xf32>
    %22 = vector.broadcast %20 : vector<1x1x64xf32> to vector<16x16x64xf32>
    %23 = arith.mulf %21, %22 : vector<16x16x64xf32>
    %24 = arith.addf %16, %23 : vector<16x16x64xf32>
    %25 = vector.extract_strided_slice %7 {offsets = [0, 2, 0], sizes = [16, 16, 1], strides = [1, 1, 1]} : vector<18x18x1xf32> to vector<16x16x1xf32>
    %c2 = arith.constant 2 : index
    %c0_13 = arith.constant 0 : index
    %26 = vector.load %arg2[%c2, %c0_13] : memref<9x64xf32, #tpu.memory_space<vmem>>, vector<1x64xf32>
    %27 = vector.shape_cast %26 : vector<1x64xf32> to vector<64xf32>
    %28 = vector.shape_cast %27 : vector<64xf32> to vector<1x1x64xf32>
    %29 = vector.broadcast %25 : vector<16x16x1xf32> to vector<16x16x64xf32>
    %30 = vector.broadcast %28 : vector<1x1x64xf32> to vector<16x16x64xf32>
    %31 = arith.mulf %29, %30 : vector<16x16x64xf32>
    %32 = arith.addf %24, %31 : vector<16x16x64xf32>
    %33 = vector.extract_strided_slice %7 {offsets = [1, 0, 0], sizes = [16, 16, 1], strides = [1, 1, 1]} : vector<18x18x1xf32> to vector<16x16x1xf32>
    %c3 = arith.constant 3 : index
    %c0_14 = arith.constant 0 : index
    %34 = vector.load %arg2[%c3, %c0_14] : memref<9x64xf32, #tpu.memory_space<vmem>>, vector<1x64xf32>
    %35 = vector.shape_cast %34 : vector<1x64xf32> to vector<64xf32>
    %36 = vector.shape_cast %35 : vector<64xf32> to vector<1x1x64xf32>
    %37 = vector.broadcast %33 : vector<16x16x1xf32> to vector<16x16x64xf32>
    %38 = vector.broadcast %36 : vector<1x1x64xf32> to vector<16x16x64xf32>
    %39 = arith.mulf %37, %38 : vector<16x16x64xf32>
    %40 = arith.addf %32, %39 : vector<16x16x64xf32>
    %41 = vector.extract_strided_slice %7 {offsets = [1, 1, 0], sizes = [16, 16, 1], strides = [1, 1, 1]} : vector<18x18x1xf32> to vector<16x16x1xf32>
    %c4 = arith.constant 4 : index
    %c0_15 = arith.constant 0 : index
    %42 = vector.load %arg2[%c4, %c0_15] : memref<9x64xf32, #tpu.memory_space<vmem>>, vector<1x64xf32>
    %43 = vector.shape_cast %42 : vector<1x64xf32> to vector<64xf32>
    %44 = vector.shape_cast %43 : vector<64xf32> to vector<1x1x64xf32>
    %45 = vector.broadcast %41 : vector<16x16x1xf32> to vector<16x16x64xf32>
    %46 = vector.broadcast %44 : vector<1x1x64xf32> to vector<16x16x64xf32>
    %47 = arith.mulf %45, %46 : vector<16x16x64xf32>
    %48 = arith.addf %40, %47 : vector<16x16x64xf32>
    %49 = vector.extract_strided_slice %7 {offsets = [1, 2, 0], sizes = [16, 16, 1], strides = [1, 1, 1]} : vector<18x18x1xf32> to vector<16x16x1xf32>
    %c5 = arith.constant 5 : index
    %c0_16 = arith.constant 0 : index
    %50 = vector.load %arg2[%c5, %c0_16] : memref<9x64xf32, #tpu.memory_space<vmem>>, vector<1x64xf32>
    %51 = vector.shape_cast %50 : vector<1x64xf32> to vector<64xf32>
    %52 = vector.shape_cast %51 : vector<64xf32> to vector<1x1x64xf32>
    %53 = vector.broadcast %49 : vector<16x16x1xf32> to vector<16x16x64xf32>
    %54 = vector.broadcast %52 : vector<1x1x64xf32> to vector<16x16x64xf32>
    %55 = arith.mulf %53, %54 : vector<16x16x64xf32>
    %56 = arith.addf %48, %55 : vector<16x16x64xf32>
    %57 = vector.extract_strided_slice %7 {offsets = [2, 0, 0], sizes = [16, 16, 1], strides = [1, 1, 1]} : vector<18x18x1xf32> to vector<16x16x1xf32>
    %c6 = arith.constant 6 : index
    %c0_17 = arith.constant 0 : index
    %58 = vector.load %arg2[%c6, %c0_17] : memref<9x64xf32, #tpu.memory_space<vmem>>, vector<1x64xf32>
    %59 = vector.shape_cast %58 : vector<1x64xf32> to vector<64xf32>
    %60 = vector.shape_cast %59 : vector<64xf32> to vector<1x1x64xf32>
    %61 = vector.broadcast %57 : vector<16x16x1xf32> to vector<16x16x64xf32>
    %62 = vector.broadcast %60 : vector<1x1x64xf32> to vector<16x16x64xf32>
    %63 = arith.mulf %61, %62 : vector<16x16x64xf32>
    %64 = arith.addf %56, %63 : vector<16x16x64xf32>
    %65 = vector.extract_strided_slice %7 {offsets = [2, 1, 0], sizes = [16, 16, 1], strides = [1, 1, 1]} : vector<18x18x1xf32> to vector<16x16x1xf32>
    %c7 = arith.constant 7 : index
    %c0_18 = arith.constant 0 : index
    %66 = vector.load %arg2[%c7, %c0_18] : memref<9x64xf32, #tpu.memory_space<vmem>>, vector<1x64xf32>
    %67 = vector.shape_cast %66 : vector<1x64xf32> to vector<64xf32>
    %68 = vector.shape_cast %67 : vector<64xf32> to vector<1x1x64xf32>
    %69 = vector.broadcast %65 : vector<16x16x1xf32> to vector<16x16x64xf32>
    %70 = vector.broadcast %68 : vector<1x1x64xf32> to vector<16x16x64xf32>
    %71 = arith.mulf %69, %70 : vector<16x16x64xf32>
    %72 = arith.addf %64, %71 : vector<16x16x64xf32>
    %73 = vector.extract_strided_slice %7 {offsets = [2, 2, 0], sizes = [16, 16, 1], strides = [1, 1, 1]} : vector<18x18x1xf32> to vector<16x16x1xf32>
    %c8 = arith.constant 8 : index
    %c0_19 = arith.constant 0 : index
    %74 = vector.load %arg2[%c8, %c0_19] : memref<9x64xf32, #tpu.memory_space<vmem>>, vector<1x64xf32>
    %75 = vector.shape_cast %74 : vector<1x64xf32> to vector<64xf32>
    %76 = vector.shape_cast %75 : vector<64xf32> to vector<1x1x64xf32>
    %77 = vector.broadcast %73 : vector<16x16x1xf32> to vector<16x16x64xf32>
    %78 = vector.broadcast %76 : vector<1x1x64xf32> to vector<16x16x64xf32>
    %79 = arith.mulf %77, %78 : vector<16x16x64xf32>
    %80 = arith.addf %72, %79 : vector<16x16x64xf32>
    %c0_20 = arith.constant 0 : index
    %c0_21 = arith.constant 0 : index
    %81 = vector.load %arg3[%c0_20, %c0_21] : memref<1x64xf32, #tpu.memory_space<vmem>>, vector<1x64xf32>
    %82 = vector.shape_cast %81 : vector<1x64xf32> to vector<1x1x64xf32>
    %83 = vector.broadcast %82 : vector<1x1x64xf32> to vector<16x16x64xf32>
    %84 = arith.addf %80, %83 : vector<16x16x64xf32>
    %cst_22 = arith.constant 0.000000e+00 : f32
    %85 = vector.broadcast %cst_22 : f32 to vector<16x16x64xf32>
    %86 = arith.maximumf %84, %85 : vector<16x16x64xf32>
    %87 = vector.shape_cast %86 : vector<16x16x64xf32> to vector<8x2x16x64xf32>
    %cst_23 = arith.constant dense<0xFF800000> : vector<8x16x64xf32>
    %88 = vector.multi_reduction <maximumf>, %87, %cst_23 [1] : vector<8x2x16x64xf32> to vector<8x16x64xf32>
    %89 = vector.shape_cast %88 : vector<8x16x64xf32> to vector<8x8x2x64xf32>
    %cst_24 = arith.constant dense<0xFF800000> : vector<8x8x64xf32>
    %90 = vector.multi_reduction <maximumf>, %89, %cst_24 [2] : vector<8x8x2x64xf32> to vector<8x8x64xf32>
    %91 = arith.truncf %90 : vector<8x8x64xf32> to vector<8x8x64xbf16>
    %c1_25 = arith.constant 1 : index
    %c1_26 = arith.constant 1 : index
    %c0_27 = arith.constant 0 : index
    %92 = vector.load %arg9[%c1_25, %c1_26, %c0_27] : memref<10x10x64xbf16, #tpu.memory_space<vmem>>, vector<8x8x64xbf16>
    tpu.vector_store %arg9[%c1_25, %c1_26, %c0_27], %91 {strides = array<i32>} : memref<10x10x64xbf16, #tpu.memory_space<vmem>>, vector<8x8x64xbf16>,
    %c0_28 = arith.constant 0 : index
    %c0_29 = arith.constant 0 : index
    %c0_30 = arith.constant 0 : index
    %93 = vector.load %arg9[%c0_28, %c0_29, %c0_30] : memref<10x10x64xbf16, #tpu.memory_space<vmem>>, vector<10x10x64xbf16>
    %cst_31 = arith.constant 0.000000e+00 : f32
    %94 = vector.broadcast %cst_31 : f32 to vector<64x64xf32>
    %95 = vector.extract_strided_slice %93 {offsets = [0, 0, 0], sizes = [8, 8, 64], strides = [1, 1, 1]} : vector<10x10x64xbf16> to vector<8x8x64xbf16>
    %96 = vector.shape_cast %95 : vector<8x8x64xbf16> to vector<64x64xbf16>
    %c0_32 = arith.constant 0 : index
    %c0_33 = arith.constant 0 : index
    %c0_34 = arith.constant 0 : index
    %97 = vector.load %arg4[%c0_32, %c0_33, %c0_34] : memref<9x64x64xbf16, #tpu.memory_space<vmem>>, vector<1x64x64xbf16>
    %98 = vector.shape_cast %97 : vector<1x64x64xbf16> to vector<64x64xbf16>
    %cst_35 = arith.constant dense<0.000000e+00> : vector<64x64xf32>
    %99 = tpu.matmul %96, %98, %cst_35 {dimension_numbers = #tpu.dot_dimension_numbers<[1], [0], [0], [1], [0, 0, 1, 1], [], []>} : vector<64x64xbf16>, vector<64x64xbf16>, vector<64x64xf32> -> vector<64x64xf32>
    %100 = arith.addf %94, %99 : vector<64x64xf32>
    %101 = vector.extract_strided_slice %93 {offsets = [0, 1, 0], sizes = [8, 8, 64], strides = [1, 1, 1]} : vector<10x10x64xbf16> to vector<8x8x64xbf16>
    %102 = vector.shape_cast %101 : vector<8x8x64xbf16> to vector<64x64xbf16>
    %c1_36 = arith.constant 1 : index
    %c0_37 = arith.constant 0 : index
    %c0_38 = arith.constant 0 : index
    %103 = vector.load %arg4[%c1_36, %c0_37, %c0_38] : memref<9x64x64xbf16, #tpu.memory_space<vmem>>, vector<1x64x64xbf16>
    %104 = vector.shape_cast %103 : vector<1x64x64xbf16> to vector<64x64xbf16>
    %cst_39 = arith.constant dense<0.000000e+00> : vector<64x64xf32>
    %105 = tpu.matmul %102, %104, %cst_39 {dimension_numbers = #tpu.dot_dimension_numbers<[1], [0], [0], [1], [0, 0, 1, 1], [], []>} : vector<64x64xbf16>, vector<64x64xbf16>, vector<64x64xf32> -> vector<64x64xf32>
    %106 = arith.addf %100, %105 : vector<64x64xf32>
    %107 = vector.extract_strided_slice %93 {offsets = [0, 2, 0], sizes = [8, 8, 64], strides = [1, 1, 1]} : vector<10x10x64xbf16> to vector<8x8x64xbf16>
    %108 = vector.shape_cast %107 : vector<8x8x64xbf16> to vector<64x64xbf16>
    %c2_40 = arith.constant 2 : index
    %c0_41 = arith.constant 0 : index
    %c0_42 = arith.constant 0 : index
    %109 = vector.load %arg4[%c2_40, %c0_41, %c0_42] : memref<9x64x64xbf16, #tpu.memory_space<vmem>>, vector<1x64x64xbf16>
    %110 = vector.shape_cast %109 : vector<1x64x64xbf16> to vector<64x64xbf16>
    %cst_43 = arith.constant dense<0.000000e+00> : vector<64x64xf32>
    %111 = tpu.matmul %108, %110, %cst_43 {dimension_numbers = #tpu.dot_dimension_numbers<[1], [0], [0], [1], [0, 0, 1, 1], [], []>} : vector<64x64xbf16>, vector<64x64xbf16>, vector<64x64xf32> -> vector<64x64xf32>
    %112 = arith.addf %106, %111 : vector<64x64xf32>
    %113 = vector.extract_strided_slice %93 {offsets = [1, 0, 0], sizes = [8, 8, 64], strides = [1, 1, 1]} : vector<10x10x64xbf16> to vector<8x8x64xbf16>
    %114 = vector.shape_cast %113 : vector<8x8x64xbf16> to vector<64x64xbf16>
    %c3_44 = arith.constant 3 : index
    %c0_45 = arith.constant 0 : index
    %c0_46 = arith.constant 0 : index
    %115 = vector.load %arg4[%c3_44, %c0_45, %c0_46] : memref<9x64x64xbf16, #tpu.memory_space<vmem>>, vector<1x64x64xbf16>
    %116 = vector.shape_cast %115 : vector<1x64x64xbf16> to vector<64x64xbf16>
    %cst_47 = arith.constant dense<0.000000e+00> : vector<64x64xf32>
    %117 = tpu.matmul %114, %116, %cst_47 {dimension_numbers = #tpu.dot_dimension_numbers<[1], [0], [0], [1], [0, 0, 1, 1], [], []>} : vector<64x64xbf16>, vector<64x64xbf16>, vector<64x64xf32> -> vector<64x64xf32>
    %118 = arith.addf %112, %117 : vector<64x64xf32>
    %119 = vector.extract_strided_slice %93 {offsets = [1, 1, 0], sizes = [8, 8, 64], strides = [1, 1, 1]} : vector<10x10x64xbf16> to vector<8x8x64xbf16>
    %120 = vector.shape_cast %119 : vector<8x8x64xbf16> to vector<64x64xbf16>
    %c4_48 = arith.constant 4 : index
    %c0_49 = arith.constant 0 : index
    %c0_50 = arith.constant 0 : index
    %121 = vector.load %arg4[%c4_48, %c0_49, %c0_50] : memref<9x64x64xbf16, #tpu.memory_space<vmem>>, vector<1x64x64xbf16>
    %122 = vector.shape_cast %121 : vector<1x64x64xbf16> to vector<64x64xbf16>
    %cst_51 = arith.constant dense<0.000000e+00> : vector<64x64xf32>
    %123 = tpu.matmul %120, %122, %cst_51 {dimension_numbers = #tpu.dot_dimension_numbers<[1], [0], [0], [1], [0, 0, 1, 1], [], []>} : vector<64x64xbf16>, vector<64x64xbf16>, vector<64x64xf32> -> vector<64x64xf32>
    %124 = arith.addf %118, %123 : vector<64x64xf32>
    %125 = vector.extract_strided_slice %93 {offsets = [1, 2, 0], sizes = [8, 8, 64], strides = [1, 1, 1]} : vector<10x10x64xbf16> to vector<8x8x64xbf16>
    %126 = vector.shape_cast %125 : vector<8x8x64xbf16> to vector<64x64xbf16>
    %c5_52 = arith.constant 5 : index
    %c0_53 = arith.constant 0 : index
    %c0_54 = arith.constant 0 : index
    %127 = vector.load %arg4[%c5_52, %c0_53, %c0_54] : memref<9x64x64xbf16, #tpu.memory_space<vmem>>, vector<1x64x64xbf16>
    %128 = vector.shape_cast %127 : vector<1x64x64xbf16> to vector<64x64xbf16>
    %cst_55 = arith.constant dense<0.000000e+00> : vector<64x64xf32>
    %129 = tpu.matmul %126, %128, %cst_55 {dimension_numbers = #tpu.dot_dimension_numbers<[1], [0], [0], [1], [0, 0, 1, 1], [], []>} : vector<64x64xbf16>, vector<64x64xbf16>, vector<64x64xf32> -> vector<64x64xf32>
    %130 = arith.addf %124, %129 : vector<64x64xf32>
    %131 = vector.extract_strided_slice %93 {offsets = [2, 0, 0], sizes = [8, 8, 64], strides = [1, 1, 1]} : vector<10x10x64xbf16> to vector<8x8x64xbf16>
    %132 = vector.shape_cast %131 : vector<8x8x64xbf16> to vector<64x64xbf16>
    %c6_56 = arith.constant 6 : index
    %c0_57 = arith.constant 0 : index
    %c0_58 = arith.constant 0 : index
    %133 = vector.load %arg4[%c6_56, %c0_57, %c0_58] : memref<9x64x64xbf16, #tpu.memory_space<vmem>>, vector<1x64x64xbf16>
    %134 = vector.shape_cast %133 : vector<1x64x64xbf16> to vector<64x64xbf16>
    %cst_59 = arith.constant dense<0.000000e+00> : vector<64x64xf32>
    %135 = tpu.matmul %132, %134, %cst_59 {dimension_numbers = #tpu.dot_dimension_numbers<[1], [0], [0], [1], [0, 0, 1, 1], [], []>} : vector<64x64xbf16>, vector<64x64xbf16>, vector<64x64xf32> -> vector<64x64xf32>
    %136 = arith.addf %130, %135 : vector<64x64xf32>
    %137 = vector.extract_strided_slice %93 {offsets = [2, 1, 0], sizes = [8, 8, 64], strides = [1, 1, 1]} : vector<10x10x64xbf16> to vector<8x8x64xbf16>
    %138 = vector.shape_cast %137 : vector<8x8x64xbf16> to vector<64x64xbf16>
    %c7_60 = arith.constant 7 : index
    %c0_61 = arith.constant 0 : index
    %c0_62 = arith.constant 0 : index
    %139 = vector.load %arg4[%c7_60, %c0_61, %c0_62] : memref<9x64x64xbf16, #tpu.memory_space<vmem>>, vector<1x64x64xbf16>
    %140 = vector.shape_cast %139 : vector<1x64x64xbf16> to vector<64x64xbf16>
    %cst_63 = arith.constant dense<0.000000e+00> : vector<64x64xf32>
    %141 = tpu.matmul %138, %140, %cst_63 {dimension_numbers = #tpu.dot_dimension_numbers<[1], [0], [0], [1], [0, 0, 1, 1], [], []>} : vector<64x64xbf16>, vector<64x64xbf16>, vector<64x64xf32> -> vector<64x64xf32>
    %142 = arith.addf %136, %141 : vector<64x64xf32>
    %143 = vector.extract_strided_slice %93 {offsets = [2, 2, 0], sizes = [8, 8, 64], strides = [1, 1, 1]} : vector<10x10x64xbf16> to vector<8x8x64xbf16>
    %144 = vector.shape_cast %143 : vector<8x8x64xbf16> to vector<64x64xbf16>
    %c8_64 = arith.constant 8 : index
    %c0_65 = arith.constant 0 : index
    %c0_66 = arith.constant 0 : index
    %145 = vector.load %arg4[%c8_64, %c0_65, %c0_66] : memref<9x64x64xbf16, #tpu.memory_space<vmem>>, vector<1x64x64xbf16>
    %146 = vector.shape_cast %145 : vector<1x64x64xbf16> to vector<64x64xbf16>
    %cst_67 = arith.constant dense<0.000000e+00> : vector<64x64xf32>
    %147 = tpu.matmul %144, %146, %cst_67 {dimension_numbers = #tpu.dot_dimension_numbers<[1], [0], [0], [1], [0, 0, 1, 1], [], []>} : vector<64x64xbf16>, vector<64x64xbf16>, vector<64x64xf32> -> vector<64x64xf32>
    %148 = arith.addf %142, %147 : vector<64x64xf32>
    %c0_68 = arith.constant 0 : index
    %c0_69 = arith.constant 0 : index
    %149 = vector.load %arg5[%c0_68, %c0_69] : memref<1x64xf32, #tpu.memory_space<vmem>>, vector<1x64xf32>
    %150 = vector.broadcast %149 : vector<1x64xf32> to vector<64x64xf32>
    %151 = arith.addf %148, %150 : vector<64x64xf32>
    %cst_70 = arith.constant 0.000000e+00 : f32
    %152 = vector.broadcast %cst_70 : f32 to vector<64x64xf32>
    %153 = arith.maximumf %151, %152 : vector<64x64xf32>
    %154 = vector.shape_cast %153 : vector<64x64xf32> to vector<8x8x64xf32>
    %155 = vector.shape_cast %154 : vector<8x8x64xf32> to vector<4x2x8x64xf32>
    %cst_71 = arith.constant dense<0xFF800000> : vector<4x8x64xf32>
    %156 = vector.multi_reduction <maximumf>, %155, %cst_71 [1] : vector<4x2x8x64xf32> to vector<4x8x64xf32>
    %157 = vector.shape_cast %156 : vector<4x8x64xf32> to vector<4x4x2x64xf32>
    %cst_72 = arith.constant dense<0xFF800000> : vector<4x4x64xf32>
    %158 = vector.multi_reduction <maximumf>, %157, %cst_72 [2] : vector<4x4x2x64xf32> to vector<4x4x64xf32>
    %159 = arith.truncf %158 : vector<4x4x64xf32> to vector<4x4x64xbf16>
    %c1_73 = arith.constant 1 : index
    %c1_74 = arith.constant 1 : index
    %c0_75 = arith.constant 0 : index
    %160 = vector.load %arg10[%c1_73, %c1_74, %c0_75] : memref<6x6x64xbf16, #tpu.memory_space<vmem>>, vector<4x4x64xbf16>
    tpu.vector_store %arg10[%c1_73, %c1_74, %c0_75], %159 {strides = array<i32>} : memref<6x6x64xbf16, #tpu.memory_space<vmem>>, vector<4x4x64xbf16>,
    %c0_76 = arith.constant 0 : index
    %c0_77 = arith.constant 0 : index
    %c0_78 = arith.constant 0 : index
    %161 = vector.load %arg10[%c0_76, %c0_77, %c0_78] : memref<6x6x64xbf16, #tpu.memory_space<vmem>>, vector<6x6x64xbf16>
    %cst_79 = arith.constant 0.000000e+00 : f32
    %162 = vector.broadcast %cst_79 : f32 to vector<16x64xf32>
    %163 = vector.extract_strided_slice %161 {offsets = [0, 0, 0], sizes = [4, 4, 64], strides = [1, 1, 1]} : vector<6x6x64xbf16> to vector<4x4x64xbf16>
    %164 = vector.shape_cast %163 : vector<4x4x64xbf16> to vector<16x64xbf16>
    %c0_80 = arith.constant 0 : index
    %c0_81 = arith.constant 0 : index
    %c0_82 = arith.constant 0 : index
    %165 = vector.load %arg6[%c0_80, %c0_81, %c0_82] : memref<9x64x64xbf16, #tpu.memory_space<vmem>>, vector<1x64x64xbf16>
    %166 = vector.shape_cast %165 : vector<1x64x64xbf16> to vector<64x64xbf16>
    %cst_83 = arith.constant dense<0.000000e+00> : vector<16x64xf32>
    %167 = tpu.matmul %164, %166, %cst_83 {dimension_numbers = #tpu.dot_dimension_numbers<[1], [0], [0], [1], [0, 0, 1, 1], [], []>} : vector<16x64xbf16>, vector<64x64xbf16>, vector<16x64xf32> -> vector<16x64xf32>
    %168 = arith.addf %162, %167 : vector<16x64xf32>
    %169 = vector.extract_strided_slice %161 {offsets = [0, 1, 0], sizes = [4, 4, 64], strides = [1, 1, 1]} : vector<6x6x64xbf16> to vector<4x4x64xbf16>
    %170 = vector.shape_cast %169 : vector<4x4x64xbf16> to vector<16x64xbf16>
    %c1_84 = arith.constant 1 : index
    %c0_85 = arith.constant 0 : index
    %c0_86 = arith.constant 0 : index
    %171 = vector.load %arg6[%c1_84, %c0_85, %c0_86] : memref<9x64x64xbf16, #tpu.memory_space<vmem>>, vector<1x64x64xbf16>
    %172 = vector.shape_cast %171 : vector<1x64x64xbf16> to vector<64x64xbf16>
    %cst_87 = arith.constant dense<0.000000e+00> : vector<16x64xf32>
    %173 = tpu.matmul %170, %172, %cst_87 {dimension_numbers = #tpu.dot_dimension_numbers<[1], [0], [0], [1], [0, 0, 1, 1], [], []>} : vector<16x64xbf16>, vector<64x64xbf16>, vector<16x64xf32> -> vector<16x64xf32>
    %174 = arith.addf %168, %173 : vector<16x64xf32>
    %175 = vector.extract_strided_slice %161 {offsets = [0, 2, 0], sizes = [4, 4, 64], strides = [1, 1, 1]} : vector<6x6x64xbf16> to vector<4x4x64xbf16>
    %176 = vector.shape_cast %175 : vector<4x4x64xbf16> to vector<16x64xbf16>
    %c2_88 = arith.constant 2 : index
    %c0_89 = arith.constant 0 : index
    %c0_90 = arith.constant 0 : index
    %177 = vector.load %arg6[%c2_88, %c0_89, %c0_90] : memref<9x64x64xbf16, #tpu.memory_space<vmem>>, vector<1x64x64xbf16>
    %178 = vector.shape_cast %177 : vector<1x64x64xbf16> to vector<64x64xbf16>
    %cst_91 = arith.constant dense<0.000000e+00> : vector<16x64xf32>
    %179 = tpu.matmul %176, %178, %cst_91 {dimension_numbers = #tpu.dot_dimension_numbers<[1], [0], [0], [1], [0, 0, 1, 1], [], []>} : vector<16x64xbf16>, vector<64x64xbf16>, vector<16x64xf32> -> vector<16x64xf32>
    %180 = arith.addf %174, %179 : vector<16x64xf32>
    %181 = vector.extract_strided_slice %161 {offsets = [1, 0, 0], sizes = [4, 4, 64], strides = [1, 1, 1]} : vector<6x6x64xbf16> to vector<4x4x64xbf16>
    %182 = vector.shape_cast %181 : vector<4x4x64xbf16> to vector<16x64xbf16>
    %c3_92 = arith.constant 3 : index
    %c0_93 = arith.constant 0 : index
    %c0_94 = arith.constant 0 : index
    %183 = vector.load %arg6[%c3_92, %c0_93, %c0_94] : memref<9x64x64xbf16, #tpu.memory_space<vmem>>, vector<1x64x64xbf16>
    %184 = vector.shape_cast %183 : vector<1x64x64xbf16> to vector<64x64xbf16>
    %cst_95 = arith.constant dense<0.000000e+00> : vector<16x64xf32>
    %185 = tpu.matmul %182, %184, %cst_95 {dimension_numbers = #tpu.dot_dimension_numbers<[1], [0], [0], [1], [0, 0, 1, 1], [], []>} : vector<16x64xbf16>, vector<64x64xbf16>, vector<16x64xf32> -> vector<16x64xf32>
    %186 = arith.addf %180, %185 : vector<16x64xf32>
    %187 = vector.extract_strided_slice %161 {offsets = [1, 1, 0], sizes = [4, 4, 64], strides = [1, 1, 1]} : vector<6x6x64xbf16> to vector<4x4x64xbf16>
    %188 = vector.shape_cast %187 : vector<4x4x64xbf16> to vector<16x64xbf16>
    %c4_96 = arith.constant 4 : index
    %c0_97 = arith.constant 0 : index
    %c0_98 = arith.constant 0 : index
    %189 = vector.load %arg6[%c4_96, %c0_97, %c0_98] : memref<9x64x64xbf16, #tpu.memory_space<vmem>>, vector<1x64x64xbf16>
    %190 = vector.shape_cast %189 : vector<1x64x64xbf16> to vector<64x64xbf16>
    %cst_99 = arith.constant dense<0.000000e+00> : vector<16x64xf32>
    %191 = tpu.matmul %188, %190, %cst_99 {dimension_numbers = #tpu.dot_dimension_numbers<[1], [0], [0], [1], [0, 0, 1, 1], [], []>} : vector<16x64xbf16>, vector<64x64xbf16>, vector<16x64xf32> -> vector<16x64xf32>
    %192 = arith.addf %186, %191 : vector<16x64xf32>
    %193 = vector.extract_strided_slice %161 {offsets = [1, 2, 0], sizes = [4, 4, 64], strides = [1, 1, 1]} : vector<6x6x64xbf16> to vector<4x4x64xbf16>
    %194 = vector.shape_cast %193 : vector<4x4x64xbf16> to vector<16x64xbf16>
    %c5_100 = arith.constant 5 : index
    %c0_101 = arith.constant 0 : index
    %c0_102 = arith.constant 0 : index
    %195 = vector.load %arg6[%c5_100, %c0_101, %c0_102] : memref<9x64x64xbf16, #tpu.memory_space<vmem>>, vector<1x64x64xbf16>
    %196 = vector.shape_cast %195 : vector<1x64x64xbf16> to vector<64x64xbf16>
    %cst_103 = arith.constant dense<0.000000e+00> : vector<16x64xf32>
    %197 = tpu.matmul %194, %196, %cst_103 {dimension_numbers = #tpu.dot_dimension_numbers<[1], [0], [0], [1], [0, 0, 1, 1], [], []>} : vector<16x64xbf16>, vector<64x64xbf16>, vector<16x64xf32> -> vector<16x64xf32>
    %198 = arith.addf %192, %197 : vector<16x64xf32>
    %199 = vector.extract_strided_slice %161 {offsets = [2, 0, 0], sizes = [4, 4, 64], strides = [1, 1, 1]} : vector<6x6x64xbf16> to vector<4x4x64xbf16>
    %200 = vector.shape_cast %199 : vector<4x4x64xbf16> to vector<16x64xbf16>
    %c6_104 = arith.constant 6 : index
    %c0_105 = arith.constant 0 : index
    %c0_106 = arith.constant 0 : index
    %201 = vector.load %arg6[%c6_104, %c0_105, %c0_106] : memref<9x64x64xbf16, #tpu.memory_space<vmem>>, vector<1x64x64xbf16>
    %202 = vector.shape_cast %201 : vector<1x64x64xbf16> to vector<64x64xbf16>
    %cst_107 = arith.constant dense<0.000000e+00> : vector<16x64xf32>
    %203 = tpu.matmul %200, %202, %cst_107 {dimension_numbers = #tpu.dot_dimension_numbers<[1], [0], [0], [1], [0, 0, 1, 1], [], []>} : vector<16x64xbf16>, vector<64x64xbf16>, vector<16x64xf32> -> vector<16x64xf32>
    %204 = arith.addf %198, %203 : vector<16x64xf32>
    %205 = vector.extract_strided_slice %161 {offsets = [2, 1, 0], sizes = [4, 4, 64], strides = [1, 1, 1]} : vector<6x6x64xbf16> to vector<4x4x64xbf16>
    %206 = vector.shape_cast %205 : vector<4x4x64xbf16> to vector<16x64xbf16>
    %c7_108 = arith.constant 7 : index
    %c0_109 = arith.constant 0 : index
    %c0_110 = arith.constant 0 : index
    %207 = vector.load %arg6[%c7_108, %c0_109, %c0_110] : memref<9x64x64xbf16, #tpu.memory_space<vmem>>, vector<1x64x64xbf16>
    %208 = vector.shape_cast %207 : vector<1x64x64xbf16> to vector<64x64xbf16>
    %cst_111 = arith.constant dense<0.000000e+00> : vector<16x64xf32>
    %209 = tpu.matmul %206, %208, %cst_111 {dimension_numbers = #tpu.dot_dimension_numbers<[1], [0], [0], [1], [0, 0, 1, 1], [], []>} : vector<16x64xbf16>, vector<64x64xbf16>, vector<16x64xf32> -> vector<16x64xf32>
    %210 = arith.addf %204, %209 : vector<16x64xf32>
    %211 = vector.extract_strided_slice %161 {offsets = [2, 2, 0], sizes = [4, 4, 64], strides = [1, 1, 1]} : vector<6x6x64xbf16> to vector<4x4x64xbf16>
    %212 = vector.shape_cast %211 : vector<4x4x64xbf16> to vector<16x64xbf16>
    %c8_112 = arith.constant 8 : index
    %c0_113 = arith.constant 0 : index
    %c0_114 = arith.constant 0 : index
    %213 = vector.load %arg6[%c8_112, %c0_113, %c0_114] : memref<9x64x64xbf16, #tpu.memory_space<vmem>>, vector<1x64x64xbf16>
    %214 = vector.shape_cast %213 : vector<1x64x64xbf16> to vector<64x64xbf16>
    %cst_115 = arith.constant dense<0.000000e+00> : vector<16x64xf32>
    %215 = tpu.matmul %212, %214, %cst_115 {dimension_numbers = #tpu.dot_dimension_numbers<[1], [0], [0], [1], [0, 0, 1, 1], [], []>} : vector<16x64xbf16>, vector<64x64xbf16>, vector<16x64xf32> -> vector<16x64xf32>
    %216 = arith.addf %210, %215 : vector<16x64xf32>
    %c0_116 = arith.constant 0 : index
    %c0_117 = arith.constant 0 : index
    %217 = vector.load %arg7[%c0_116, %c0_117] : memref<1x64xf32, #tpu.memory_space<vmem>>, vector<1x64xf32>
    %218 = vector.broadcast %217 : vector<1x64xf32> to vector<16x64xf32>
    %219 = arith.addf %216, %218 : vector<16x64xf32>
    %cst_118 = arith.constant 0.000000e+00 : f32
    %220 = vector.broadcast %cst_118 : f32 to vector<16x64xf32>
    %221 = arith.maximumf %219, %220 : vector<16x64xf32>
    %222 = vector.shape_cast %221 : vector<16x64xf32> to vector<4x4x64xf32>
    %223 = vector.shape_cast %222 : vector<4x4x64xf32> to vector<2x2x4x64xf32>
    %cst_119 = arith.constant dense<0xFF800000> : vector<2x4x64xf32>
    %224 = vector.multi_reduction <maximumf>, %223, %cst_119 [1] : vector<2x2x4x64xf32> to vector<2x4x64xf32>
    %225 = vector.shape_cast %224 : vector<2x4x64xf32> to vector<2x2x2x64xf32>
    %cst_120 = arith.constant dense<0xFF800000> : vector<2x2x64xf32>
    %226 = vector.multi_reduction <maximumf>, %225, %cst_120 [2] : vector<2x2x2x64xf32> to vector<2x2x64xf32>
    %227 = arith.truncf %226 : vector<2x2x64xf32> to vector<2x2x64xbf16>
    %c0_121 = arith.constant 0 : index
    %c0_122 = arith.constant 0 : index
    %c0_123 = arith.constant 0 : index
    %c0_124 = arith.constant 0 : index
    %228 = vector.load %arg8[%c0_121, %c0_122, %c0_123, %c0_124] : memref<1x2x2x64xbf16, #tpu.memory_space<vmem>>, vector<1x2x2x64xbf16>
    %229 = vector.shape_cast %228 : vector<1x2x2x64xbf16> to vector<2x2x64xbf16>
    %230 = vector.shape_cast %227 : vector<2x2x64xbf16> to vector<1x2x2x64xbf16>
    tpu.vector_store %arg8[%c0_121, %c0_122, %c0_123, %c0_124], %230 {strides = array<i32>} : memref<1x2x2x64xbf16, #tpu.memory_space<vmem>>, vector<1x2x2x64xbf16>,
    return
  }
  func.func @transform_0(%arg0: i32) -> (i32, i32, i32) {
    %c0_i32 = arith.constant 0 : i32
    %c0_i32_0 = arith.constant 0 : i32
    %c0_i32_1 = arith.constant 0 : i32
    return %arg0, %c0_i32, %c0_i32_0 : i32, i32, i32
  }
  func.func @transform_1(%arg0: i32) -> (i32, i32) {
    %c0_i32 = arith.constant 0 : i32
    %c0_i32_0 = arith.constant 0 : i32
    %c0_i32_1 = arith.constant 0 : i32
    return %c0_i32, %c0_i32_0 : i32, i32
  }
  func.func @transform_2(%arg0: i32) -> (i32, i32) {
    %c0_i32 = arith.constant 0 : i32
    %c0_i32_0 = arith.constant 0 : i32
    %c0_i32_1 = arith.constant 0 : i32
    return %c0_i32, %c0_i32_0 : i32, i32
  }
  func.func @transform_3(%arg0: i32) -> (i32, i32, i32) {
    %c0_i32 = arith.constant 0 : i32
    %c0_i32_0 = arith.constant 0 : i32
    %c0_i32_1 = arith.constant 0 : i32
    %c0_i32_2 = arith.constant 0 : i32
    return %c0_i32, %c0_i32_0, %c0_i32_1 : i32, i32, i32
  }
  func.func @transform_4(%arg0: i32) -> (i32, i32) {
    %c0_i32 = arith.constant 0 : i32
    %c0_i32_0 = arith.constant 0 : i32
    %c0_i32_1 = arith.constant 0 : i32
    return %c0_i32, %c0_i32_0 : i32, i32
  }
  func.func @transform_5(%arg0: i32) -> (i32, i32, i32) {
    %c0_i32 = arith.constant 0 : i32
    %c0_i32_0 = arith.constant 0 : i32
    %c0_i32_1 = arith.constant 0 : i32
    %c0_i32_2 = arith.constant 0 : i32
    return %c0_i32, %c0_i32_0, %c0_i32_1 : i32, i32, i32
  }
  func.func @transform_6(%arg0: i32) -> (i32, i32) {
    %c0_i32 = arith.constant 0 : i32
    %c0_i32_0 = arith.constant 0 : i32
    %c0_i32_1 = arith.constant 0 : i32
    return %c0_i32, %c0_i32_0 : i32, i32
  }
  func.func @transform_7(%arg0: i32) -> (i32, i32, i32, i32) {
    %c0_i32 = arith.constant 0 : i32
    %c0_i32_0 = arith.constant 0 : i32
    %c0_i32_1 = arith.constant 0 : i32
    %c0_i32_2 = arith.constant 0 : i32
    return %arg0, %c0_i32, %c0_i32_0, %c0_i32_1 : i32, i32, i32, i32
  }
}

</mosaic_0001>

<bundles_post_ra>
// kernel: tpu_custom_call.1
= control target key start
LH: loop header
LB: loop body
LE: loop exit
PB: predicated region body
PF: predicated region fallthrough
CT: control target
= control target key end

     0   :  { %12 = vsyncpa [#allocation5], 0  ;;  %s9704_s0 = inlined_call_operand.vmem [shape: bf16[2,18,18], index: 0, kind: input, shape index: {}]   ;;  %s9705_s1 = inlined_call_operand.vmem [shape: f32[9,64], index: 1, kind: input, shape index: {}]   ;;  %s9706_s2 = inlined_call_operand.vmem [shape: f32[1,64], index: 2, kind: input, shape index: {}]   ;;  %s9707_s3 = inlined_call_operand.hbm [shape: bf16[9,64,64], index: 3, kind: input, shape index: {}]   ;;  %s9708_s4 = inlined_call_operand.vmem [shape: f32[1,64], index: 4, kind: input, shape index: {}]   ;;  %s9709_s5 = inlined_call_operand.hbm [shape: bf16[9,64,64], index: 5, kind: input, shape index: {}]   ;;  %s9710_s6 = inlined_call_operand.vmem [shape: f32[1,64], index: 6, kind: input, shape index: {}]   ;;  %s9711_s7 = inlined_call_operand.hbm [shape: bf16[2,2,2,64], index: 7, kind: output, shape index: {}]  }
   0x1   :  { %13 = vsyncpa [#allocation8], 0 }
   0x2   :  { %14 = vsyncpa [#allocation6], 0 }
   0x3   :  { %16 = vsyncpa [#allocation6 + $0x1], 0  ;;  %s6396_s24 = smov 0   ;;  %s6398_s25 = smov 0  }
   0x4   :  { %s6400_s26 = smov 0   ;;  %s6402_s27 = smov 0  }
   0x5 LB: > { %s6417_s28 = sadd.s32 4294967295, %s6347_s27   ;;  %s5523_s29 = sadd.s32 4294967294, %s6347_s27   ;;  %s6347_s27 = sphi %s6402_s27, %s10161_s27   ;;  %s6343_s26 = sphi %s6400_s26, %s10160_s26   ;;  %s6339_s25 = sphi %s6398_s25, %s10159_s25   ;;  %s6335_s24 = sphi %s6396_s24, %s10158_s24  }
   0x6   : > { %s6421_s30 = sadd.s32 1, %s6347_s27   ;;  %s181_s8 = sadd.s32 1, %s6343_s26 }
   0x7   : > { %s178_s9 = ssub.s32 %s6347_s27, %s6421_s30  ;;  %p191_p0 = scmp.ne.s32.totalorder %s6343_s26, %s6339_s25 }
   0x8   : > { %p179_p1 = scmp.eq.s32.totalorder %s178_s9, 0  ;;  %p192_p2 = scmp.eq.s32.totalorder %s6417_s28, 1 }
   0x9   : > { %p197_p3 = scmp.ne.s32.totalorder %s6339_s25, %s6335_s24  ;;  %p198_p4 = scmp.eq.s32.totalorder %s5523_s29, 1 }
   0xa   : > { %s6432_s10 = scalar_select %p179_p1, %s6343_s26, %s181_s8  }
   0xb   : > { %p6434_p5 = por %p192_p2, %p191_p0  ;;  %p6438_p6 = por %p198_p4, %p197_p3 }
   0xc   : > { %p5524_p7 = scmp.ge.s32.totalorder %s6347_s27, 1  ;;  %p205_p8 = scmp.lt.s32.totalorder %s6347_s27, 3 }
   0xd   : > { %p5984_p9 = scmp.eq.s32.totalorder %s6417_s28, 0  ;;  %s222_s16 = sshll.u32 %s9707_s3, 4  ;;  %s223_s16 = int_to_ptr.hbm [resolvable:$true] %s222_s16 }
   0xe   : > { %p6445_p10 = pnand %p5524_p7, %p205_p8  ;;  %s6349_s17 = smov [#allocation4]  }
   0xf   : > { %s224_s18 = sshll.u32 %s6349_s17, 4  ;;  %s239_s21 = sshll.u32 %s9709_s5, 4  ;;  %s225_s18 = int_to_ptr.vmem [resolvable:$true] %s224_s18  ;;  %s240_s21 = int_to_ptr.hbm [resolvable:$true] %s239_s21 }
  0x10   : > { %p5973_p11 = pneg %p6445_p10  ;;  %s6350_s22 = smov 64  }
  0x11   : > { %s6351_s23 = smov 4   ;;  %s6352_s29 = smov [#allocation7]  }
  0x12   : > { %p5974_p12 = pnand %p5984_p9, %p5973_p11  ;;  %s241_s8 = sshll.u32 %s6352_s29, 4  ;;  %s242_s8 = int_to_ptr.vmem [resolvable:$true] %s241_s8 }
  0x13   : > { %268 = sbr.rel (%p6445_p10) target bundleno = 1307 (0x51b), region = 48 }
  0x14   : > { %5976 = dma.hbm_to_vmem [thread:$0]  (!%p5974_p12), %s223_s16, 4608, %s225_s18, [#allocation5], %s6350_s22, %s6350_s22, %s6351_s23  }
  0x15   : > { %5979 = dma.hbm_to_vmem [thread:$0]  (!%p5974_p12), %s240_s21, 4608, %s242_s8, [#allocation8], %s6350_s22, %s6350_s22, %s6351_s23  }
  0x18   : > { %6322 = dma.done.wait (%p5984_p9), [#allocation5], 4608  }
  0x19   : > { %6324 = vsyncadd (%p5984_p9), [#allocation5], 4294962688 }
  0x1a   : > { %6326 = dma.done.wait (%p5984_p9), [#allocation8], 4608  }
  0x1b   : > { %6328 = vsyncadd (%p5984_p9), [#allocation8], 4294962688  ;;  %v348_v0 = vlaneseq  ;;  %p306_p13 = scmp.lt.s32.totalorder %s6417_s28, 1  ;;  %v6522_v35 = vld [vmem:[%s9705_s1 + $0x1] ss:$0 sm:$0xff]  ;;  %vm853_vm0 = vcmask 1046528  }
  0x1c   : > { %v6529_v37 = vld [vmem:[%s9705_s1 + $0x2] ss:$0 sm:$0xff]  ;;  %v6534_v38 = vld [vmem:[%s9705_s1 + $0x4] ss:$0 sm:$0xff]  ;;  %v6539_v39 = vld [vmem:[%s9705_s1] ss:$0 sm:$0xff] }
  0x1d   : > { %v6470_v1 = vshrl.u32 %v348_v0, 7  ;;  %s307_s9 = scalar_select %p306_p13, %s6417_s28, 1  ;;  %9821 = vst [vmem:[#allocation13_spill] sm:$0xff] %v6534_v38  ;;  %v6546_v41 = vld [vmem:[%s9705_s1 + $0x5] ss:$0 sm:$0xff]  ;;  %vm1096_vm1 = vcmask 1045504  }
  0x1e   : > { %9822 = vst [vmem:[#allocation14_spill] sm:$0xff] %v6546_v41  ;;  %v6551_v42 = vld [vmem:[%s9705_s1 + $0x7] ss:$0 sm:$0xff]  ;;  %v6556_v43 = vld [vmem:[%s9705_s1 + $0x8] ss:$0 sm:$0xff]  ;;  %vm2409_vm2 = vcmask 523264  }
  0x1f   : > { %6040 = vset.pattern.permute.xlu1 %v6470_v1  ;;  %6028 = vset.pattern.permute.xlu0 %v6470_v1  ;;  %v6476_v2 = vadd.s32 8, %v6470_v1  ;;  %s5962_s13 = smul.u32 12, %s307_s9  ;;  %v6486_v11 = vadd.s32 16, %v6470_v1  ;;  %9823 = vst [vmem:[#allocation15_spill] sm:$0xff] %v6551_v42  ;;  %v6581_v49 = vld [vmem:[%s9705_s1 + $0x3] ss:$0 sm:$0xff] }
  0x20   : > { %9824 = vst [vmem:[#allocation16_spill] sm:$0xff] %v6556_v43  ;;  %vm2570_vm3 = vcmask 517120   ;;  %vm3211_vm4 = vcmask 1042434   ;;  %vm3213_vm5 = vcmask 1043459   ;;  %vm3215_vm6 = vcmask 1044484   ;;  %s303_s17 = sand.u32 1, %s6339_s25  }
  0x21   : > { %6058 = vset.pattern.permute.xlu2 %v6476_v2  ;;  %s6482_s16 = scalar_lea.vmem %s9704_s0, %s5962_s13  ;;  %9827 = vst [vmem:[#allocation19_spill] sm:$0xff] %v6581_v49  ;;  %vm3217_vm7 = vcmask 1045509   ;;  %vm3219_vm8 = vcmask 1046534   ;;  %vm3221_vm9 = vcmask 1047559   ;;  %vm9780_vm10 = vcmask 519168   ;;  %s5531_s18 = sshll.u32 %s303_s17, 1 }
  0x22   : > { %v5959_v3 = vld [vmem:[%s6482_s16] sm:$0xff]   ;;  %v343_v29 = vld [vmem:[%s6482_s16 + $0x8] sm:$0x1]  ;;  %vm3299_vm11 = vsmask.f32 7938  ;;  %vm9790_vm13 = vcmask 516096  }
  0x23   : > { %v5960_v4 = vunpack.c.l.bf16 %v5959_v3  ;;  %v6494_v18 = vunpack.c.h.bf16 %v5959_v3  ;;  %v346_v30 = vunpack.c.l.bf16 %v343_v29  ;;  %vm8330_vm12 = vmand %vm9780_vm10, %vm3299_vm11  ;;  %vm3305_vm14 = vsmask.f32 256  ;;  %s5883_s19 = sshll.u32 %s6417_s28, 1  ;;  %s305_s23 = scalar_lea.vmem [#allocation9], %s5531_s18 }
  0x24   : > { %vm3674_vm15 = vcmask 1042432   ;;  %vm3675_vm11 = vcmask 1046532   ;;  %s5435_s22 = scalar_lea.hbm %s9711_s7, %s5883_s19  ;;  %s5436_s29 = sshll.u32 %s305_s23, 4  ;;  %s5437_s29 = int_to_ptr.vmem [resolvable:$true] %s5436_s29 }
  0x25   : > { %v385_v5 = vperm.slane %v5960_v4, 2  ;;  %v404_v6 = vperm.slane %v5960_v4, 3  ;;  %v347_v7 = vperm.slane %v5960_v4, 0  ;;  %v366_v8 = vperm.slane %v5960_v4, 1  ;;  %s5438_s28 = sshll.u32 %s5435_s22, 4  ;;  %s5425_s8 = scalar_lea.sflag [#allocation6], %s303_s17  ;;  %s5439_s28 = int_to_ptr.hbm [resolvable:$true] %s5438_s28 }
  0x26   : > { %v423_v12 = vperm.slane %v5960_v4, 4  ;;  %v442_v13 = vperm.slane %v5960_v4, 5  ;;  %v461_v15 = vperm.slane %v5960_v4, 6  ;;  %v480_v16 = vperm.slane %v5960_v4, 7  ;;  %s6291_s9 = sshra.s32 %s5439_s28, 4  ;;  %s6297_s16 = scalar_lea.hbm %s9711_s7, 4  ;;  %s6292_s9 = int_to_ptr.hbm [resolvable:$true] %s6291_s9 }
  0x27   : > { %v6059_v9 = vpack.i.bf16 %v404_v6, %v385_v5  ;;  %v6029_v10 = vpack.i.bf16 %v366_v8, %v347_v7  ;;  %v499_v19 = vperm.slane %v6494_v18, 0  ;;  %v518_v20 = vperm.slane %v6494_v18, 1  ;;  %s6293_s13 = scalar_lea.hbm %s6292_s9, 2  ;;  %p6298_p3 = scmp.lt.s32.totalorder %s6292_s9, %s9711_s7 }
  0x28   : > { %v6071_v14 = vpack.i.bf16 %v442_v13, %v423_v12  ;;  %v6082_v17 = vpack.i.bf16 %v480_v16, %v461_v15  ;;  %v537_v22 = vperm.slane %v6494_v18, 2  ;;  %v556_v23 = vperm.slane %v6494_v18, 3  ;;  %p6294_p0 = scmp.ne.s32.totalorder %s6292_s9, %s6293_s13  ;;  %p6299_p4 = scmp.lt.s32.totalorder %s6297_s16, %s6293_s13 }
  0x29   : > { %6060 = vperm.xlu2 %6058, %v6059_v9   ;;  %6042 = vperm.xlu1 %6040, %v6059_v9   ;;  %v6105_v21 = vpack.i.bf16 %v518_v20, %v499_v19  ;;  %v575_v24 = vperm.slane %v6494_v18, 4  ;;  %v594_v25 = vperm.slane %v6494_v18, 5  ;;  %v613_v28 = vperm.slane %v6494_v18, 6 }
  0x2a   : > { %6030 = vperm.xlu0 %6028, %v6029_v10   ;;  %v6115_v26 = vpack.i.bf16 %v556_v23, %v537_v22  ;;  %v6511_v31 = vperm.slane %v346_v30, 1  ;;  %v632_v33 = vperm.slane %v6494_v18, 7  ;;  %v6639_v22 = vld [vmem:[%s9705_s1 + $0x6] ss:$0 sm:$0xff]  ;;  %p6295_p1 = pnand %p6294_p0, %p6434_p5  ;;  %p6300_p7 = por %p6299_p4, %p6298_p3 }
  0x2b   : > { %v6133_v27 = vpack.i.bf16 %v594_v25, %v575_v24  ;;  %9830 = vst [vmem:[#allocation22_spill] sm:$0xff] %v6639_v22 }
  0x2c   : > { %v6149_v40 = vpack.i.bf16 %v632_v33, %v613_v28  ;;  %p6296_p2 = pneg %p6295_p1 }
  0x2e   : > { %p6301_p8 = pnand %p6300_p7, %p6296_p2 }
  0x31   : > { %6064 = vset.pattern.permute.xlu2 %v6486_v11  ;;  %6046 = vset.pattern.permute.xlu1 %v6486_v11 }
  0x32   : > { %6034 = vset.pattern.permute.xlu0 %v6476_v2 }
  0x39   : > { %6066 = vperm.xlu2 %6064, %v6059_v9   ;;  %6048 = vperm.xlu1 %6046, %v6029_v10   ;;  %v6622_v9 = vperm.slane %v346_v30, 0 }
  0x3a   : > { %6036 = vperm.xlu0 %6034, %v6029_v10  }
  0x41   : > { %6070 = vset.pattern.permute.xlu2 %v6476_v2  ;;  %6052 = vset.pattern.permute.xlu1 %v6470_v1 }
  0x42   : > { %6076 = vset.pattern.permute.xlu0 %v6486_v11 }
  0x49   : > { %6072 = vperm.xlu2 %6070, %v6071_v14   ;;  %6054 = vperm.xlu1 %6052, %v6071_v14  }
  0x4a   : > { %6078 = vperm.xlu0 %6076, %v6071_v14  }
  0x51   : > { %6083 = vperm.xlu1 %6052, %v6082_v17   ;;  %6088 = vperm.xlu2 %6070, %v6082_v17  }
  0x52   : > { %6104 = vset.pattern.permute.xlu0 %v6476_v2 }
  0x59   : > { %6092 = vset.pattern.permute.xlu1 %v6486_v11  ;;  %6098 = vset.pattern.permute.xlu2 %v6470_v1 }
  0x5a   : > { %6106 = vperm.xlu0 %6104, %v6105_v21  }
  0x61   : > { %6094 = vperm.xlu1 %6092, %v6082_v17   ;;  %6100 = vperm.xlu2 %6098, %v6105_v21  }
  0x62   : > { %6132 = vset.pattern.permute.xlu0 %v6470_v1 }
  0x69   : > { %6111 = vperm.xlu1 %6092, %v6105_v21   ;;  %6116 = vperm.xlu2 %6098, %v6115_v26  }
  0x6a   : > { %6134 = vperm.xlu0 %6132, %v6133_v27  }
  0x71   : > { %6120 = vset.pattern.permute.xlu1 %v6476_v2  ;;  %6126 = vset.pattern.permute.xlu2 %v6486_v11 }
  0x72   : > { %6160 = vset.pattern.permute.xlu0 %v6486_v11 }
  0x79   : > { %6122 = vperm.xlu1 %6120, %v6115_v26   ;;  %6128 = vperm.xlu2 %6126, %v6115_v26  }
  0x7a   : > { %630 = vperm.xlu0 %6160, %v613_v28  }
  0x81   : > { %6139 = vperm.xlu1 %6120, %v6133_v27   ;;  %6144 = vperm.xlu2 %6126, %v6133_v27  }
  0x82   : > { %687 = vperm.xlu0 %6160, %v6511_v31  }
  0x83   : > { %v6061_v32 = vpop.permute.xlu2 %6060 }
  0x84   : > { %v6517_v34 = vunpack.i.l.bf16 %v6061_v32  ;;  %v6524_v36 = vunpack.i.h.bf16 %v6061_v32 }
  0x86   : > { %v6560_v44 = vmul.f32 %v6522_v35, %v6517_v34  ;;  %v6564_v45 = vmul.f32 %v6522_v35, %v6524_v36  ;;  %v6568_v46 = vmul.f32 %v6529_v37, %v6517_v34  ;;  %v6572_v47 = vmul.f32 %v6529_v37, %v6524_v36 }
  0x87   : > { %v6576_v48 = vmul.f32 %v6534_v38, %v6517_v34  ;;  %v696_v50 = vmul.f32 %v6539_v39, %v6517_v34  ;;  %v6587_v51 = vmul.f32 %v6534_v38, %v6524_v36  ;;  %v6591_v52 = vmul.f32 %v6546_v41, %v6517_v34 }
  0x88   : > { %9825 = vst [vmem:[#allocation17_spill] sm:$0xff] %v6568_v46  ;;  %v6595_v53 = vmul.f32 %v6546_v41, %v6524_v36  ;;  %v6599_v54 = vmul.f32 %v6551_v42, %v6524_v36  ;;  %v698_v55 = vmul.f32 %v6539_v39, %v6524_v36  ;;  %v9713_v56 = vrot.slane %v6560_v44, 1 }
  0x89   : > { %6148 = vset.pattern.permute.xlu1 %v6470_v1  ;;  %6154 = vset.pattern.permute.xlu2 %v6476_v2  ;;  %9826 = vst [vmem:[#allocation18_spill] sm:$0xff] %v6572_v47  ;;  %v1248_v57 = vmul.f32 %v6581_v49, %v6524_v36  ;;  %v6608_v58 = vmul.f32 %v6556_v43, %v6524_v36  ;;  %v9712_v60 = vrot.slane %v6564_v45, 1  ;;  %v9717_v61 = vrot.slane %v6568_v46, 2 }
  0x8a   : > { %9828 = vst [vmem:[#allocation20_spill] sm:$0xff] %v6587_v51  ;;  %v9716_v62 = vrot.slane %v6572_v47, 2  ;;  %v9722_v63 = vrot.slane %v6576_v48, 1  ;;  %v9715_v4 = vrot.slane %v6587_v51, 1  ;;  %v6617_v5 = vmul.f32 %v6551_v42, %v6517_v34 }
  0x8b   : > { %9829 = vst [vmem:[#allocation21_spill] sm:$0xff] %v6595_v53  ;;  %v9721_v6 = vrot.slane %v6591_v52, 2  ;;  %v9714_v7 = vrot.slane %v6595_v53, 2  ;;  %v9719_v8 = vrot.slane %v6599_v54, 1  ;;  %v9718_v14 = vrot.slane %v6608_v58, 2 }
  0x8c   : > { %v6633_v19 = vmul.f32 %v6581_v49, %v6517_v34  ;;  %v9720_v23 = vrot.slane %v6617_v5, 1  ;;  %v6644_v24 = vmul.f32 %v6556_v43, %v6517_v34  ;;  %v9841_v46 = vrot.slane %v6576_v48, 1 }
  0x91   : > { %6150 = vperm.xlu1 %6148, %v6149_v40   ;;  %6156 = vperm.xlu2 %6154, %v6149_v40   ;;  %v6655_v40 = vmul.f32 %v6639_v22, %v6517_v34 }
  0x93   : > { %v6067_v59 = vpop.permute.xlu2 %6066 }
  0x94   : > { %v6069_v0 = vunpack.i.h.bf16 %v6067_v59  ;;  %v6068_v3 = vunpack.i.l.bf16 %v6067_v59 }
  0x96   : > { %v768_v10 = vmul.f32 %v6522_v35, %v6069_v0  ;;  %v1011_v12 = vmul.f32 %v6529_v37, %v6069_v0  ;;  %v1317_v13 = vmul.f32 %v6534_v38, %v6069_v0  ;;  %v1559_v15 = vmul.f32 %v6546_v41, %v6069_v0 }
  0x97   : > { %v765_v16 = vmul.f32 %v6522_v35, %v6068_v3  ;;  %v1008_v17 = vmul.f32 %v6529_v37, %v6068_v3  ;;  %v1864_v21 = vmul.f32 %v6551_v42, %v6069_v0  ;;  %v2106_v26 = vmul.f32 %v6556_v43, %v6069_v0 }
  0x98   : > { %v872_v20 = vrot.slane %v768_v10, 1  ;;  %v1115_v25 = vrot.slane %v1011_v12, 2  ;;  %v1418_v29 = vrot.slane %v1317_v13, 1  ;;  %v1314_v32 = vmul.f32 %v6534_v38, %v6068_v3 }
  0x99   : > { %v867_v27 = vrot.slane %v765_v16, 1  ;;  %v1110_v28 = vrot.slane %v1008_v17, 2  ;;  %6161 = vset.pattern.permute.xlu1 %v6486_v11  ;;  %6162 = vset.pattern.permute.xlu2 %v6470_v1  ;;  %v1660_v59 = vrot.slane %v1559_v15, 2  ;;  %v1556_v10 = vmul.f32 %v6546_v41, %v6068_v3 }
  0x9a   : > { %v873_v30 = vsel %vm853_vm0, %v9712_v60, %v872_v20  ;;  %v1963_v12 = vrot.slane %v1864_v21, 1  ;;  %v1861_v17 = vmul.f32 %v6551_v42, %v6068_v3  ;;  %v2205_v60 = vrot.slane %v2106_v26, 2 }
  0x9b   : > { %v868_v0 = vsel %vm853_vm0, %v9713_v56, %v867_v27  ;;  %v1111_v1 = vsel %vm1096_vm1, %v9717_v61, %v1110_v28  ;;  %v973_v16 = vadd.f32 %v873_v30, %v698_v55  ;;  %v6043_v20 = vpop.permute.xlu1 %6042  ;;  %v1116_v34 = vsel %vm1096_vm1, %v9716_v62, %v1115_v25 }
  0x9c   : > { %v971_v13 = vadd.f32 %v868_v0, %v696_v50  ;;  %v1413_v15 = vrot.slane %v1314_v32, 1  ;;  %v6670_v27 = vmul.f32 %v6639_v22, %v6524_v36  ;;  %v1419_v21 = vsel %vm853_vm0, %v9715_v4, %v1418_v29 }
  0x9d   : > { %v1655_v50 = vrot.slane %v1556_v10, 2  ;;  %v1958_v28 = vrot.slane %v1861_v17, 1  ;;  %v6677_v26 = vmul.f32 %v6556_v43, %v6068_v3  ;;  %v6679_v30 = vunpack.i.h.bf16 %v6043_v20 }
  0x9e   : > { %v1214_v56 = vadd.f32 %v1111_v1, %v971_v13  ;;  %v6681_v25 = vunpack.i.l.bf16 %v6043_v20  ;;  %v6683_v32 = vadd.f32 %v1116_v34, %v973_v16  ;;  %v1661_v0 = vsel %vm1096_vm1, %v9714_v7, %v1660_v59  ;;  %v6031_v59 = vpop.permute.xlu0 %6030 }
  0x9f   : > { %v6691_v29 = vsel %vm853_vm0, %v9719_v8, %v1963_v12  ;;  %v6696_v3 = vsel %vm853_vm0, %v9722_v63, %v1413_v15  ;;  %v6701_v1 = vsel %vm1096_vm1, %v9718_v14, %v2205_v60  ;;  %v6716_v12 = vsel %vm1096_vm1, %v9721_v6, %v1655_v50 }
  0xa0   : > { %9831 = vst [vmem:[#allocation23_spill] sm:$0xff] %v6683_v32  ;;  %v1280_v36 = vadd.f32 %v1248_v57, %v1214_v56  ;;  %v6705_v56 = vmul.f32 %v6522_v35, %v6679_v30  ;;  %v6709_v57 = vmul.f32 %v6529_v37, %v6679_v30  ;;  %v6720_v60 = vmul.f32 %v6534_v38, %v6679_v30 }
  0xa1   : > { %649 = vperm.xlu1 %6161, %v632_v33   ;;  %v6722_v13 = vunpack.i.h.bf16 %v6031_v59  ;;  %v763_v17 = vmul.f32 %v6522_v35, %v6681_v25  ;;  %v6032_v18 = vunpack.i.l.bf16 %v6031_v59  ;;  %v6730_v33 = vsel %vm853_vm0, %v9720_v23, %v1958_v28 }
  0xa2   : > { %9832 = vst [vmem:[#allocation24_spill] sm:$0xff] %v6709_v57  ;;  %v1522_v10 = vadd.f32 %v1419_v21, %v1280_v36  ;;  %v6734_v20 = vmul.f32 %v6539_v39, %v6679_v30  ;;  %v6738_v34 = vmul.f32 %v6581_v49, %v6679_v30  ;;  %v6742_v15 = vmul.f32 %v6546_v41, %v6679_v30 }
  0xa3   : > { %9833 = vst [vmem:[#allocation25_spill] sm:$0xff] %v6720_v60  ;;  %v6746_v21 = vmul.f32 %v6529_v37, %v6681_v25  ;;  %v695_v36 = vmul.f32 %v6539_v39, %v6681_v25  ;;  %v864_v59 = vrot.slane %v763_v17, 1  ;;  %v6073_v7 = vpop.permute.xlu2 %6072  ;;  %v6757_v61 = vmul.f32 %v6522_v35, %v6722_v13 }
  0xa4   : > { %9834 = vst [vmem:[#allocation26_spill] sm:$0xff] %v6734_v20  ;;  %v6752_v4 = vadd.f32 %v1661_v0, %v1522_v10  ;;  %v6761_v14 = vmul.f32 %v6529_v37, %v6722_v13  ;;  %v9839_v50 = vrot.slane %v6560_v44, 1  ;;  %v6768_v17 = vmul.f32 %v6534_v38, %v6722_v13 }
  0xa5   : > { %9835 = vst [vmem:[#allocation27_spill] sm:$0xff] %v6738_v34  ;;  %v6772_v0 = vmul.f32 %v6546_v41, %v6722_v13  ;;  %v6775_v10 = vmul.f32 %v6522_v35, %v6032_v18  ;;  %v6779_v23 = vunpack.i.h.bf16 %v6073_v7  ;;  %v6781_v44 = vunpack.i.l.bf16 %v6073_v7 }
  0xa6   : > { %9836 = vst [vmem:[#allocation28_spill] sm:$0xff] %v6742_v15  ;;  %v866_v28 = vsel %vm853_vm0, %v864_v59, %v9839_v50  ;;  %v6787_v59 = vmul.f32 %v6539_v39, %v6722_v13  ;;  %v6790_v55 = vmul.f32 %v6539_v39, %v6032_v18  ;;  %v6793_v16 = vmul.f32 %v6529_v37, %v6032_v18 }
  0xa7   : > { %9837 = vst [vmem:[#allocation29_spill] sm:$0xff] %v6746_v21  ;;  %v6783_v50 = vadd.f32 %v866_v28, %v695_v36  ;;  %v1312_v7 = vmul.f32 %v6534_v38, %v6681_v25  ;;  %v1554_v28 = vmul.f32 %v6546_v41, %v6681_v25  ;;  %v1862_v8 = vmul.f32 %v6551_v42, %v6679_v30 }
  0xa8   : > { %9838 = vst [vmem:[#allocation30_spill] sm:$0xff] %v6752_v4  ;;  %v2101_v15 = vmul.f32 %v6556_v43, %v6681_v25  ;;  %v1097_v53 = vrot.slane %v6793_v16, 2  ;;  %v6814_v36 = vmul.f32 %v6581_v49, %v6681_v25  ;;  %v6828_v34 = vmul.f32 %v6639_v22, %v6681_v25 }
  0xa9   : > { %9840 = vst [vmem:[#allocation31_spill] sm:$0xff] %v6783_v50  ;;  %6168 = vset.pattern.permute.xlu1 %v6476_v2  ;;  %v1859_v2 = vmul.f32 %v6551_v42, %v6681_v25  ;;  %v1410_v6 = vrot.slane %v1312_v7, 1  ;;  %v1652_v63 = vrot.slane %v1554_v28, 2  ;;  %v2104_v7 = vmul.f32 %v6556_v43, %v6679_v30 }
  0xaa   : > { %v6834_v28 = vmul.f32 %v6639_v22, %v6679_v30  ;;  %v1960_v57 = vrot.slane %v1862_v8, 1  ;;  %v2197_v47 = vrot.slane %v2101_v15, 2  ;;  %v9842_v25 = vrot.slane %v6591_v52, 2 }
  0xab   : > { %v6049_v18 = vpop.permute.xlu1 %6048  ;;  %v1955_v50 = vrot.slane %v1859_v2, 1  ;;  %v9843_v43 = vrot.slane %v6677_v26, 2  ;;  %v9844_v30 = vrot.slane %v6644_v24, 2  ;;  %v9846_v26 = vrot.slane %v6599_v54, 1 }
  0xac   : > { %v6051_v4 = vunpack.i.h.bf16 %v6049_v18  ;;  %v6050_v62 = vunpack.i.l.bf16 %v6049_v18  ;;  %v6844_v20 = vsel %vm1096_vm1, %v1652_v63, %v9842_v25  ;;  %v9845_v63 = vrot.slane %v6617_v5, 1 }
  0xad   : > { %v6851_v2 = vsel %vm1096_vm1, %v9844_v30, %v9843_v43  ;;  %v6863_v43 = vsel %vm853_vm0, %v1960_v57, %v9846_v26  ;;  %v9848_v24 = vrot.slane %v6608_v58, 2  ;;  %v6890_v48 = vmul.f32 %v6539_v39, %v6781_v44 }
  0xae   : > { %v762_v32 = vmul.f32 %v6522_v35, %v6051_v4  ;;  %v1005_v60 = vmul.f32 %v6529_v37, %v6051_v4  ;;  %v6819_v18 = vmul.f32 %v6534_v38, %v6051_v4  ;;  %v6822_v42 = vmul.f32 %v6546_v41, %v6051_v4  ;;  %v6037_v4 = vpop.permute.xlu0 %6036 }
  0xaf   : > { %v759_v51 = vmul.f32 %v6522_v35, %v6050_v62  ;;  %v1002_v16 = vmul.f32 %v6529_v37, %v6050_v62  ;;  %v6839_v62 = vsel %vm853_vm0, %v1410_v6, %v9841_v46  ;;  %v2202_v6 = vrot.slane %v2104_v7, 2  ;;  %9849 = vst [vmem:[#allocation32_spill] sm:$0xff] %v6890_v48 }
  0xb0   : > { %v862_v21 = vrot.slane %v762_v32, 1  ;;  %v1105_v8 = vrot.slane %v1005_v60, 2  ;;  %v1408_v32 = vrot.slane %v6819_v18, 1  ;;  %v6039_v22 = vunpack.i.h.bf16 %v6037_v4 }
  0xb1   : > { %v857_v15 = vrot.slane %v759_v51, 1  ;;  %v1100_v46 = vrot.slane %v1002_v16, 2  ;;  %v6038_v52 = vunpack.i.l.bf16 %v6037_v4  ;;  %v6858_v25 = vsel %vm853_vm0, %v1955_v50, %v9845_v63 }
  0xb2   : > { %v6163_v60 = vpack.i.bf16 %v6511_v31, %v6622_v9  ;;  %v9847_v18 = vmov %v9844_v30  ;;  %v761_v16 = vmul.f32 %v6522_v35, %v6039_v22  ;;  %v1004_v5 = vmul.f32 %v6529_v37, %v6039_v22 }
  0xb3   : > { %v6870_v51 = vsel %vm1096_vm1, %v2197_v47, %v9847_v18  ;;  %v1243_v50 = vmul.f32 %v6581_v49, %v6722_v13  ;;  %v694_v54 = vmul.f32 %v6539_v39, %v6039_v22  ;;  %v1310_v57 = vmul.f32 %v6534_v38, %v6039_v22 }
  0xb4   : > { %v1552_v7 = vmul.f32 %v6546_v41, %v6039_v22  ;;  %v758_v31 = vmul.f32 %v6522_v35, %v6038_v52  ;;  %6164 = vperm.xlu2 %6162, %v6163_v60   ;;  %v6883_v47 = vsel %vm1096_vm1, %v2202_v6, %v9848_v24  ;;  %v860_v4 = vrot.slane %v761_v16, 1  ;;  %6170 = vperm.xlu1 %6168, %v6163_v60  }
  0xb5   : > { %v1103_v30 = vrot.slane %v1004_v5, 2  ;;  %v1001_v63 = vmul.f32 %v6529_v37, %v6038_v52  ;;  %v1244_v13 = vmul.f32 %v6581_v49, %v6039_v22  ;;  %v692_v26 = vmul.f32 %v6539_v39, %v6038_v52 }
  0xb6   : > { %v855_v18 = vrot.slane %v758_v31, 1  ;;  %v863_v41 = vsel %vm853_vm0, %v860_v4, %v862_v21  ;;  %v1406_v58 = vrot.slane %v1310_v57, 1  ;;  %v9850_v6 = vrot.slane %v6757_v61, 1 }
  0xb7   : > { %v1098_v5 = vrot.slane %v1001_v63, 2  ;;  %v969_v24 = vadd.f32 %v863_v41, %v694_v54  ;;  %v1106_v60 = vsel %vm1096_vm1, %v1103_v30, %v1105_v8  ;;  %v1648_v38 = vrot.slane %v1552_v7, 2 }
  0xb8   : > { %v861_v16 = vsel %vm853_vm0, %v9850_v6, %v860_v4  ;;  %v9851_v22 = vrot.slane %v6775_v10, 1  ;;  %v858_v31 = vsel %vm853_vm0, %v855_v18, %v857_v15  ;;  %v9852_v41 = vrot.slane %v6761_v14, 2 }
  0xb9   : > { %v968_v21 = vadd.f32 %v861_v16, %v6787_v59  ;;  %v1099_v57 = vsel %vm1096_vm1, %v1097_v53, %v1098_v5  ;;  %v1212_v49 = vadd.f32 %v1106_v60, %v969_v24  ;;  %v967_v4 = vadd.f32 %v858_v31, %v692_v26 }
  0xba   : > { %v856_v52 = vsel %vm853_vm0, %v9851_v22, %v855_v18  ;;  %v1104_v8 = vsel %vm1096_vm1, %v9852_v41, %v1103_v30  ;;  %v6909_v10 = vmul.f32 %v6522_v35, %v6781_v44  ;;  %v1101_v54 = vsel %vm1096_vm1, %v1098_v5, %v1100_v46 }
  0xbb   : > { %v966_v48 = vadd.f32 %v856_v52, %v6790_v55  ;;  %v6055_v61 = vpop.permute.xlu1 %6054  ;;  %v1211_v7 = vadd.f32 %v1104_v8, %v968_v21  ;;  %v9853_v55 = vrot.slane %v6768_v17, 1  ;;  %v1278_v53 = vadd.f32 %v6633_v19, %v1212_v49 }
  0xbc   : > { %v1210_v63 = vadd.f32 %v1101_v54, %v967_v4  ;;  %v6916_v26 = vunpack.i.h.bf16 %v6055_v61  ;;  %v6918_v14 = vunpack.i.l.bf16 %v6055_v61  ;;  %6174 = vset.pattern.permute.xlu2 %v6486_v11  ;;  %v1409_v30 = vsel %vm853_vm0, %v1406_v58, %v1408_v32 }
  0xbd   : > { %v1209_v15 = vadd.f32 %v1099_v57, %v966_v48  ;;  %v1407_v59 = vsel %vm853_vm0, %v9853_v55, %v1406_v58  ;;  %v1277_v46 = vadd.f32 %v6814_v36, %v1211_v7  ;;  %v6925_v48 = vmul.f32 %v6539_v39, %v6779_v23 }
  0xbe   : > { %v1520_v17 = vadd.f32 %v6696_v3, %v1278_v53  ;;  %v1276_v6 = vadd.f32 %v1244_v13, %v1210_v63  ;;  %v9854_v49 = vrot.slane %v6772_v0, 2  ;;  %v6933_v16 = vmul.f32 %v6522_v35, %v6779_v23 }
  0xbf   : > { %v1275_v18 = vadd.f32 %v1243_v50, %v1209_v15  ;;  %v1519_v32 = vadd.f32 %v6839_v62, %v1277_v46  ;;  %v769_v36 = vmul.f32 %v6522_v35, %v6918_v14  ;;  %v772_v50 = vmul.f32 %v6522_v35, %v6916_v26  ;;  %v9858_v15 = vld [vmem:[#allocation26_spill] sm:$0xff] }
  0xc0   : > { %v1649_v19 = vsel %vm1096_vm1, %v9854_v49, %v1648_v38  ;;  %v9855_v3 = vrot.slane %v6822_v42, 2  ;;  %v1762_v0 = vadd.f32 %v6716_v12, %v1520_v17  ;;  %v1518_v58 = vadd.f32 %v1409_v30, %v1276_v6  ;;  %v9859_v49 = vld [vmem:[#allocation17_spill] sm:$0xff] }
  0xc1   : > { %v1517_v11 = vadd.f32 %v1407_v59, %v1275_v18  ;;  %v875_v5 = vrot.slane %v6909_v10, 1  ;;  %v1761_v60 = vadd.f32 %v6844_v20, %v1519_v32  ;;  %v9856_v62 = vrot.slane %v6564_v45, 1 }
  0xc2   : > { %v1651_v13 = vsel %vm1096_vm1, %v1648_v38, %v9855_v3  ;;  %v9857_v22 = vrot.slane %v6705_v56, 1  ;;  %v874_v31 = vrot.slane %v769_v36, 1  ;;  %v1828_v42 = vadd.f32 %v6670_v27, %v1762_v0  ;;  %v6962_v56 = vld [vmem:[%s9706_s2] ss:$0 sm:$0xff]  ;;  %v9865_v0 = vld [vmem:[#allocation24_spill] sm:$0xff] }
  0xc3   : > { %v1759_v24 = vadd.f32 %v1649_v19, %v1517_v11  ;;  %v1760_v21 = vadd.f32 %v1651_v13, %v1518_v58  ;;  %v699_v38 = vmul.f32 %v6539_v39, %v6918_v14  ;;  %v701_v12 = vmul.f32 %v6539_v39, %v6916_v26  ;;  %v9861_v11 = vld [vmem:[#allocation29_spill] sm:$0xff]  ;;  %v9863_v3 = vld [vmem:[#allocation18_spill] sm:$0xff] }
  0xc4   : > { %v871_v52 = vsel %vm853_vm0, %v9857_v22, %v9856_v62  ;;  %v1827_v20 = vadd.f32 %v6834_v28, %v1761_v60  ;;  %v879_v61 = vrot.slane %v772_v50, 1  ;;  %v880_v45 = vrot.slane %v6933_v16, 1  ;;  %668 = vperm.xlu2 %6174, %v6622_v9   ;;  %v9867_v60 = vld [vmem:[#allocation31_spill] sm:$0xff] }
  0xc5   : > { %v1825_v57 = vadd.f32 %v6828_v34, %v1759_v24  ;;  %v2070_v27 = vadd.f32 %v6691_v29, %v1828_v42  ;;  %v1826_v4 = vadd.f32 %v6655_v40, %v1760_v21  ;;  %v876_v39 = vsel %vm853_vm0, %v874_v31, %v875_v5 }
  0xc6   : > { %v1012_v34 = vmul.f32 %v6529_v37, %v6918_v14  ;;  %v2069_v41 = vadd.f32 %v6863_v43, %v1827_v20  ;;  %v6976_v8 = vmul.f32 %v6529_v37, %v6781_v44  ;;  %v1015_v40 = vmul.f32 %v6529_v37, %v6916_v26 }
  0xc7   : > { %v2067_v28 = vadd.f32 %v6858_v25, %v1825_v57  ;;  %v2312_v29 = vadd.f32 %v6701_v1, %v2070_v27  ;;  %v2068_v54 = vadd.f32 %v6730_v33, %v1826_v4  ;;  %v972_v7 = vadd.f32 %v871_v52, %v9858_v15  ;;  %v9868_v4 = vld [vmem:[#allocation19_spill] sm:$0xff] }
  0xc8   : > { %v6985_v9 = vmul.f32 %v6529_v37, %v6779_v23  ;;  %v2311_v43 = vadd.f32 %v6883_v47, %v2069_v41  ;;  %v881_v55 = vsel %vm853_vm0, %v879_v61, %v880_v45  ;;  %v974_v59 = vadd.f32 %v876_v39, %v699_v38 }
  0xc9   : > { %v2309_v25 = vadd.f32 %v6870_v51, %v2067_v28  ;;  %v2348_v53 = vadd.f32 %v6962_v56, %v2312_v29  ;;  %v2310_v1 = vadd.f32 %v6851_v2, %v2068_v54  ;;  %v1117_v33 = vrot.slane %v1012_v34, 2 }
  0xca   : > { %v1118_v63 = vrot.slane %v6976_v8, 2  ;;  %v2347_v18 = vadd.f32 %v6962_v56, %v2311_v43  ;;  %v1122_v46 = vrot.slane %v1015_v40, 2  ;;  %v1123_v51 = vrot.slane %v6985_v9, 2  ;;  %v9869_v40 = vld [vmem:[#allocation27_spill] sm:$0xff] }
  0xcb   : > { %v2345_v30 = vadd.f32 %v6962_v56, %v2309_v25  ;;  %v2380_v47 = vmax.f32 %v2348_v53, 0.0  ;;  %v2346_v17 = vadd.f32 %v6962_v56, %v2310_v1  ;;  %v976_v6 = vadd.f32 %v881_v55, %v701_v12 }
  0xcc   : > { %v9860_v19 = vrot.slane %v9859_v49, 2  ;;  %v9862_v32 = vrot.slane %v9861_v11, 2  ;;  %v2379_v50 = vmax.f32 %v2347_v18, 0.0  ;;  %v9864_v13 = vrot.slane %v9863_v3, 2 }
  0xcd   : > { %v2377_v36 = vmax.f32 %v2345_v30, 0.0  ;;  %v9866_v58 = vrot.slane %v9865_v0, 2  ;;  %v2414_v22 = vsel %vm2409_vm2, %v2380_v47, -inf  ;;  %v2378_v52 = vmax.f32 %v2346_v17, 0.0 }
  0xce   : > { %v1109_v2 = vsel %vm1096_vm1, %v9862_v32, %v9860_v19  ;;  %v1119_v31 = vsel %vm1096_vm1, %v1117_v33, %v1118_v63  ;;  %v2411_v38 = vsel %vm2409_vm2, %v2379_v50, -inf  ;;  %v1124_v12 = vsel %vm1096_vm1, %v1122_v46, %v1123_v51 }
  0xcf   : > { %v1114_v24 = vsel %vm1096_vm1, %v9866_v58, %v9864_v13  ;;  %v1213_v62 = vadd.f32 %v1109_v2, %v9867_v60  ;;  %v2410_v21 = vsel %vm2409_vm2, %v2377_v36, -inf  ;;  %v7021_v57 = vadd.f32 %v1119_v31, %v974_v59 }
  0xd0   : > { %v7014_v42 = vadd.f32 %v1114_v24, %v972_v7  ;;  %v2412_v20 = vmax.f32 %v2410_v21, %v2411_v38  ;;  %v2413_v61 = vsel %vm2409_vm2, %v2378_v52, -inf  ;;  %v7024_v27 = vadd.f32 %v1124_v12, %v976_v6 }
  0xd1   : > { %v7028_v39 = vmul.f32 %v9868_v4, %v6918_v14  ;;  %v2415_v34 = vmax.f32 %v2413_v61, %v2414_v22  ;;  %v7032_v28 = vmul.f32 %v9868_v4, %v6781_v44  ;;  %v7036_v41 = vmul.f32 %v9868_v4, %v6916_v26 }
  0xd2   : > { %v7039_v29 = vadd.f32 %v9869_v40, %v1213_v62  ;;  %v2474_v54 = vrot.slane %v2412_v20, 2  ;;  %v2475_v15 = vrot.slane %v2412_v20, 4  ;;  %v2476_v7 = vrot.slane %v2412_v20, 6 }
  0xd3   : > { %v2571_v25 = vsel %vm2570_vm3, %v2412_v20, -inf  ;;  %v2477_v43 = vrot.slane %v2415_v34, 2  ;;  %v2478_v55 = vrot.slane %v2415_v34, 4  ;;  %v2479_v59 = vrot.slane %v2415_v34, 6 }
  0xd4   : > { %v2572_v53 = vrot.slane %v2571_v25, 4  ;;  %v2578_v1 = vsel %vm2570_vm3, %v2474_v54, -inf  ;;  %v2585_v33 = vsel %vm2570_vm3, %v2475_v15, -inf  ;;  %v2592_v30 = vsel %vm2570_vm3, %v2476_v7, -inf }
  0xd5   : > { %v2599_v18 = vsel %vm2570_vm3, %v2415_v34, -inf  ;;  %v2579_v47 = vrot.slane %v2578_v1, 4  ;;  %v2586_v17 = vrot.slane %v2585_v33, 4  ;;  %v2593_v6 = vrot.slane %v2592_v30, 4 }
  0xd6   : > { %v2573_v46 = vmax.f32 %v2571_v25, %v2572_v53  ;;  %v2600_v49 = vrot.slane %v2599_v18, 4  ;;  %v2606_v19 = vsel %vm2570_vm3, %v2477_v43, -inf  ;;  %v2613_v11 = vsel %vm2570_vm3, %v2478_v55, -inf }
  0xd7   : > { %v2620_v32 = vsel %vm2570_vm3, %v2479_v59, -inf  ;;  %v2580_v36 = vmax.f32 %v2578_v1, %v2579_v47  ;;  %v2587_v50 = vmax.f32 %v2585_v33, %v2586_v17  ;;  %v2594_v3 = vmax.f32 %v2592_v30, %v2593_v6 }
  0xd8   : > { %v2574_v2 = vrot.slane %v2573_v46, 2  ;;  %v2601_v13 = vmax.f32 %v2599_v18, %v2600_v49  ;;  %v2607_v0 = vrot.slane %v2606_v19, 4  ;;  %v2614_v58 = vrot.slane %v2613_v11, 4 }
  0xd9   : > { %v2621_v24 = vrot.slane %v2620_v32, 4  ;;  %v2581_v62 = vrot.slane %v2580_v36, 2  ;;  %v2588_v22 = vrot.slane %v2587_v50, 2  ;;  %v2595_v52 = vrot.slane %v2594_v3, 2 }
  0xda   : > { %v2575_v60 = vmax.f32 %v2573_v46, %v2574_v2  ;;  %v2602_v31 = vrot.slane %v2601_v13, 2  ;;  %v2608_v21 = vmax.f32 %v2606_v19, %v2607_v0  ;;  %v2615_v38 = vmax.f32 %v2613_v11, %v2614_v58 }
  0xdb   : > { %v2622_v12 = vmax.f32 %v2620_v32, %v2621_v24  ;;  %v2582_v61 = vmax.f32 %v2580_v36, %v2581_v62  ;;  %v2589_v34 = vmax.f32 %v2587_v50, %v2588_v22  ;;  %v2596_v40 = vmax.f32 %v2594_v3, %v2595_v52  ;;  %v9870_v52 = vld [vmem:[#allocation13_spill] sm:$0xff] }
  0xdc   : > { %v2576_v20 = vrot.slane %v2575_v60, 1  ;;  %v2603_v54 = vmax.f32 %v2601_v13, %v2602_v31  ;;  %v2609_v15 = vrot.slane %v2608_v21, 2  ;;  %v2616_v7 = vrot.slane %v2615_v38, 2 }
  0xdd   : > { %v2623_v25 = vrot.slane %v2622_v12, 2  ;;  %v2583_v55 = vrot.slane %v2582_v61, 1  ;;  %v2590_v59 = vrot.slane %v2589_v34, 1  ;;  %v2597_v53 = vrot.slane %v2596_v40, 1 }
  0xde   : > { %v2577_v43 = vmax.f32 %v2575_v60, %v2576_v20  ;;  %v2604_v1 = vrot.slane %v2603_v54, 1  ;;  %v2610_v33 = vmax.f32 %v2608_v21, %v2609_v15  ;;  %v2617_v30 = vmax.f32 %v2615_v38, %v2616_v7 }
  0xdf   : > { %v2624_v18 = vmax.f32 %v2622_v12, %v2623_v25  ;;  %v2584_v46 = vmax.f32 %v2582_v61, %v2583_v55  ;;  %v2591_v47 = vmax.f32 %v2589_v34, %v2590_v59  ;;  %v2598_v17 = vmax.f32 %v2596_v40, %v2597_v53 }
  0xe0   : > { %v3019_v6 = vpack.c.bf16 %v2577_v43, %v2577_v43  ;;  %v2605_v49 = vmax.f32 %v2603_v54, %v2604_v1  ;;  %v2611_v19 = vrot.slane %v2610_v33, 1  ;;  %v2618_v11 = vrot.slane %v2617_v30, 1 }
  0xe1   : > { %v2625_v32 = vrot.slane %v2624_v18, 1  ;;  %v3020_v2 = vpack.c.bf16 %v2584_v46, %v2584_v46  ;;  %v3021_v36 = vpack.c.bf16 %v2591_v47, %v2591_v47  ;;  %v3022_v50 = vpack.c.bf16 %v2598_v17, %v2598_v17  ;;  %v9872_v46 = vld [vmem:[#allocation20_spill] sm:$0xff]  ;;  %v9874_v17 = vld [vmem:[#allocation25_spill] sm:$0xff] }
  0xe2   : > { %v1281_v3 = vadd.f32 %v7028_v39, %v7014_v42  ;;  %v2612_v13 = vmax.f32 %v2610_v33, %v2611_v19  ;;  %v2619_v0 = vmax.f32 %v2617_v30, %v2618_v11  ;;  %v3023_v24 = vpack.c.bf16 %v2605_v49, %v2605_v49  ;;  %v9876_v49 = vld [vmem:[#allocation14_spill] sm:$0xff] }
  0xe3   : > { %v2626_v58 = vmax.f32 %v2624_v18, %v2625_v32  ;;  %v3147_v60 = vunpack.c.l.b16 %v3019_v6  ;;  %v3148_v62 = vunpack.c.l.b16 %v3020_v2  ;;  %v3149_v22 = vunpack.c.l.b16 %v3021_v36 }
  0xe4   : > { %v1318_v31 = vmul.f32 %v9870_v52, %v6918_v14  ;;  %v3024_v21 = vpack.c.bf16 %v2612_v13, %v2612_v13  ;;  %v3025_v38 = vpack.c.bf16 %v2619_v0, %v2619_v0  ;;  %v3150_v20 = vunpack.c.l.b16 %v3022_v50  ;;  %v9878_v50 = vld [vmem:[#allocation23_spill] sm:$0xff] }
  0xe5   : > { %v3026_v12 = vpack.c.bf16 %v2626_v58, %v2626_v58  ;;  %v3212_v61 = vsel %vm3211_vm4, %v3148_v62, %v3147_v60  ;;  %v7056_v34 = vmul.f32 %v9870_v52, %v6781_v44  ;;  %v1321_v42 = vmul.f32 %v9870_v52, %v6916_v26  ;;  %v9879_v62 = vld [vmem:[#allocation22_spill] sm:$0xff] }
  0xe6   : > { %v7062_v39 = vmul.f32 %v9870_v52, %v6779_v23  ;;  %v3151_v40 = vunpack.c.l.b16 %v3023_v24  ;;  %v3152_v54 = vunpack.c.l.b16 %v3024_v21  ;;  %v3214_v15 = vsel %vm3213_vm5, %v3149_v22, %v3212_v61  ;;  %v9880_v21 = vld [vmem:[#allocation21_spill] sm:$0xff] }
  0xe7   : > { %v1283_v7 = vadd.f32 %v7036_v41, %v7021_v57  ;;  %v3153_v25 = vunpack.c.l.b16 %v3025_v38  ;;  %v3216_v43 = vsel %vm3215_vm6, %v3150_v20, %v3214_v15  ;;  %v1420_v55 = vrot.slane %v1318_v31, 1  ;;  %v9884_v15 = vld [vmem:[#allocation15_spill] sm:$0xff] }
  0xe8   : > { %v1421_v59 = vrot.slane %v7056_v34, 1  ;;  %v7069_v53 = vunpack.c.l.b16 %v3026_v12  ;;  %v3218_v1 = vsel %vm3217_vm7, %v3151_v40, %v3216_v43  ;;  %v1425_v33 = vrot.slane %v1321_v42, 1  ;;  %v9882_v12 = vld [vmem:[#allocation28_spill] sm:$0xff] }
  0xe9   : > { %v1426_v30 = vrot.slane %v7062_v39, 1  ;;  %v3220_v18 = vsel %vm3219_vm8, %v3152_v54, %v3218_v1  ;;  %v9873_v47 = vrot.slane %v9872_v46, 1  ;;  %v9875_v6 = vrot.slane %v9874_v17, 1  ;;  %v6079_v17 = vpop.permute.xlu0 %6078 }
  0xea   : > { %9871 = vst [vmem:[#allocation26_spill] sm:$0xff] %v7069_v53  ;;  %v1422_v41 = vsel %vm853_vm0, %v1420_v55, %v1421_v59  ;;  %v1560_v19 = vmul.f32 %v9876_v49, %v6918_v14  ;;  %v7085_v11 = vsel %vm3221_vm9, %v3153_v25, %v3220_v18  ;;  %v7089_v32 = vmul.f32 %v9868_v4, %v6779_v23 }
  0xeb   : > { %v1417_v57 = vsel %vm853_vm0, %v9875_v6, %v9873_v47  ;;  %9877 = vst [vmem:[#allocation17_spill] sm:$0xff] %v7085_v11  ;;  %v7094_v36 = vmul.f32 %v9876_v49, %v6781_v44  ;;  %v7098_v13 = vadd.f32 %v7032_v28, %v9878_v50  ;;  %v1523_v0 = vadd.f32 %v1422_v41, %v1281_v3  ;;  %v9885_v41 = vld [vmem:[#allocation16_spill] sm:$0xff] }
  0xec   : > { %v1521_v2 = vadd.f32 %v1417_v57, %v7039_v29  ;;  %v1563_v58 = vmul.f32 %v9876_v49, %v6916_v26  ;;  %v7104_v24 = vmul.f32 %v9876_v49, %v6779_v23  ;;  %v1427_v4 = vsel %vm853_vm0, %v1425_v33, %v1426_v30 }
  0xed   : > { %v1662_v29 = vrot.slane %v1560_v19, 2  ;;  %v1663_v60 = vrot.slane %v7094_v36, 2  ;;  %v1797_v22 = vmul.f32 %v9879_v62, %v6918_v14  ;;  %v1525_v31 = vadd.f32 %v1427_v4, %v1283_v7 }
  0xee   : > { %v9881_v38 = vrot.slane %v9880_v21, 2  ;;  %v9883_v20 = vrot.slane %v9882_v12, 2  ;;  %v1667_v40 = vrot.slane %v1563_v58, 2  ;;  %v1865_v25 = vmul.f32 %v9884_v15, %v6918_v14 }
  0xef   : > { %v1664_v42 = vsel %vm1096_vm1, %v1662_v29, %v1663_v60  ;;  %v1668_v43 = vrot.slane %v7104_v24, 2  ;;  %v1798_v7 = vmul.f32 %v9879_v62, %v6781_v44  ;;  %v1799_v1 = vmul.f32 %v9879_v62, %v6916_v26 }
  0xf0   : > { %v1659_v61 = vsel %vm1096_vm1, %v9883_v20, %v9881_v38  ;;  %v1765_v55 = vadd.f32 %v1664_v42, %v1523_v0  ;;  %v7133_v18 = vmul.f32 %v9884_v15, %v6781_v44  ;;  %v1868_v46 = vmul.f32 %v9884_v15, %v6916_v26 }
  0xf1   : > { %v1763_v54 = vadd.f32 %v1659_v61, %v1521_v2  ;;  %v1869_v47 = vmul.f32 %v9884_v15, %v6779_v23  ;;  %v1965_v57 = vrot.slane %v1865_v25, 1  ;;  %v2107_v19 = vmul.f32 %v9885_v41, %v6918_v14 }
  0xf2   : > { %v1831_v6 = vadd.f32 %v1799_v1, %v1765_v55  ;;  %v7143_v2 = vmul.f32 %v9885_v41, %v6781_v44  ;;  %v1966_v50 = vrot.slane %v7133_v18, 1  ;;  %v1970_v0 = vrot.slane %v1868_v46, 1 }
  0xf3   : > { %v1829_v33 = vadd.f32 %v1797_v22, %v1763_v54  ;;  %v1971_v58 = vrot.slane %v1869_v47, 1  ;;  %v2110_v4 = vmul.f32 %v9885_v41, %v6916_v26  ;;  %v7150_v29 = vmul.f32 %v9885_v41, %v6779_v23 }
  0xf4   : > { %v2207_v22 = vrot.slane %v2107_v19, 2  ;;  %v2208_v21 = vrot.slane %v7143_v2, 2  ;;  %v6081_v38 = vunpack.i.h.bf16 %v6079_v17  ;;  %v1967_v44 = vsel %vm853_vm0, %v1965_v57, %v1966_v50 }
  0xf5   : > { %v1972_v14 = vsel %vm853_vm0, %v1970_v0, %v1971_v58  ;;  %v2212_v12 = vrot.slane %v2110_v4, 2  ;;  %v6080_v20 = vunpack.i.l.bf16 %v6079_v17  ;;  %v2071_v61 = vadd.f32 %v1967_v44, %v1829_v33 }
  0xf6   : > { %v2073_v42 = vadd.f32 %v1972_v14, %v1831_v6  ;;  %v2209_v26 = vsel %vm1096_vm1, %v2207_v22, %v2208_v21  ;;  %v2213_v54 = vrot.slane %v7150_v29, 2  ;;  %v774_v25 = vmul.f32 %v6522_v35, %v6081_v38  ;;  %v9886_v14 = vld [vmem:[#allocation30_spill] sm:$0xff]  ;;  %v6084_v29 = vpop.permute.xlu1 %6083 }
  0xf7   : > { %v1017_v55 = vmul.f32 %v6529_v37, %v6081_v38  ;;  %v1323_v1 = vmul.f32 %v9870_v52, %v6081_v38  ;;  %v7165_v46 = vmul.f32 %v9876_v49, %v6081_v38  ;;  %v2313_v47 = vadd.f32 %v2209_v26, %v2071_v61 }
  0xf8   : > { %v2214_v33 = vsel %vm1096_vm1, %v2212_v12, %v2213_v54  ;;  %v1870_v17 = vmul.f32 %v9884_v15, %v6081_v38  ;;  %v7172_v6 = vmul.f32 %v9885_v41, %v6081_v38  ;;  %v882_v19 = vrot.slane %v774_v25, 1 }
  0xf9   : > { %v2315_v57 = vadd.f32 %v2214_v33, %v2073_v42  ;;  %v1125_v0 = vrot.slane %v1017_v55, 2  ;;  %v1428_v4 = vrot.slane %v1323_v1, 1  ;;  %v1669_v22 = vsel %vm1096_vm1, %v1667_v40, %v1668_v43 }
  0xfa   : > { %v1800_v44 = vmul.f32 %v9879_v62, %v6779_v23  ;;  %v1830_v3 = vadd.f32 %v1798_v7, %v9886_v14  ;;  %v2349_v12 = vadd.f32 %v6962_v56, %v2313_v47  ;;  %v7181_v61 = vadd.f32 %v1669_v22, %v1525_v31 }
  0xfb   : > { %v2351_v38 = vadd.f32 %v6962_v56, %v2315_v57  ;;  %v883_v42 = vsel %vm853_vm0, %v880_v45, %v882_v19  ;;  %v1670_v26 = vrot.slane %v7165_v46, 2  ;;  %v7191_v40 = vsel %vm1096_vm1, %v1123_v51, %v1125_v0 }
  0xfc   : > { %v2381_v25 = vmax.f32 %v2349_v12, 0.0  ;;  %v1973_v23 = vrot.slane %v1870_v17, 1  ;;  %v2215_v62 = vrot.slane %v7172_v6, 2  ;;  %v1429_v31 = vsel %vm853_vm0, %v1426_v30, %v1428_v4 }
  0xfd   : > { %v2383_v7 = vmax.f32 %v2351_v38, 0.0  ;;  %v771_v16 = vmul.f32 %v6522_v35, %v6080_v20  ;;  %v1014_v45 = vmul.f32 %v6529_v37, %v6080_v20  ;;  %v977_v1 = vadd.f32 %v883_v42, %v6925_v48 }
  0xfe   : > { %v2416_v55 = vsel %vm2409_vm2, %v2381_v25, -inf  ;;  %v1320_v9 = vmul.f32 %v9870_v52, %v6080_v20  ;;  %v1562_v51 = vmul.f32 %v9876_v49, %v6080_v20  ;;  %v1867_v39 = vmul.f32 %v9884_v15, %v6080_v20 }
  0xff   : > { %v2417_v46 = vsel %vm2409_vm2, %v2383_v7, -inf  ;;  %v877_v33 = vrot.slane %v771_v16, 1  ;;  %v1120_v47 = vrot.slane %v1014_v45, 2  ;;  %v1974_v30 = vsel %vm853_vm0, %v1971_v58, %v1973_v23  ;;  %v9887_v58 = vld [vmem:[#allocation32_spill] sm:$0xff]  ;;  %v6089_v45 = vpop.permute.xlu2 %6088 }
 0x100   : > { %v2418_v17 = vmax.f32 %v2416_v55, %v2417_v46  ;;  %v1423_v35 = vrot.slane %v1320_v9, 1  ;;  %v1665_v6 = vrot.slane %v1562_v51, 2  ;;  %v1968_v52 = vrot.slane %v1867_v39, 1 }
 0x101   : > { %v878_v37 = vsel %vm853_vm0, %v875_v5, %v877_v33  ;;  %v1121_v48 = vsel %vm1096_vm1, %v1118_v63, %v1120_v47  ;;  %v2109_v49 = vmul.f32 %v9885_v41, %v6080_v20  ;;  %v2216_v39 = vsel %vm1096_vm1, %v2213_v54, %v2215_v62 }
 0x102   : > { %v2480_v57 = vrot.slane %v2418_v17, 2  ;;  %v2481_v19 = vrot.slane %v2418_v17, 4  ;;  %v2482_v0 = vrot.slane %v2418_v17, 6  ;;  %v2627_v15 = vsel %vm2570_vm3, %v2418_v17, -inf }
 0x103   : > { %v2628_v4 = vrot.slane %v2627_v15, 4  ;;  %v975_v22 = vadd.f32 %v878_v37, %v9887_v58  ;;  %v1424_v10 = vsel %vm853_vm0, %v1421_v59, %v1423_v35  ;;  %v1666_v5 = vsel %vm1096_vm1, %v1663_v60, %v1665_v6 }
 0x104   : > { %v2634_v8 = vsel %vm2570_vm3, %v2480_v57, -inf  ;;  %v2641_v63 = vsel %vm2570_vm3, %v2481_v19, -inf  ;;  %v2648_v41 = vsel %vm2570_vm3, %v2482_v0, -inf  ;;  %v1524_v20 = vadd.f32 %v1424_v10, %v7098_v13 }
 0x105   : > { %v2629_v14 = vmax.f32 %v2627_v15, %v2628_v4  ;;  %v2635_v12 = vrot.slane %v2634_v8, 4  ;;  %v2642_v38 = vrot.slane %v2641_v63, 4  ;;  %v2649_v42 = vrot.slane %v2648_v41, 4 }
 0x106   : > { %v1218_v25 = vadd.f32 %v1121_v48, %v975_v22  ;;  %v1766_v34 = vadd.f32 %v1666_v5, %v1524_v20  ;;  %v1969_v59 = vsel %vm853_vm0, %v1966_v50, %v1968_v52  ;;  %v2210_v36 = vrot.slane %v2109_v49, 2 }
 0x107   : > { %v2630_v60 = vrot.slane %v2629_v14, 2  ;;  %v2636_v23 = vmax.f32 %v2634_v8, %v2635_v12  ;;  %v2643_v7 = vmax.f32 %v2641_v63, %v2642_v38  ;;  %v2650_v16 = vmax.f32 %v2648_v41, %v2649_v42  ;;  %v6107_v8 = vpop.permute.xlu0 %6106 }
 0x108   : > { %v1284_v55 = vadd.f32 %v7089_v32, %v1218_v25  ;;  %v1832_v9 = vadd.f32 %v1800_v44, %v1766_v34  ;;  %v2072_v13 = vadd.f32 %v1969_v59, %v1830_v3  ;;  %v2211_v51 = vsel %vm1096_vm1, %v2208_v21, %v2210_v36  ;;  %v7266_v59 = vld [vmem:[%s9705_s1] ss:$0 sm:$0xff] }
 0x109   : > { %v2631_v46 = vmax.f32 %v2629_v14, %v2630_v60  ;;  %v2637_v33 = vrot.slane %v2636_v23, 2  ;;  %v2644_v47 = vrot.slane %v2643_v7, 2  ;;  %v2651_v18 = vrot.slane %v2650_v16, 2  ;;  %v7275_v60 = vld [vmem:[%s9705_s1 + $0x1] ss:$0 sm:$0xff] }
 0x10a   : > { %v1671_v50 = vsel %vm1096_vm1, %v1668_v43, %v1670_v26  ;;  %v2074_v17 = vadd.f32 %v1974_v30, %v1832_v9  ;;  %v2314_v32 = vadd.f32 %v2211_v51, %v2072_v13  ;;  %v7239_v21 = vadd.f32 %v7191_v40, %v977_v1  ;;  %9888 = vst [vmem:[#allocation29_spill] sm:$0xff] %v7275_v60 }
 0x10b   : > { %v2632_v44 = vrot.slane %v2631_v46, 1  ;;  %v2638_v3 = vmax.f32 %v2636_v23, %v2637_v33  ;;  %v2645_v35 = vmax.f32 %v2643_v7, %v2644_v47  ;;  %v2652_v2 = vmax.f32 %v2650_v16, %v2651_v18  ;;  %v7294_v33 = vld [vmem:[%s9705_s1 + $0x2] ss:$0 sm:$0xff] }
 0x10c   : > { %v1526_v6 = vadd.f32 %v1429_v31, %v1284_v55  ;;  %v2316_v37 = vadd.f32 %v2216_v39, %v2074_v17  ;;  %v2350_v48 = vadd.f32 %v6962_v56, %v2314_v32  ;;  %v7243_v30 = vunpack.i.h.bf16 %v6089_v45  ;;  %v6101_v31 = vpop.permute.xlu2 %6100  ;;  %9889 = vst [vmem:[#allocation18_spill] sm:$0xff] %v7294_v33 }
 0x10d   : > { %v2633_v24 = vmax.f32 %v2631_v46, %v2632_v44  ;;  %v2639_v52 = vrot.slane %v2638_v3, 1  ;;  %v2646_v43 = vrot.slane %v2645_v35, 1  ;;  %v2653_v26 = vrot.slane %v2652_v2, 1 }
 0x10e   : > { %v2352_v54 = vadd.f32 %v6962_v56, %v2316_v37  ;;  %v2382_v62 = vmax.f32 %v2350_v48, 0.0  ;;  %v7245_v49 = vunpack.i.l.bf16 %v6089_v45  ;;  %v7247_v0 = vadd.f32 %v1671_v50, %v1526_v6 }
 0x10f   : > { %v2640_v57 = vmax.f32 %v2638_v3, %v2639_v52  ;;  %v2647_v19 = vmax.f32 %v2645_v35, %v2646_v43  ;;  %v2654_v40 = vmax.f32 %v2652_v2, %v2653_v26  ;;  %v3027_v1 = vpack.c.bf16 %v2633_v24, %v2633_v24  ;;  %v7314_v26 = vld [vmem:[%s9705_s1 + $0x4] ss:$0 sm:$0xff] }
 0x110   : > { %v2384_v15 = vmax.f32 %v2352_v54, 0.0  ;;  %v7249_v4 = vunpack.i.h.bf16 %v6084_v29  ;;  %v7251_v58 = vunpack.i.l.bf16 %v6084_v29  ;;  %v2419_v56 = vsel %vm2409_vm2, %v2382_v62, -inf }
 0x111   : > { %v3028_v22 = vpack.c.bf16 %v2640_v57, %v2640_v57  ;;  %v3029_v10 = vpack.c.bf16 %v2647_v19, %v2647_v19  ;;  %v7254_v5 = vunpack.i.h.bf16 %v6101_v31  ;;  %v3030_v63 = vpack.c.bf16 %v2654_v40, %v2654_v40 }
 0x112   : > { %v2420_v41 = vsel %vm2409_vm2, %v2384_v15, -inf  ;;  %v7257_v20 = vunpack.i.l.bf16 %v6101_v31  ;;  %v7259_v14 = vunpack.i.h.bf16 %v6107_v8  ;;  %v3155_v12 = vunpack.c.l.b16 %v3027_v1  ;;  %v7329_v15 = vld [vmem:[%s9705_s1 + $0x3] ss:$0 sm:$0xff] }
 0x113   : > { %v3156_v38 = vunpack.c.l.b16 %v3028_v22  ;;  %v3157_v42 = vunpack.c.l.b16 %v3029_v10  ;;  %v2421_v25 = vmax.f32 %v2419_v56, %v2420_v41  ;;  %v7261_v34 = vunpack.i.l.bf16 %v6107_v8  ;;  %v7338_v8 = vld [vmem:[%s9705_s1 + $0x5] ss:$0 sm:$0xff] }
 0x114   : > { %v7270_v36 = vmul.f32 %v7266_v59, %v7245_v49  ;;  %v7279_v23 = vmul.f32 %v7275_v60, %v7245_v49  ;;  %v7283_v7 = vmul.f32 %v7275_v60, %v7243_v30  ;;  %v3158_v13 = vunpack.c.l.b16 %v3030_v63 }
 0x115   : > { %v3223_v16 = vsel %vm3211_vm4, %v3156_v38, %v3155_v12  ;;  %v2483_v45 = vrot.slane %v2421_v25, 2  ;;  %v2484_v55 = vrot.slane %v2421_v25, 4  ;;  %v2485_v9 = vrot.slane %v2421_v25, 6 }
 0x116   : > { %v2655_v51 = vsel %vm2570_vm3, %v2421_v25, -inf  ;;  %v7289_v46 = vmul.f32 %v7266_v59, %v7243_v30  ;;  %v7298_v47 = vmul.f32 %v7294_v33, %v7245_v49  ;;  %v3224_v18 = vsel %vm3213_vm5, %v3157_v42, %v3223_v16 }
 0x117   : > { %v2656_v50 = vrot.slane %v2655_v51, 4  ;;  %v2662_v39 = vsel %vm2570_vm3, %v2483_v45, -inf  ;;  %v2669_v17 = vsel %vm2570_vm3, %v2484_v55, -inf  ;;  %v2676_v3 = vsel %vm2570_vm3, %v2485_v9, -inf  ;;  %v7357_v9 = vld [vmem:[%s9705_s1 + $0x7] ss:$0 sm:$0xff] }
 0x118   : > { %v2663_v32 = vrot.slane %v2662_v39, 4  ;;  %v2670_v44 = vrot.slane %v2669_v17, 4  ;;  %v7306_v35 = vmul.f32 %v7294_v33, %v7243_v30  ;;  %v2677_v6 = vrot.slane %v2676_v3, 4 }
 0x119   : > { %v2657_v2 = vmax.f32 %v2655_v51, %v2656_v50  ;;  %v9744_v48 = vrot.slane %v7283_v7, 1  ;;  %v3225_v24 = vsel %vm3215_vm6, %v3158_v13, %v3224_v18  ;;  %v7318_v29 = vmul.f32 %v7314_v26, %v7245_v49 }
 0x11a   : > { %v2664_v52 = vmax.f32 %v2662_v39, %v2663_v32  ;;  %v2671_v43 = vmax.f32 %v2669_v17, %v2670_v44  ;;  %v2678_v62 = vmax.f32 %v2676_v3, %v2677_v6  ;;  %v7323_v19 = vmul.f32 %v7314_v26, %v7243_v30  ;;  %v7370_v39 = vld [vmem:[%s9705_s1 + $0x8] ss:$0 sm:$0xff]  ;;  %v6095_v32 = vpop.permute.xlu1 %6094 }
 0x11b   : > { %v2658_v54 = vrot.slane %v2657_v2, 2  ;;  %v9743_v31 = vrot.slane %v7306_v35, 2  ;;  %v7333_v22 = vmul.f32 %v7329_v15, %v7245_v49  ;;  %v7342_v63 = vmul.f32 %v7338_v8, %v7245_v49 }
 0x11c   : > { %v2665_v40 = vrot.slane %v2664_v52, 2  ;;  %v2672_v1 = vrot.slane %v2671_v43, 2  ;;  %v2679_v56 = vrot.slane %v2678_v62, 2  ;;  %v7346_v41 = vmul.f32 %v7338_v8, %v7243_v30 }
 0x11d   : > { %v2659_v10 = vmax.f32 %v2657_v2, %v2658_v54  ;;  %v7350_v42 = vmul.f32 %v7329_v15, %v7243_v30  ;;  %v7361_v13 = vmul.f32 %v7357_v9, %v7245_v49  ;;  %v7365_v50 = vmul.f32 %v7357_v9, %v7243_v30  ;;  %v7381_v54 = vld [vmem:[%s9705_s1 + $0x6] ss:$0 sm:$0xff] }
 0x11e   : > { %v2666_v12 = vmax.f32 %v2664_v52, %v2665_v40  ;;  %v2673_v38 = vmax.f32 %v2671_v43, %v2672_v1  ;;  %v2680_v45 = vmax.f32 %v2678_v62, %v2679_v56  ;;  %v7374_v17 = vmul.f32 %v7370_v39, %v7245_v49 }
 0x11f   : > { %v2660_v16 = vrot.slane %v2659_v10, 1  ;;  %v7385_v62 = vmul.f32 %v7381_v54, %v7245_v49  ;;  %v7389_v40 = vmul.f32 %v7381_v54, %v7243_v30 }
 0x120   : > { %v2667_v51 = vrot.slane %v2666_v12, 1  ;;  %v2674_v18 = vrot.slane %v2673_v38, 1  ;;  %v2681_v3 = vrot.slane %v2680_v45, 1 }
 0x121   : > { %v2661_v44 = vmax.f32 %v2659_v10, %v2660_v16  ;;  %v6097_v16 = vunpack.i.h.bf16 %v6095_v32 }
 0x122   : > { %v2668_v52 = vmax.f32 %v2666_v12, %v2667_v51  ;;  %v2675_v43 = vmax.f32 %v2673_v38, %v2674_v18  ;;  %v2682_v1 = vmax.f32 %v2680_v45, %v2681_v3  ;;  %v7395_v51 = vmul.f32 %v7370_v39, %v7243_v30 }
 0x123   : > { %v3031_v10 = vpack.c.bf16 %v2661_v44, %v2661_v44  ;;  %v780_v2 = vmul.f32 %v7275_v60, %v6097_v16  ;;  %v1023_v25 = vmul.f32 %v7294_v33, %v6097_v16  ;;  %v1329_v44 = vmul.f32 %v7314_v26, %v6097_v16 }
 0x124   : > { %v3032_v12 = vpack.c.bf16 %v2668_v52, %v2668_v52  ;;  %v3034_v49 = vpack.c.bf16 %v2682_v1, %v2682_v1  ;;  %v3033_v45 = vpack.c.bf16 %v2675_v43, %v2675_v43  ;;  %v1571_v3 = vmul.f32 %v7338_v8, %v6097_v16 }
 0x125   : > { %v3159_v28 = vunpack.c.l.b16 %v3031_v10  ;;  %v7402_v52 = vunpack.i.l.bf16 %v6095_v32  ;;  %v892_v57 = vrot.slane %v780_v2, 1  ;;  %v1135_v38 = vrot.slane %v1023_v25, 2 }
 0x126   : > { %v7404_v56 = vunpack.c.l.b16 %v3034_v49  ;;  %v3160_v18 = vunpack.c.l.b16 %v3032_v12  ;;  %v1438_v1 = vrot.slane %v1329_v44, 1  ;;  %v1680_v10 = vrot.slane %v1571_v3, 2 }
 0x127   : > { %v3226_v30 = vsel %vm3217_vm7, %v3159_v28, %v3225_v24  ;;  %v1876_v37 = vmul.f32 %v7357_v9, %v6097_v16  ;;  %v893_v43 = vsel %vm853_vm0, %v9744_v48, %v892_v57  ;;  %v2118_v32 = vmul.f32 %v7370_v39, %v6097_v16 }
 0x128   : > { %9890 = vst [vmem:[#allocation24_spill] sm:$0xff] %v7404_v56  ;;  %v703_v49 = vmul.f32 %v7266_v59, %v7251_v58  ;;  %v7415_v55 = vunpack.c.l.b16 %v3033_v45  ;;  %v7418_v28 = vsel %vm3219_vm8, %v3160_v18, %v3226_v30  ;;  %v1136_v25 = vsel %vm1096_vm1, %v9743_v31, %v1135_v38 }
 0x129   : > { %9892 = vst [vmem:[#allocation19_spill] sm:$0xff] %v7418_v28  ;;  %v981_v2 = vadd.f32 %v893_v43, %v7289_v46  ;;  %v9893_v57 = vrot.slane %v7323_v19, 1  ;;  %v775_v12 = vmul.f32 %v7275_v60, %v7251_v58  ;;  %v777_v18 = vmul.f32 %v7275_v60, %v7402_v52 }
 0x12a   : > { %9891 = vst [vmem:[#allocation31_spill] sm:$0xff] %v7415_v55  ;;  %v9894_v45 = vrot.slane %v7346_v41, 2  ;;  %v1983_v3 = vrot.slane %v1876_v37, 1  ;;  %v778_v38 = vmul.f32 %v7275_v60, %v7249_v4  ;;  %v1018_v46 = vmul.f32 %v7294_v33, %v7251_v58 }
 0x12b   : > { %v1439_v16 = vsel %vm853_vm0, %v9893_v57, %v1438_v1  ;;  %v2225_v30 = vrot.slane %v2118_v32, 2  ;;  %v884_v1 = vrot.slane %v775_v12, 1  ;;  %v887_v43 = vrot.slane %v777_v18, 1 }
 0x12c   : > { %v7436_v44 = vsel %vm1096_vm1, %v9894_v45, %v1680_v10  ;;  %v1020_v57 = vmul.f32 %v7294_v33, %v7402_v52  ;;  %v705_v24 = vmul.f32 %v7266_v59, %v7249_v4  ;;  %v889_v31 = vrot.slane %v778_v38, 1 }
 0x12d   : > { %v1021_v10 = vmul.f32 %v7294_v33, %v7249_v4  ;;  %v1127_v37 = vrot.slane %v1018_v46, 2  ;;  %v9895_v45 = vrot.slane %v7279_v23, 1  ;;  %v1253_v18 = vmul.f32 %v7329_v15, %v7251_v58 }
 0x12e   : > { %v1130_v12 = vrot.slane %v1020_v57, 2  ;;  %v7456_v56 = vadd.f32 %v1136_v25, %v981_v2  ;;  %v9897_v38 = vrot.slane %v7365_v50, 1  ;;  %v9898_v53 = vrot.slane %v7395_v51, 2 }
 0x12f   : > { %v886_v48 = vsel %vm853_vm0, %v884_v1, %v9895_v45  ;;  %v9896_v6 = vmov %v9895_v45  ;;  %v9899_v23 = vrot.slane %v7283_v7, 1  ;;  %v1324_v57 = vmul.f32 %v7314_v26, %v7251_v58 }
 0x130   : > { %v888_v32 = vsel %vm853_vm0, %v9896_v6, %v887_v43  ;;  %v1984_v55 = vsel %vm853_vm0, %v9897_v38, %v1983_v3  ;;  %v978_v28 = vadd.f32 %v886_v48, %v703_v49  ;;  %v7465_v1 = vsel %vm1096_vm1, %v9898_v53, %v2225_v30 }
 0x131   : > { %v979_v46 = vadd.f32 %v888_v32, %v7270_v36  ;;  %v891_v6 = vsel %vm853_vm0, %v889_v31, %v9899_v23  ;;  %v9900_v43 = vrot.slane %v7298_v47, 2  ;;  %v1132_v48 = vrot.slane %v1021_v10, 2 }
 0x132   : > { %v1285_v53 = vadd.f32 %v1253_v18, %v7024_v27  ;;  %v1326_v7 = vmul.f32 %v7314_v26, %v7402_v52  ;;  %v1327_v31 = vmul.f32 %v7314_v26, %v7249_v4  ;;  %v1566_v30 = vmul.f32 %v7338_v8, %v7251_v58 }
 0x133   : > { %v1129_v25 = vsel %vm1096_vm1, %v1127_v37, %v9900_v43  ;;  %v9901_v2 = vmov %v9900_v43  ;;  %v980_v47 = vadd.f32 %v891_v6, %v705_v24  ;;  %v1255_v10 = vmul.f32 %v7329_v15, %v7249_v4 }
 0x134   : > { %v1131_v3 = vsel %vm1096_vm1, %v9901_v2, %v1130_v12  ;;  %v1221_v49 = vadd.f32 %v1129_v25, %v978_v28  ;;  %v1430_v37 = vrot.slane %v1324_v57, 1  ;;  %v1286_v45 = vadd.f32 %v7333_v22, %v7239_v21 }
 0x135   : > { %v1222_v36 = vadd.f32 %v1131_v3, %v979_v46  ;;  %v1433_v27 = vrot.slane %v1326_v7, 1  ;;  %v1435_v32 = vrot.slane %v1327_v31, 1  ;;  %v1568_v12 = vmul.f32 %v7338_v8, %v7402_v52 }
 0x136   : > { %v1287_v18 = vadd.f32 %v1255_v10, %v1221_v49  ;;  %v9902_v38 = vrot.slane %v7318_v29, 1  ;;  %v1569_v24 = vmul.f32 %v7338_v8, %v7249_v4  ;;  %v1672_v23 = vrot.slane %v1566_v30, 2 }
 0x137   : > { %v1288_v28 = vadd.f32 %v7350_v42, %v1222_v36  ;;  %v9903_v42 = vrot.slane %v7306_v35, 2  ;;  %v1675_v25 = vrot.slane %v1568_v12, 2  ;;  %v9905_v36 = vrot.slane %v7342_v63, 2  ;;  %v6117_v12 = vpop.permute.xlu2 %6116 }
 0x138   : > { %v1432_v46 = vsel %vm853_vm0, %v1430_v37, %v9902_v38  ;;  %v9904_v21 = vmov %v9902_v38  ;;  %v9906_v7 = vrot.slane %v7323_v19, 1  ;;  %v1834_v19 = vadd.f32 %v7385_v62, %v7247_v0 }
 0x139   : > { %v1134_v6 = vsel %vm1096_vm1, %v1132_v48, %v9903_v42  ;;  %v1434_v22 = vsel %vm853_vm0, %v9904_v21, %v1433_v27  ;;  %v1527_v43 = vadd.f32 %v1432_v46, %v1285_v53  ;;  %v1530_v49 = vadd.f32 %v1439_v16, %v1288_v28 }
 0x13a   : > { %v7503_v2 = vadd.f32 %v1134_v6, %v980_v47  ;;  %v1528_v3 = vadd.f32 %v1434_v22, %v1286_v45  ;;  %v1674_v57 = vsel %vm1096_vm1, %v1672_v23, %v9905_v36  ;;  %v1437_v35 = vsel %vm853_vm0, %v1435_v32, %v9906_v7 }
 0x13b   : > { %v9907_v48 = vmov %v9905_v36  ;;  %v1769_v31 = vadd.f32 %v1674_v57, %v1527_v43  ;;  %v1801_v53 = vmul.f32 %v7381_v54, %v7251_v58  ;;  %v1529_v30 = vadd.f32 %v1437_v35, %v1287_v18 }
 0x13c   : > { %v1676_v29 = vsel %vm1096_vm1, %v9907_v48, %v1675_v25  ;;  %v1677_v47 = vrot.slane %v1569_v24, 2  ;;  %v1803_v16 = vmul.f32 %v7381_v54, %v7249_v4  ;;  %v1871_v63 = vmul.f32 %v7357_v9, %v7251_v58 }
 0x13d   : > { %v1770_v10 = vadd.f32 %v1676_v29, %v1528_v3  ;;  %v1833_v28 = vadd.f32 %v1801_v53, %v7181_v61  ;;  %v1873_v37 = vmul.f32 %v7357_v9, %v7402_v52  ;;  %v1874_v27 = vmul.f32 %v7357_v9, %v7249_v4 }
 0x13e   : > { %v2113_v32 = vmul.f32 %v7370_v39, %v7251_v58  ;;  %v2115_v61 = vmul.f32 %v7370_v39, %v7402_v52  ;;  %v1835_v18 = vadd.f32 %v1803_v16, %v1769_v31  ;;  %v1975_v0 = vrot.slane %v1871_v63, 1 }
 0x13f   : > { %v1836_v45 = vadd.f32 %v7389_v40, %v1770_v10  ;;  %v1978_v62 = vrot.slane %v1873_v37, 1  ;;  %v2116_v38 = vmul.f32 %v7370_v39, %v7249_v4  ;;  %v1980_v46 = vrot.slane %v1874_v27, 1 }
 0x140   : > { %v2217_v23 = vrot.slane %v2113_v32, 2  ;;  %v2220_v40 = vrot.slane %v2115_v61, 2  ;;  %v9908_v42 = vrot.slane %v7361_v13, 1  ;;  %v6119_v22 = vunpack.i.h.bf16 %v6117_v12 }
 0x141   : > { %v2078_v24 = vadd.f32 %v1984_v55, %v1836_v45  ;;  %v2222_v52 = vrot.slane %v2116_v38, 2  ;;  %v7541_v43 = vadd.f32 %v7436_v44, %v1530_v49  ;;  %v9910_v25 = vrot.slane %v7365_v50, 1 }
 0x142   : > { %v1977_v6 = vsel %vm853_vm0, %v1975_v0, %v9908_v42  ;;  %v9909_v58 = vmov %v9908_v42  ;;  %v9911_v57 = vrot.slane %v7374_v17, 2  ;;  %v9913_v44 = vrot.slane %v7346_v41, 2  ;;  %v7564_v17 = vld [vmem:[%s9706_s2] ss:$0 sm:$0xff] }
 0x143   : > { %v1979_v21 = vsel %vm853_vm0, %v9909_v58, %v1978_v62  ;;  %v1982_v4 = vsel %vm853_vm0, %v1980_v46, %v9910_v25  ;;  %v2075_v55 = vadd.f32 %v1977_v6, %v1833_v28  ;;  %v2320_v48 = vadd.f32 %v7465_v1, %v2078_v24  ;;  %9915 = vst [vmem:[#allocation27_spill] sm:$0xff] %v7564_v17 }
 0x144   : > { %v2076_v3 = vadd.f32 %v1979_v21, %v1834_v19  ;;  %v2077_v36 = vadd.f32 %v1982_v4, %v1835_v18  ;;  %v2219_v7 = vsel %vm1096_vm1, %v2217_v23, %v9911_v57  ;;  %v9912_v13 = vmov %v9911_v57 }
 0x145   : > { %v2221_v35 = vsel %vm1096_vm1, %v9912_v13, %v2220_v40  ;;  %v1679_v49 = vsel %vm1096_vm1, %v1677_v47, %v9913_v44  ;;  %v9914_v50 = vrot.slane %v7395_v51, 2  ;;  %v2317_v31 = vadd.f32 %v2219_v7, %v2075_v55 }
 0x146   : > { %v2318_v53 = vadd.f32 %v2221_v35, %v2076_v3  ;;  %v7559_v10 = vadd.f32 %v1679_v49, %v1529_v30  ;;  %v2356_v1 = vadd.f32 %v7564_v17, %v2320_v48  ;;  %v7568_v41 = vmul.f32 %v7275_v60, %v6119_v22 }
 0x147   : > { %v2224_v29 = vsel %vm1096_vm1, %v2222_v52, %v9914_v50  ;;  %v2353_v47 = vadd.f32 %v7564_v17, %v2317_v31  ;;  %v7573_v28 = vmul.f32 %v7294_v33, %v6119_v22  ;;  %v7576_v30 = vmul.f32 %v7314_v26, %v6119_v22 }
 0x148   : > { %v2319_v16 = vadd.f32 %v2224_v29, %v2077_v36  ;;  %9916 = vst [vmem:[#allocation13_spill] sm:$0xff] %v7568_v41  ;;  %v2354_v51 = vadd.f32 %v7564_v17, %v2318_v53  ;;  %v2388_v63 = vmax.f32 %v2356_v1, 0.0  ;;  %v7580_v37 = vmul.f32 %v7266_v59, %v6119_v22  ;;  %v5897_v41 = vld [vmem:[#allocation4 + $0x58] sm:$0xff] }
 0x149   : > { %9917 = vst [vmem:[#allocation20_spill] sm:$0xff] %v7573_v28  ;;  %v7583_v45 = vmul.f32 %v7338_v8, %v6119_v22  ;;  %v2385_v27 = vmax.f32 %v2353_v47, 0.0  ;;  %v7586_v61 = vmul.f32 %v7329_v15, %v6119_v22  ;;  %v7589_v18 = vmul.f32 %v7357_v9, %v6119_v22  ;;  %3770 = vmatpush.bf16.msra.mxu2 %v5897_v41 }
 0x14a   : > { %9918 = vst [vmem:[#allocation25_spill] sm:$0xff] %v7576_v30  ;;  %v2355_v19 = vadd.f32 %v7564_v17, %v2319_v16  ;;  %v2386_v32 = vmax.f32 %v2354_v51, 0.0  ;;  %v2426_v62 = vsel %vm2409_vm2, %v2388_v63, -inf  ;;  %v7594_v46 = vmul.f32 %v7370_v39, %v6119_v22 }
 0x14b   : > { %9919 = vst [vmem:[#allocation14_spill] sm:$0xff] %v7580_v37  ;;  %v7600_v42 = vmul.f32 %v7381_v54, %v6119_v22  ;;  %v2422_v6 = vsel %vm2409_vm2, %v2385_v27, -inf  ;;  %v7607_v3 = vunpack.i.l.bf16 %v6117_v12 }
 0x14c   : > { %9920 = vst [vmem:[#allocation23_spill] sm:$0xff] %v7583_v45  ;;  %v2387_v0 = vmax.f32 %v2355_v19, 0.0  ;;  %v2425_v24 = vsel %vm2409_vm2, %v2386_v32, -inf  ;;  %v708_v45 = vmul.f32 %v7266_v59, %v7261_v34 }
 0x14d   : > { %9921 = vst [vmem:[#allocation22_spill] sm:$0xff] %v7586_v61  ;;  %v2427_v21 = vmax.f32 %v2425_v24, %v2426_v62 }
 0x14e   : > { %9922 = vst [vmem:[#allocation21_spill] sm:$0xff] %v7589_v18  ;;  %v2423_v58 = vsel %vm2409_vm2, %v2387_v0, -inf }
 0x14f   : > { %9923 = vst [vmem:[#allocation28_spill] sm:$0xff] %v7594_v46  ;;  %v2424_v25 = vmax.f32 %v2422_v6, %v2423_v58  ;;  %v2489_v36 = vrot.slane %v2427_v21, 2  ;;  %v2490_v57 = vrot.slane %v2427_v21, 4  ;;  %v2491_v7 = vrot.slane %v2427_v21, 6 }
 0x150   : > { %9924 = vst [vmem:[#allocation15_spill] sm:$0xff] %v7600_v42  ;;  %v2711_v22 = vsel %vm2570_vm3, %v2427_v21, -inf  ;;  %v1260_v46 = vmul.f32 %v7329_v15, %v7259_v14 }
 0x151   : > { %v2486_v13 = vrot.slane %v2424_v25, 2  ;;  %v2487_v35 = vrot.slane %v2424_v25, 4  ;;  %v2488_v48 = vrot.slane %v2424_v25, 6  ;;  %v2683_v44 = vsel %vm2570_vm3, %v2424_v25, -inf }
 0x152   : > { %v2684_v49 = vrot.slane %v2683_v44, 4  ;;  %v2712_v50 = vrot.slane %v2711_v22, 4  ;;  %v2718_v29 = vsel %vm2570_vm3, %v2489_v36, -inf  ;;  %v2725_v31 = vsel %vm2570_vm3, %v2490_v57, -inf }
 0x153   : > { %v2690_v53 = vsel %vm2570_vm3, %v2486_v13, -inf  ;;  %v2697_v12 = vsel %vm2570_vm3, %v2487_v35, -inf  ;;  %v2704_v16 = vsel %vm2570_vm3, %v2488_v48, -inf  ;;  %v2719_v1 = vrot.slane %v2718_v29, 4 }
 0x154   : > { %v2685_v47 = vmax.f32 %v2683_v44, %v2684_v49  ;;  %v2691_v51 = vrot.slane %v2690_v53, 4  ;;  %v2698_v19 = vrot.slane %v2697_v12, 4  ;;  %v2705_v63 = vrot.slane %v2704_v16, 4 }
 0x155   : > { %v2713_v27 = vmax.f32 %v2711_v22, %v2712_v50  ;;  %v2720_v32 = vmax.f32 %v2718_v29, %v2719_v1  ;;  %v2726_v0 = vrot.slane %v2725_v31, 4  ;;  %v2732_v62 = vsel %vm2570_vm3, %v2491_v7, -inf }
 0x156   : > { %v2686_v24 = vrot.slane %v2685_v47, 2  ;;  %v2692_v6 = vmax.f32 %v2690_v53, %v2691_v51  ;;  %v2699_v58 = vmax.f32 %v2697_v12, %v2698_v19  ;;  %v2706_v21 = vmax.f32 %v2704_v16, %v2705_v63 }
 0x157   : > { %v2714_v25 = vrot.slane %v2713_v27, 2  ;;  %v2721_v36 = vrot.slane %v2720_v32, 2  ;;  %v2727_v57 = vmax.f32 %v2725_v31, %v2726_v0  ;;  %v2733_v13 = vrot.slane %v2732_v62, 4 }
 0x158   : > { %v2687_v35 = vmax.f32 %v2685_v47, %v2686_v24  ;;  %v2693_v48 = vrot.slane %v2692_v6, 2  ;;  %v2700_v52 = vrot.slane %v2699_v58, 2  ;;  %v2707_v44 = vrot.slane %v2706_v21, 2 }
 0x159   : > { %v2715_v49 = vmax.f32 %v2713_v27, %v2714_v25  ;;  %v2722_v23 = vmax.f32 %v2720_v32, %v2721_v36  ;;  %v2728_v55 = vrot.slane %v2727_v57, 2  ;;  %v2734_v22 = vmax.f32 %v2732_v62, %v2733_v13 }
 0x15a   : > { %v2688_v50 = vrot.slane %v2687_v35, 1  ;;  %v2694_v29 = vmax.f32 %v2692_v6, %v2693_v48  ;;  %v2701_v1 = vmax.f32 %v2699_v58, %v2700_v52  ;;  %v2708_v7 = vmax.f32 %v2706_v21, %v2707_v44 }
 0x15b   : > { %v2716_v4 = vrot.slane %v2715_v49, 1  ;;  %v2723_v53 = vrot.slane %v2722_v23, 1  ;;  %v2729_v12 = vmax.f32 %v2727_v57, %v2728_v55  ;;  %v2735_v16 = vrot.slane %v2734_v22, 2 }
 0x15c   : > { %v2689_v51 = vmax.f32 %v2687_v35, %v2688_v50  ;;  %v2695_v19 = vrot.slane %v2694_v29, 1  ;;  %v2702_v31 = vrot.slane %v2701_v1, 1  ;;  %v2709_v63 = vrot.slane %v2708_v7, 1 }
 0x15d   : > { %v2717_v47 = vmax.f32 %v2715_v49, %v2716_v4  ;;  %v2724_v0 = vmax.f32 %v2722_v23, %v2723_v53  ;;  %v2730_v24 = vrot.slane %v2729_v12, 1  ;;  %v2736_v40 = vmax.f32 %v2734_v22, %v2735_v16 }
 0x15e   : > { %v2696_v27 = vmax.f32 %v2694_v29, %v2695_v19  ;;  %v2703_v32 = vmax.f32 %v2701_v1, %v2702_v31  ;;  %v2710_v25 = vmax.f32 %v2708_v7, %v2709_v63  ;;  %v3035_v62 = vpack.c.bf16 %v2689_v51, %v2689_v51 }
 0x15f   : > { %v2731_v36 = vmax.f32 %v2729_v12, %v2730_v24  ;;  %v2737_v6 = vrot.slane %v2736_v40, 1  ;;  %v3039_v52 = vpack.c.bf16 %v2717_v47, %v2717_v47  ;;  %v3040_v58 = vpack.c.bf16 %v2724_v0, %v2724_v0 }
 0x160   : > { %v3036_v21 = vpack.c.bf16 %v2696_v27, %v2696_v27  ;;  %v3037_v13 = vpack.c.bf16 %v2703_v32, %v2703_v32  ;;  %v3038_v55 = vpack.c.bf16 %v2710_v25, %v2710_v25  ;;  %v7619_v57 = vmul.f32 %v7266_v59, %v7257_v20 }
 0x161   : > { %v2738_v35 = vmax.f32 %v2736_v40, %v2737_v6  ;;  %v3041_v4 = vpack.c.bf16 %v2731_v36, %v2731_v36  ;;  %v7623_v23 = vmul.f32 %v7275_v60, %v7607_v3  ;;  %v7627_v48 = vmul.f32 %v7294_v33, %v7607_v3 }
 0x162   : > { %v3163_v44 = vunpack.c.l.b16 %v3035_v62  ;;  %v3164_v49 = vunpack.c.l.b16 %v3036_v21  ;;  %v3165_v22 = vunpack.c.l.b16 %v3037_v13  ;;  %v7631_v50 = vmul.f32 %v7266_v59, %v7607_v3 }
 0x163   : > { %9925 = vst [vmem:[#allocation16_spill] sm:$0xff] %v7623_v23  ;;  %v3042_v29 = vpack.c.bf16 %v2738_v35, %v2738_v35  ;;  %v7633_v1 = vunpack.c.l.b16 %v3039_v52  ;;  %v7635_v40 = vunpack.c.l.b16 %v3040_v58  ;;  %v7639_v7 = vmul.f32 %v7314_v26, %v7607_v3  ;;  %v6112_v52 = vpop.permute.xlu1 %6111 }
 0x164   : > { %9926 = vst [vmem:[#allocation30_spill] sm:$0xff] %v7627_v48  ;;  %v3166_v53 = vunpack.c.l.b16 %v3038_v55  ;;  %v3229_v12 = vsel %vm3211_vm4, %v3164_v49, %v3163_v44  ;;  %v7644_v16 = vmul.f32 %v7338_v8, %v7607_v3  ;;  %v7648_v51 = vmul.f32 %v7357_v9, %v7607_v3 }
 0x165   : > { %9927 = vst [vmem:[#allocation32_spill] sm:$0xff] %v7631_v50  ;;  %v7650_v19 = vunpack.c.l.b16 %v3041_v4  ;;  %v3230_v31 = vsel %vm3213_vm5, %v3165_v22, %v3229_v12  ;;  %v7655_v0 = vunpack.c.l.b16 %v3042_v29  ;;  %v7660_v27 = vmul.f32 %v7370_v39, %v7607_v3  ;;  %v5889_v50 = vld [vmem:[#allocation4 + $0x18] sm:$0xff] }
 0x166   : > { %9928 = vst [vmem:[#allocation33_spill] sm:$0xff] %v7635_v40  ;;  %v7664_v32 = vmul.f32 %v7266_v59, %v7254_v5  ;;  %v7667_v25 = vsel %vm3215_vm6, %v3166_v53, %v3230_v31  ;;  %v7672_v36 = vmul.f32 %v7275_v60, %v7257_v20  ;;  %v7676_v6 = vmul.f32 %v7275_v60, %v7254_v5 }
 0x167   : > { %9929 = vst [vmem:[#allocation34_spill] sm:$0xff] %v7639_v7  ;;  %v7681_v58 = vmul.f32 %v7294_v33, %v7257_v20  ;;  %v7685_v21 = vmul.f32 %v7294_v33, %v7254_v5  ;;  %v7689_v13 = vmul.f32 %v7329_v15, %v7257_v20  ;;  %v7695_v4 = vmul.f32 %v7329_v15, %v7254_v5 }
 0x168   : > { %9930 = vst [vmem:[#allocation35_spill] sm:$0xff] %v7644_v16  ;;  %v894_v55 = vrot.slane %v7672_v36, 1  ;;  %v899_v35 = vrot.slane %v7676_v6, 1  ;;  %v7699_v44 = vmul.f32 %v7329_v15, %v7607_v3  ;;  %v7705_v29 = vmul.f32 %v7314_v26, %v7257_v20  ;;  %3641 = vmatpush.bf16.msra.mxu1 %v5889_v50 }
 0x169   : > { %9931 = vst [vmem:[#allocation36_spill] sm:$0xff] %v7648_v51  ;;  %v7709_v53 = vmul.f32 %v7314_v26, %v7254_v5  ;;  %v7713_v12 = vmul.f32 %v7338_v8, %v7257_v20  ;;  %v7717_v31 = vmul.f32 %v7338_v8, %v7254_v5  ;;  %v7721_v36 = vmul.f32 %v7381_v54, %v7257_v20 }
 0x16a   : > { %9932 = vst [vmem:[#allocation37_spill] sm:$0xff] %v7650_v19  ;;  %v7725_v6 = vmul.f32 %v7381_v54, %v7254_v5  ;;  %v7731_v24 = vmul.f32 %v7381_v54, %v7607_v3  ;;  %v7735_v63 = vmul.f32 %v7357_v9, %v7257_v20  ;;  %v7741_v49 = vmul.f32 %v7357_v9, %v7254_v5 }
 0x16b   : > { %9933 = vst [vmem:[#allocation38_spill] sm:$0xff] %v7655_v0  ;;  %v7745_v62 = vmul.f32 %v7370_v39, %v7257_v20  ;;  %v7750_v3 = vmul.f32 %v7370_v39, %v7254_v5  ;;  %v6114_v19 = vunpack.i.h.bf16 %v6112_v52  ;;  %v7752_v11 = vunpack.i.l.bf16 %v6112_v52 }
 0x16c   : > { %v710_v20 = vmul.f32 %v7266_v59, %v7259_v14  ;;  %v782_v59 = vmul.f32 %v7275_v60, %v7261_v34  ;;  %v1028_v16 = vmul.f32 %v7294_v33, %v7259_v14  ;;  %v1258_v48 = vmul.f32 %v7329_v15, %v7261_v34 }
 0x16d   : > { %v786_v47 = vmul.f32 %v7275_v60, %v6114_v19  ;;  %v1029_v5 = vmul.f32 %v7294_v33, %v6114_v19  ;;  %v7764_v61 = vmul.f32 %v7314_v26, %v6114_v19  ;;  %v7767_v52 = vmul.f32 %v7338_v8, %v6114_v19 }
 0x16e   : > { %v7770_v22 = vmul.f32 %v7357_v9, %v6114_v19  ;;  %v7773_v38 = vmul.f32 %v7370_v39, %v6114_v19  ;;  %v783_v42 = vmul.f32 %v7275_v60, %v7752_v11  ;;  %v785_v19 = vmul.f32 %v7275_v60, %v7259_v14  ;;  %v5888_v60 = vld [vmem:[#allocation4 + $0x10] sm:$0xff] }
 0x16f   : > { %v902_v28 = vrot.slane %v786_v47, 1  ;;  %v1145_v37 = vrot.slane %v1029_v5, 2  ;;  %v1448_v51 = vrot.slane %v7764_v61, 1  ;;  %v895_v7 = vrot.slane %v782_v59, 1  ;;  %3642 = vmatpush.bf16.msra.mxu1 %v5888_v60 }
 0x170   : > { %9934 = vst [vmem:[#allocation39_spill] sm:$0xff] %v7773_v38  ;;  %v897_v23 = vrot.slane %v783_v42, 1  ;;  %v1025_v47 = vmul.f32 %v7294_v33, %v7261_v34  ;;  %v1026_v61 = vmul.f32 %v7294_v33, %v7752_v11  ;;  %v900_v5 = vrot.slane %v785_v19, 1 }
 0x171   : > { %v896_v59 = vsel %vm853_vm0, %v894_v55, %v895_v7  ;;  %v9935_v15 = vrot.slane %v7681_v58, 2  ;;  %v9936_v41 = vrot.slane %v7685_v21, 2  ;;  %v1573_v58 = vmul.f32 %v7338_v8, %v7261_v34 }
 0x172   : > { %v898_v42 = vsel %vm853_vm0, %v895_v7, %v897_v23  ;;  %v1138_v18 = vrot.slane %v1025_v47, 2  ;;  %v1140_v30 = vrot.slane %v1026_v61, 2  ;;  %v901_v40 = vsel %vm853_vm0, %v899_v35, %v900_v5 }
 0x173   : > { %v903_v19 = vsel %vm853_vm0, %v900_v5, %v902_v28  ;;  %v982_v0 = vadd.f32 %v896_v59, %v7619_v57  ;;  %v983_v33 = vadd.f32 %v898_v42, %v708_v45  ;;  %v984_v17 = vadd.f32 %v901_v40, %v7664_v32 }
 0x174   : > { %v985_v38 = vadd.f32 %v903_v19, %v710_v20  ;;  %v1139_v50 = vsel %vm1096_vm1, %v9935_v15, %v1138_v18  ;;  %v1141_v23 = vsel %vm1096_vm1, %v1138_v18, %v1140_v30  ;;  %v1143_v7 = vrot.slane %v1028_v16, 2 }
 0x175   : > { %v1225_v55 = vadd.f32 %v1139_v50, %v982_v0  ;;  %v1226_v47 = vadd.f32 %v1141_v23, %v983_v33  ;;  %v1289_v28 = vadd.f32 %v7689_v13, %v7503_v2  ;;  %v1290_v45 = vadd.f32 %v1258_v48, %v7456_v56 }
 0x176   : > { %v1331_v57 = vmul.f32 %v7314_v26, %v7261_v34  ;;  %v1332_v40 = vmul.f32 %v7314_v26, %v7752_v11  ;;  %v1334_v32 = vmul.f32 %v7314_v26, %v7259_v14  ;;  %v1144_v30 = vsel %vm1096_vm1, %v9936_v41, %v1143_v7 }
 0x177   : > { %v1146_v33 = vsel %vm1096_vm1, %v1143_v7, %v1145_v37  ;;  %v1291_v2 = vadd.f32 %v7695_v4, %v1225_v55  ;;  %v1292_v60 = vadd.f32 %v1260_v46, %v1226_v47  ;;  %v1227_v18 = vadd.f32 %v1144_v30, %v984_v17 }
 0x178   : > { %v7819_v56 = vadd.f32 %v1146_v33, %v985_v38  ;;  %v1441_v48 = vrot.slane %v1331_v57, 1  ;;  %v1443_v16 = vrot.slane %v1332_v40, 1  ;;  %v1446_v0 = vrot.slane %v1334_v32, 1  ;;  %v5887_v40 = vld [vmem:[#allocation4 + $0x8] sm:$0xff] }
 0x179   : > { %v1574_v13 = vmul.f32 %v7338_v8, %v7752_v11  ;;  %v1576_v21 = vmul.f32 %v7338_v8, %v7259_v14  ;;  %v7828_v37 = vadd.f32 %v7699_v44, %v1227_v18  ;;  %v9937_v46 = vrot.slane %v7705_v29, 1  ;;  %3643 = vmatpush.bf16.msra.mxu1 %v5887_v40 }
 0x17a   : > { %v1444_v38 = vsel %vm853_vm0, %v1441_v48, %v1443_v16  ;;  %v1806_v35 = vmul.f32 %v7381_v54, %v7261_v34  ;;  %v9938_v4 = vrot.slane %v7709_v53, 1  ;;  %v1449_v61 = vsel %vm853_vm0, %v1446_v0, %v1448_v51 }
 0x17b   : > { %v1442_v17 = vsel %vm853_vm0, %v9937_v46, %v1441_v48  ;;  %v1532_v59 = vadd.f32 %v1444_v38, %v1290_v45  ;;  %v1534_v44 = vadd.f32 %v1449_v61, %v1292_v60  ;;  %v1683_v19 = vrot.slane %v1573_v58, 2  ;;  %v5896_v45 = vld [vmem:[#allocation4 + $0x50] sm:$0xff] }
 0x17c   : > { %v1447_v20 = vsel %vm853_vm0, %v9938_v4, %v1446_v0  ;;  %v1531_v5 = vadd.f32 %v1442_v17, %v1289_v28  ;;  %v1685_v15 = vrot.slane %v1574_v13, 2  ;;  %v1688_v29 = vrot.slane %v1576_v21, 2  ;;  %3771 = vmatpush.bf16.msra.mxu2 %v5896_v45  ;;  %v7901_v45 = vpop.permute.xlu1 %6122 }
 0x17d   : > { %v1533_v42 = vadd.f32 %v1447_v20, %v1291_v2  ;;  %v1808_v50 = vmul.f32 %v7381_v54, %v7259_v14  ;;  %v1837_v23 = vadd.f32 %v7721_v36, %v7559_v10  ;;  %v1838_v7 = vadd.f32 %v1806_v35, %v7541_v43 }
 0x17e   : > { %v9939_v53 = vrot.slane %v7713_v12, 2  ;;  %v1686_v51 = vsel %vm1096_vm1, %v1683_v19, %v1685_v15  ;;  %v1878_v47 = vmul.f32 %v7357_v9, %v7261_v34  ;;  %v1879_v28 = vmul.f32 %v7357_v9, %v7752_v11 }
 0x17f   : > { %v9940_v54 = vrot.slane %v7717_v31, 2  ;;  %v9941_v10 = vrot.slane %v7767_v52, 2  ;;  %v1774_v36 = vadd.f32 %v1686_v51, %v1532_v59  ;;  %v1881_v30 = vmul.f32 %v7357_v9, %v7259_v14  ;;  %v6129_v59 = vpop.permute.xlu2 %6128 }
 0x180   : > { %v1684_v55 = vsel %vm1096_vm1, %v9939_v53, %v1683_v19  ;;  %v1986_v33 = vrot.slane %v1878_v47, 1  ;;  %v1988_v60 = vrot.slane %v1879_v28, 1  ;;  %v2120_v52 = vmul.f32 %v7370_v39, %v7261_v34  ;;  %v9950_v47 = vld [vmem:[#allocation29_spill] sm:$0xff] }
 0x181   : > { %v1689_v57 = vsel %vm1096_vm1, %v9940_v54, %v1688_v29  ;;  %v1691_v43 = vsel %vm1096_vm1, %v1688_v29, %v9941_v10  ;;  %v1773_v12 = vadd.f32 %v1684_v55, %v1531_v5  ;;  %v1840_v31 = vadd.f32 %v1808_v50, %v1774_v36  ;;  %v9947_v29 = vld [vmem:[#allocation39_spill] sm:$0xff] }
 0x182   : > { %v1775_v32 = vadd.f32 %v1689_v57, %v1533_v42  ;;  %v7859_v41 = vadd.f32 %v1691_v43, %v1534_v44  ;;  %v9942_v48 = vrot.slane %v7735_v63, 1  ;;  %v1991_v0 = vrot.slane %v1881_v30, 1  ;;  %v9949_v55 = vld [vmem:[#allocation27_spill] sm:$0xff] }
 0x183   : > { %v1839_v2 = vadd.f32 %v7725_v6, %v1773_v12  ;;  %v2121_v58 = vmul.f32 %v7370_v39, %v7752_v11  ;;  %v1989_v13 = vsel %vm853_vm0, %v1986_v33, %v1988_v60  ;;  %v2123_v21 = vmul.f32 %v7370_v39, %v7259_v14 }
 0x184   : > { %v7867_v18 = vadd.f32 %v7731_v24, %v1775_v32  ;;  %v1987_v16 = vsel %vm853_vm0, %v9942_v48, %v1986_v33  ;;  %v2228_v46 = vrot.slane %v2120_v52, 2  ;;  %v9943_v34 = vrot.slane %v7741_v49, 1  ;;  %v9953_v32 = vld [vmem:[#allocation33_spill] sm:$0xff] }
 0x185   : > { %v2079_v6 = vadd.f32 %v1987_v16, %v1837_v23  ;;  %v9944_v17 = vrot.slane %v7770_v22, 1  ;;  %v2080_v38 = vadd.f32 %v1989_v13, %v1838_v7  ;;  %v2230_v35 = vrot.slane %v2121_v58, 2 }
 0x186   : > { %v1992_v24 = vsel %vm853_vm0, %v9943_v34, %v1991_v0  ;;  %v9945_v11 = vrot.slane %v7745_v62, 2  ;;  %v2233_v5 = vrot.slane %v2123_v21, 2  ;;  %v6131_v44 = vunpack.i.h.bf16 %v6129_v59 }
 0x187   : > { %v1994_v63 = vsel %vm853_vm0, %v1991_v0, %v9944_v17  ;;  %v2081_v4 = vadd.f32 %v1992_v24, %v1839_v2  ;;  %v2231_v49 = vsel %vm1096_vm1, %v2228_v46, %v2230_v35  ;;  %v3232_v22 = vsel %vm3217_vm7, %v7633_v1, %v7667_v25  ;;  %v9951_v25 = vld [vmem:[#allocation18_spill] sm:$0xff] }
 0x188   : > { %v2082_v20 = vadd.f32 %v1994_v63, %v1840_v31  ;;  %v2229_v61 = vsel %vm1096_vm1, %v9945_v11, %v2228_v46  ;;  %v9946_v19 = vrot.slane %v7750_v3, 2  ;;  %v9948_v62 = vrot.slane %v9947_v29, 2 }
 0x189   : > { %v2321_v42 = vadd.f32 %v2229_v61, %v2079_v6  ;;  %v2322_v23 = vadd.f32 %v2231_v49, %v2080_v38  ;;  %v7899_v28 = vmul.f32 %v9950_v47, %v6131_v44  ;;  %v7905_v3 = vmul.f32 %v9951_v25, %v6131_v44  ;;  %v5901_v49 = vld [vmem:[#allocation4 + $0x78] sm:$0xff] }
 0x18a   : > { %v2234_v15 = vsel %vm1096_vm1, %v9946_v19, %v2233_v5  ;;  %v2236_v50 = vsel %vm1096_vm1, %v2233_v5, %v9948_v62  ;;  %v7908_v54 = vmul.f32 %v7314_v26, %v6131_v44  ;;  %v7910_v57 = vunpack.i.l.bf16 %v6129_v59  ;;  %3858 = vmatpush.bf16.msra.mxu3 %v5901_v49 }
 0x18b   : > { %v2323_v7 = vadd.f32 %v2234_v15, %v2081_v4  ;;  %v2324_v53 = vadd.f32 %v2236_v50, %v2082_v20  ;;  %v2357_v51 = vadd.f32 %v9949_v55, %v2321_v42  ;;  %v2358_v1 = vadd.f32 %v9949_v55, %v2322_v23  ;;  %v5893_v20 = vld [vmem:[#allocation4 + $0x38] sm:$0xff]  ;;  %v5895_v15 = vld [vmem:[#allocation4 + $0x48] sm:$0xff]  ;;  %v5886_v23 = vld [vmem:[#allocation4] sm:$0xff] }
 0x18c   : > { %v7918_v30 = vsel %vm3219_vm8, %v9953_v32, %v3232_v22  ;;  %v7921_v2 = vmul.f32 %v7338_v8, %v6131_v44  ;;  %v7924_v31 = vunpack.i.h.bf16 %v7901_v45  ;;  %v912_v48 = vrot.slane %v7899_v28, 1  ;;  %3556 = vmatpush.bf16.msra.mxu0 %v5893_v20  ;;  %3772 = vmatpush.bf16.msra.mxu2 %v5895_v15 }
 0x18d   : > { %v2359_v12 = vadd.f32 %v9949_v55, %v2323_v7  ;;  %v2360_v36 = vadd.f32 %v9949_v55, %v2324_v53  ;;  %v2389_v40 = vmax.f32 %v2357_v51, 0.0  ;;  %v2390_v33 = vmax.f32 %v2358_v1, 0.0  ;;  %3644 = vmatpush.bf16.msra.mxu1 %v5886_v23 }
 0x18e   : > { %v7928_v16 = vmul.f32 %v7357_v9, %v6131_v44  ;;  %v1458_v58 = vrot.slane %v7908_v54, 1  ;;  %v7933_v13 = vmul.f32 %v7370_v39, %v6131_v44  ;;  %v7937_v8 = vmul.f32 %v9950_v47, %v7910_v57 }
 0x18f   : > { %v2391_v60 = vmax.f32 %v2359_v12, 0.0  ;;  %v2392_v52 = vmax.f32 %v2360_v36, 0.0  ;;  %v2428_v6 = vsel %vm2409_vm2, %v2389_v40, -inf  ;;  %v2431_v46 = vsel %vm2409_vm2, %v2390_v33, -inf }
 0x190   : > { %v7946_v39 = vmul.f32 %v9951_v25, %v7910_v57  ;;  %v2003_v63 = vrot.slane %v7928_v16, 1  ;;  %v907_v35 = vrot.slane %v7937_v8, 1  ;;  %v7953_v4 = vmul.f32 %v7314_v26, %v7910_v57 }
 0x191   : > { %v2429_v21 = vsel %vm2409_vm2, %v2391_v60, -inf  ;;  %v2432_v9 = vsel %vm2409_vm2, %v2392_v52, -inf }
 0x192   : > { %v2430_v34 = vmax.f32 %v2428_v6, %v2429_v21  ;;  %v2433_v24 = vmax.f32 %v2431_v46, %v2432_v9 }
 0x194   : > { %v2492_v11 = vrot.slane %v2430_v34, 2  ;;  %v2493_v61 = vrot.slane %v2430_v34, 4  ;;  %v2494_v5 = vrot.slane %v2430_v34, 6  ;;  %v2495_v59 = vrot.slane %v2433_v24, 2 }
 0x195   : > { %v2496_v42 = vrot.slane %v2433_v24, 4  ;;  %v2497_v44 = vrot.slane %v2433_v24, 6  ;;  %v2739_v22 = vsel %vm2570_vm3, %v2430_v34, -inf  ;;  %v2767_v19 = vsel %vm2570_vm3, %v2433_v24, -inf }
 0x196   : > { %v2740_v29 = vrot.slane %v2739_v22, 4  ;;  %v2746_v62 = vsel %vm2570_vm3, %v2492_v11, -inf  ;;  %v2753_v26 = vsel %vm2570_vm3, %v2493_v61, -inf  ;;  %v2760_v50 = vsel %vm2570_vm3, %v2494_v5, -inf }
 0x197   : > { %v2747_v7 = vrot.slane %v2746_v62, 4  ;;  %v2754_v53 = vrot.slane %v2753_v26, 4  ;;  %v2761_v51 = vrot.slane %v2760_v50, 4  ;;  %v2768_v47 = vrot.slane %v2767_v19, 4 }
 0x198   : > { %v2741_v1 = vmax.f32 %v2739_v22, %v2740_v29  ;;  %v2774_v25 = vsel %vm2570_vm3, %v2495_v59, -inf  ;;  %v2781_v12 = vsel %vm2570_vm3, %v2496_v42, -inf  ;;  %v2788_v36 = vsel %vm2570_vm3, %v2497_v44, -inf }
 0x199   : > { %v2748_v40 = vmax.f32 %v2746_v62, %v2747_v7  ;;  %v2755_v32 = vmax.f32 %v2753_v26, %v2754_v53  ;;  %v2762_v33 = vmax.f32 %v2760_v50, %v2761_v51  ;;  %v2769_v60 = vmax.f32 %v2767_v19, %v2768_v47 }
 0x19a   : > { %v2742_v52 = vrot.slane %v2741_v1, 2  ;;  %v2775_v6 = vrot.slane %v2774_v25, 4  ;;  %v2782_v21 = vrot.slane %v2781_v12, 4  ;;  %v2789_v46 = vrot.slane %v2788_v36, 4 }
 0x19b   : > { %v2749_v9 = vrot.slane %v2748_v40, 2  ;;  %v2756_v34 = vrot.slane %v2755_v32, 2  ;;  %v2763_v24 = vrot.slane %v2762_v33, 2  ;;  %v2770_v20 = vrot.slane %v2769_v60, 2 }
 0x19c   : > { %v2743_v11 = vmax.f32 %v2741_v1, %v2742_v52  ;;  %v2776_v61 = vmax.f32 %v2774_v25, %v2775_v6  ;;  %v2783_v5 = vmax.f32 %v2781_v12, %v2782_v21  ;;  %v2790_v59 = vmax.f32 %v2788_v36, %v2789_v46  ;;  %v5892_v52 = vld [vmem:[#allocation4 + $0x30] sm:$0xff] }
 0x19d   : > { %v2750_v49 = vmax.f32 %v2748_v40, %v2749_v9  ;;  %v2757_v42 = vmax.f32 %v2755_v32, %v2756_v34  ;;  %v2764_v44 = vmax.f32 %v2762_v33, %v2763_v24  ;;  %v2771_v22 = vmax.f32 %v2769_v60, %v2770_v20  ;;  %v5900_v34 = vld [vmem:[#allocation4 + $0x70] sm:$0xff]  ;;  %3557 = vmatpush.bf16.msra.mxu0 %v5892_v52 }
 0x19e   : > { %v2744_v15 = vrot.slane %v2743_v11, 1  ;;  %v2777_v29 = vrot.slane %v2776_v61, 2  ;;  %v2784_v62 = vrot.slane %v2783_v5, 2  ;;  %v2791_v19 = vrot.slane %v2790_v59, 2  ;;  %3859 = vmatpush.bf16.msra.mxu3 %v5900_v34  ;;  %v8017_v52 = vld [vmem:[%s9705_s1 + $0x2] ss:$0 sm:$0xff] }
 0x19f   : > { %v2751_v26 = vrot.slane %v2750_v49, 1  ;;  %v2758_v50 = vrot.slane %v2757_v42, 1  ;;  %v2765_v23 = vrot.slane %v2764_v44, 1  ;;  %v2772_v7 = vrot.slane %v2771_v22, 1 }
 0x1a0   : > { %v2745_v53 = vmax.f32 %v2743_v11, %v2744_v15  ;;  %v2778_v51 = vmax.f32 %v2776_v61, %v2777_v29  ;;  %v2785_v47 = vmax.f32 %v2783_v5, %v2784_v62  ;;  %v2792_v43 = vmax.f32 %v2790_v59, %v2791_v19  ;;  %v7966_v61 = vld [vmem:[%s9705_s1 + $0x5] ss:$0 sm:$0xff]  ;;  %v5894_v59 = vld [vmem:[#allocation4 + $0x40] sm:$0xff] }
 0x1a1   : > { %v2752_v1 = vmax.f32 %v2750_v49, %v2751_v26  ;;  %v2759_v25 = vmax.f32 %v2757_v42, %v2758_v50  ;;  %v2766_v12 = vmax.f32 %v2764_v44, %v2765_v23  ;;  %v2773_v36 = vmax.f32 %v2771_v22, %v2772_v7  ;;  %v7975_v22 = vld [vmem:[%s9705_s1 + $0x7] ss:$0 sm:$0xff]  ;;  %3773 = vmatpush.bf16.msra.mxu2 %v5894_v59  ;;  %v7986_v7 = vld [vmem:[%s9705_s1 + $0x8] ss:$0 sm:$0xff]  ;;  %v8042_v59 = vld [vmem:[%s9705_s1 + $0x3] ss:$0 sm:$0xff] }
 0x1a2   : > { %v2779_v40 = vrot.slane %v2778_v51, 1  ;;  %v2786_v32 = vrot.slane %v2785_v47, 1  ;;  %v2793_v33 = vrot.slane %v2792_v43, 1  ;;  %v3043_v60 = vpack.c.bf16 %v2745_v53, %v2745_v53 }
 0x1a3   : > { %v3044_v6 = vpack.c.bf16 %v2752_v1, %v2752_v1  ;;  %v3045_v21 = vpack.c.bf16 %v2759_v25, %v2759_v25  ;;  %v3046_v46 = vpack.c.bf16 %v2766_v12, %v2766_v12  ;;  %v3047_v9 = vpack.c.bf16 %v2773_v36, %v2773_v36 }
 0x1a4   : > { %v2780_v24 = vmax.f32 %v2778_v51, %v2779_v40  ;;  %v2787_v20 = vmax.f32 %v2785_v47, %v2786_v32  ;;  %v2794_v11 = vmax.f32 %v2792_v43, %v2793_v33  ;;  %v7970_v5 = vmul.f32 %v7966_v61, %v7910_v57  ;;  %v8002_v32 = vld [vmem:[%s9705_s1 + $0x1] ss:$0 sm:$0xff] }
 0x1a5   : > { %v3171_v49 = vunpack.c.l.b16 %v3043_v60  ;;  %v3172_v42 = vunpack.c.l.b16 %v3044_v6  ;;  %v3173_v44 = vunpack.c.l.b16 %v3045_v21  ;;  %v7979_v43 = vmul.f32 %v7975_v22, %v7910_v57  ;;  %v8026_v21 = vld [vmem:[%s9705_s1 + $0x4] ss:$0 sm:$0xff] }
 0x1a6   : > { %v3048_v15 = vpack.c.bf16 %v2780_v24, %v2780_v24  ;;  %v3050_v29 = vpack.c.bf16 %v2794_v11, %v2794_v11  ;;  %v3175_v62 = vunpack.c.l.b16 %v3047_v9  ;;  %v1150_v19 = vrot.slane %v7946_v39, 2 }
 0x1a7   : > { %v3049_v26 = vpack.c.bf16 %v2787_v20, %v2787_v20  ;;  %v3174_v50 = vunpack.c.l.b16 %v3046_v46  ;;  %v3235_v23 = vsel %vm3211_vm4, %v3172_v42, %v3171_v49  ;;  %v7990_v53 = vmul.f32 %v7986_v7, %v7910_v57 }
 0x1a8   : > { %v7992_v51 = vunpack.c.l.b16 %v3050_v29  ;;  %v3236_v47 = vsel %vm3213_vm5, %v3173_v44, %v3235_v23  ;;  %v1453_v1 = vrot.slane %v7953_v4, 1  ;;  %v1695_v25 = vrot.slane %v7970_v5, 2  ;;  %v8010_v4 = vld [vmem:[%s9705_s1] ss:$0 sm:$0xff]  ;;  %v9976_v5 = vld [vmem:[#allocation36_spill] sm:$0xff] }
 0x1a9   : > { %v3176_v12 = vunpack.c.l.b16 %v3048_v15  ;;  %v3237_v36 = vsel %vm3215_vm6, %v3174_v50, %v3236_v47  ;;  %v791_v57 = vmul.f32 %v8002_v32, %v7924_v31  ;;  %v714_v60 = vmul.f32 %v8010_v4, %v7924_v31  ;;  %v9957_v50 = vld [vmem:[#allocation13_spill] sm:$0xff] }
 0x1aa   : > { %9954 = vst [vmem:[#allocation39_spill] sm:$0xff] %v7992_v51  ;;  %v3238_v33 = vsel %vm3217_vm7, %v3175_v62, %v3237_v36  ;;  %v8021_v6 = vmul.f32 %v8017_v52, %v7924_v31  ;;  %v1340_v46 = vmul.f32 %v8026_v21, %v7924_v31  ;;  %v8030_v9 = vunpack.c.l.b16 %v3049_v26 }
 0x1ab   : > { %v910_v24 = vrot.slane %v791_v57, 1  ;;  %v8035_v20 = vmul.f32 %v7966_v61, %v7924_v31  ;;  %v1264_v49 = vmul.f32 %v8042_v59, %v7924_v31  ;;  %v1887_v44 = vmul.f32 %v7975_v22, %v7924_v31 }
 0x1ac   : > { %9955 = vst [vmem:[#allocation27_spill] sm:$0xff] %v8030_v9  ;;  %v1456_v42 = vrot.slane %v1340_v46, 1  ;;  %v8049_v15 = vsel %vm3219_vm8, %v3176_v12, %v3238_v33  ;;  %v2129_v62 = vmul.f32 %v7986_v7, %v7924_v31  ;;  %v6124_v26 = vunpack.i.l.bf16 %v7901_v45  ;;  %v8066_v12 = vld [vmem:[%s9705_s1 + $0x6] ss:$0 sm:$0xff]  ;;  %v9961_v45 = vld [vmem:[#allocation21_spill] sm:$0xff] }
 0x1ad   : > { %9956 = vst [vmem:[#allocation29_spill] sm:$0xff] %v8049_v15  ;;  %v913_v29 = vsel %vm853_vm0, %v910_v24, %v912_v48  ;;  %v9958_v23 = vrot.slane %v9957_v50, 1  ;;  %v1812_v28 = vmul.f32 %v8066_v12, %v7924_v31  ;;  %v2001_v48 = vrot.slane %v1887_v44, 1 }
 0x1ae   : > { %v8070_v57 = vadd.f32 %v913_v29, %v714_v60  ;;  %v788_v33 = vmul.f32 %v8002_v32, %v6124_v26  ;;  %v1031_v46 = vmul.f32 %v8017_v52, %v6124_v26  ;;  %v1459_v11 = vsel %vm853_vm0, %v1456_v42, %v1458_v58 }
 0x1af   : > { %v8060_v47 = vsel %vm853_vm0, %v9958_v23, %v910_v24  ;;  %v9959_v24 = vld [vmem:[#allocation25_spill] sm:$0xff]  ;;  %v1262_v31 = vmul.f32 %v8042_v59, %v6124_v26  ;;  %v1337_v60 = vmul.f32 %v8026_v21, %v6124_v26  ;;  %v2243_v44 = vrot.slane %v2129_v62, 2 }
 0x1b0   : > { %v9960_v50 = vrot.slane %v9959_v24, 1  ;;  %v712_v29 = vmul.f32 %v8010_v4, %v6124_v26  ;;  %v905_v17 = vrot.slane %v788_v33, 1  ;;  %v1148_v0 = vrot.slane %v1031_v46, 2  ;;  %v9965_v46 = vld [vmem:[#allocation34_spill] sm:$0xff] }
 0x1b1   : > { %v9962_v36 = vrot.slane %v9961_v45, 1  ;;  %v1451_v34 = vrot.slane %v1337_v60, 1  ;;  %v1579_v54 = vmul.f32 %v7966_v61, %v6124_v26  ;;  %v2004_v58 = vsel %vm853_vm0, %v2001_v48, %v2003_v63  ;;  %v9967_v60 = vld [vmem:[#allocation32_spill] sm:$0xff] }
 0x1b2   : > { %v8078_v23 = vsel %vm853_vm0, %v9960_v50, %v1456_v42  ;;  %v1294_v50 = vadd.f32 %v1262_v31, %v7819_v56  ;;  %v9963_v42 = vld [vmem:[#allocation16_spill] sm:$0xff]  ;;  %v908_v33 = vsel %vm853_vm0, %v905_v17, %v907_v35  ;;  %v1810_v45 = vmul.f32 %v8066_v12, %v6124_v26 }
 0x1b3   : > { %v2002_v24 = vsel %vm853_vm0, %v9962_v36, %v2001_v48  ;;  %v9964_v14 = vrot.slane %v9963_v42, 1  ;;  %v987_v36 = vadd.f32 %v908_v33, %v712_v29  ;;  %v1151_v56 = vsel %vm1096_vm1, %v1148_v0, %v1150_v19  ;;  %v6145_v48 = vpop.permute.xlu2 %6144  ;;  %v9968_v35 = vld [vmem:[#allocation28_spill] sm:$0xff] }
 0x1b4   : > { %v9966_v31 = vrot.slane %v9965_v46, 1  ;;  %v1454_v63 = vsel %vm853_vm0, %v1451_v34, %v1453_v1  ;;  %v9969_v40 = vrot.slane %v9968_v35, 2  ;;  %v1884_v19 = vmul.f32 %v7975_v22, %v6124_v26  ;;  %v9970_v46 = vld [vmem:[#allocation30_spill] sm:$0xff]  ;;  %v9975_v35 = vld [vmem:[#allocation15_spill] sm:$0xff] }
 0x1b5   : > { %v906_v62 = vsel %vm853_vm0, %v9964_v14, %v905_v17  ;;  %v1536_v42 = vadd.f32 %v1454_v63, %v1294_v50  ;;  %v1693_v17 = vrot.slane %v1579_v54, 2  ;;  %v1230_v39 = vadd.f32 %v1151_v56, %v987_v36 }
 0x1b6   : > { %v1452_v16 = vsel %vm853_vm0, %v9966_v31, %v1451_v34  ;;  %v986_v14 = vadd.f32 %v906_v62, %v9967_v60  ;;  %v2244_v29 = vsel %vm1096_vm1, %v9969_v40, %v2243_v44  ;;  %v2126_v33 = vmul.f32 %v7986_v7, %v6124_v26  ;;  %v9972_v34 = vld [vmem:[#allocation35_spill] sm:$0xff] }
 0x1b7   : > { %v1535_v8 = vadd.f32 %v1452_v16, %v7828_v37  ;;  %v9971_v31 = vrot.slane %v9970_v46, 2  ;;  %v9973_v38 = vrot.slane %v9972_v34, 2  ;;  %v1696_v37 = vsel %vm1096_vm1, %v1693_v17, %v1695_v25 }
 0x1b8   : > { %v6147_v50 = vunpack.i.h.bf16 %v6145_v48  ;;  %v1778_v40 = vadd.f32 %v1696_v37, %v1536_v42  ;;  %v1842_v36 = vadd.f32 %v1810_v45, %v7859_v41  ;;  %v1996_v56 = vrot.slane %v1884_v19, 1 }
 0x1b9   : > { %v1149_v1 = vsel %vm1096_vm1, %v9971_v31, %v1148_v0  ;;  %v1694_v62 = vsel %vm1096_vm1, %v9973_v38, %v1693_v17  ;;  %v9974_v26 = vrot.slane %v7933_v13, 2  ;;  %v1296_v0 = vadd.f32 %v1264_v49, %v1230_v39 }
 0x1ba   : > { %v1777_v54 = vadd.f32 %v1694_v62, %v1535_v8  ;;  %v8128_v63 = vadd.f32 %v1149_v1, %v986_v14  ;;  %v2238_v60 = vrot.slane %v2126_v33, 2  ;;  %v1844_v46 = vadd.f32 %v1812_v28, %v1778_v40 }
 0x1bb   : > { %v2246_v16 = vsel %vm1096_vm1, %v2243_v44, %v9974_v26  ;;  %v9977_v31 = vrot.slane %v9976_v5, 1  ;;  %v8135_v8 = vmul.f32 %v8002_v32, %v6147_v50  ;;  %v9978_v41 = vrot.slane %v7979_v43, 1 }
 0x1bc   : > { %v1843_v38 = vadd.f32 %v9975_v35, %v1777_v54  ;;  %v8142_v45 = vmul.f32 %v8017_v52, %v6147_v50  ;;  %v8145_v49 = vmul.f32 %v8026_v21, %v6147_v50  ;;  %v2086_v42 = vadd.f32 %v2004_v58, %v1844_v46 }
 0x1bd   : > { %v1997_v25 = vsel %vm853_vm0, %v9977_v31, %v1996_v56  ;;  %v1999_v13 = vsel %vm853_vm0, %v1996_v56, %v9978_v41  ;;  %v9979_v17 = vrot.slane %v7660_v27, 2  ;;  %v8150_v19 = vadd.f32 %v1459_v11, %v1296_v0 }
 0x1be   : > { %v2083_v44 = vadd.f32 %v1997_v25, %v7867_v18  ;;  %v2084_v28 = vadd.f32 %v1999_v13, %v1842_v36  ;;  %v2085_v14 = vadd.f32 %v2002_v24, %v1843_v38  ;;  %v9980_v43 = vrot.slane %v7990_v53, 2  ;;  %v9985_v36 = vld [vmem:[#allocation20_spill] sm:$0xff] }
 0x1bf   : > { %v2239_v39 = vsel %vm1096_vm1, %v9979_v17, %v2238_v60  ;;  %v6146_v1 = vunpack.i.l.bf16 %v6145_v48  ;;  %v2328_v37 = vadd.f32 %v2246_v16, %v2086_v42  ;;  %v8159_v27 = vmul.f32 %v7966_v61, %v6147_v50  ;;  %v8169_v48 = vld [vmem:[%s9706_s2] ss:$0 sm:$0xff] }
 0x1c0   : > { %v2241_v33 = vsel %vm1096_vm1, %v2238_v60, %v9980_v43  ;;  %v2325_v18 = vadd.f32 %v2239_v39, %v2083_v44  ;;  %v2327_v62 = vadd.f32 %v2244_v29, %v2085_v14  ;;  %v8162_v11 = vmul.f32 %v7975_v22, %v6147_v50 }
 0x1c1   : > { %v2326_v34 = vadd.f32 %v2241_v33, %v2084_v28  ;;  %v2364_v29 = vadd.f32 %v8169_v48, %v2328_v37  ;;  %v8174_v26 = vmul.f32 %v7986_v7, %v6147_v50  ;;  %v8177_v16 = vmul.f32 %v8002_v32, %v6146_v1 }
 0x1c2   : > { %v2361_v24 = vadd.f32 %v9949_v55, %v2325_v18  ;;  %v2363_v40 = vadd.f32 %v9949_v55, %v2327_v62  ;;  %v8180_v0 = vmul.f32 %v8017_v52, %v6146_v1  ;;  %v8183_v38 = vmul.f32 %v8026_v21, %v6146_v1 }
 0x1c3   : > { %v2362_v53 = vadd.f32 %v9949_v55, %v2326_v34  ;;  %v2396_v35 = vmax.f32 %v2364_v29, 0.0  ;;  %v8188_v31 = vmul.f32 %v7966_v61, %v6146_v1  ;;  %v8191_v50 = vmul.f32 %v7975_v22, %v6146_v1  ;;  %v9982_v29 = vld [vmem:[#allocation14_spill] sm:$0xff] }
 0x1c4   : > { %v2393_v56 = vmax.f32 %v2361_v24, 0.0  ;;  %v2395_v60 = vmax.f32 %v2363_v40, 0.0  ;;  %v8206_v24 = vmul.f32 %v7986_v7, %v6146_v1  ;;  %v9986_v58 = vrot.slane %v9985_v36, 2 }
 0x1c5   : > { %v2394_v55 = vmax.f32 %v2362_v53, 0.0  ;;  %v2438_v44 = vsel %vm2409_vm2, %v2396_v35, -inf  ;;  %v9998_v51 = vmov 0 }
 0x1c6   : > { %v2434_v25 = vsel %vm2409_vm2, %v2393_v56, -inf  ;;  %v2435_v41 = vsel %vm2409_vm2, %v2395_v60, -inf  ;;  %v988_v56 = vadd.f32 %v8060_v47, %v9982_v29  ;;  %v6135_v47 = vpop.permute.xlu0 %6134  ;;  %v9988_v29 = vrot.slane %v8035_v20, 2 }
 0x1c7   : > { %v2437_v13 = vsel %vm2409_vm2, %v2394_v55, -inf  ;;  %v2436_v28 = vmax.f32 %v2434_v25, %v2435_v41  ;;  %v9983_v55 = vld [vmem:[#allocation22_spill] sm:$0xff]  ;;  %v8229_v43 = vunpack.i.h.bf16 %v6135_v47  ;;  %v6136_v36 = vunpack.i.l.bf16 %v6135_v47 }
 0x1c8   : > { %v8197_v14 = vmax.f32 %v2437_v13, %v2438_v44  ;;  %v1295_v60 = vadd.f32 %v9983_v55, %v8128_v63  ;;  %v9989_v63 = vld [vmem:[#allocation23_spill] sm:$0xff]  ;;  %v9781_v47 = vmov 0   ;;  %v9999_v51 = vsel %vm8330_vm12, 4294967295, %v9998_v51 }
 0x1c9   : > { %v2498_v34 = vrot.slane %v2436_v28, 2  ;;  %v2499_v62 = vrot.slane %v2436_v28, 4  ;;  %v2500_v37 = vrot.slane %v2436_v28, 6  ;;  %v2795_v53 = vsel %vm2570_vm3, %v2436_v28, -inf  ;;  %313 = vst.msk [vmem:[#allocation2] sm:$0xf] %vm9780_vm10, %v9781_v47 }
 0x1ca   : > { %9981 = vst [vmem:[#allocation18_spill] sm:$0xff] %v8197_v14  ;;  %v2823_v40 = vsel %vm2570_vm3, %v8197_v14, -inf  ;;  %v2796_v35 = vrot.slane %v2795_v53, 4  ;;  %v9984_v28 = vrot.slane %v8021_v6, 2 }
 0x1cb   : > { %v2802_v25 = vsel %vm2570_vm3, %v2498_v34, -inf  ;;  %v2809_v41 = vsel %vm2570_vm3, %v2499_v62, -inf  ;;  %v2816_v13 = vsel %vm2570_vm3, %v2500_v37, -inf  ;;  %v2824_v34 = vrot.slane %v2823_v40, 4  ;;  %316 = vst.msk [vmem:[#allocation2 + $0x8] sm:$0xf] %vm9780_vm10, %v9781_v47 }
 0x1cc   : > { %v2803_v1 = vrot.slane %v2802_v25, 4  ;;  %v2810_v44 = vrot.slane %v2809_v41, 4  ;;  %v2817_v46 = vrot.slane %v2816_v13, 4  ;;  %v1154_v39 = vsel %vm1096_vm1, %v9986_v58, %v9984_v28  ;;  %318 = vst.msk [vmem:[#allocation2 + $0x10] sm:$0xf] %vm9780_vm10, %v9781_v47 }
 0x1cd   : > { %v2797_v55 = vmax.f32 %v2795_v53, %v2796_v35  ;;  %v1537_v37 = vadd.f32 %v8078_v23, %v1295_v60  ;;  %v1231_v42 = vadd.f32 %v1154_v39, %v988_v56  ;;  %v9990_v53 = vrot.slane %v9989_v63, 2  ;;  %320 = vst.msk [vmem:[#allocation2 + $0x18] sm:$0xf] %vm9780_vm10, %v9781_v47 }
 0x1ce   : > { %v2804_v54 = vmax.f32 %v2802_v25, %v2803_v1  ;;  %v2811_v62 = vmax.f32 %v2809_v41, %v2810_v44  ;;  %v8225_v17 = vmax.f32 %v2816_v13, %v2817_v46  ;;  %v8238_v46 = vmax.f32 %v2823_v40, %v2824_v34  ;;  %322 = vst.msk [vmem:[#allocation2 + $0x20] sm:$0xf] %vm9780_vm10, %v9781_v47 }
 0x1cf   : > { %v2798_v18 = vrot.slane %v2797_v55, 2  ;;  %v1699_v35 = vsel %vm1096_vm1, %v9990_v53, %v9988_v29  ;;  %v8242_v23 = vmul.f32 %v7975_v22, %v8229_v43  ;;  %v8246_v60 = vmul.f32 %v7986_v7, %v8229_v43  ;;  %324 = vst.msk [vmem:[#allocation2 + $0x28] sm:$0xf] %vm9780_vm10, %v9781_v47 }
 0x1d0   : > { %9987 = vst [vmem:[#allocation33_spill] sm:$0xff] %v8225_v17  ;;  %v2805_v58 = vrot.slane %v2804_v54, 2  ;;  %v2812_v28 = vrot.slane %v2811_v62, 2  ;;  %v1779_v56 = vadd.f32 %v1699_v35, %v1537_v37  ;;  %v8251_v41 = vmul.f32 %v8066_v12, %v8229_v43 }
 0x1d1   : > { %v8236_v25 = vmax.f32 %v2797_v55, %v2798_v18  ;;  %9991 = vst [vmem:[#allocation13_spill] sm:$0xff] %v8238_v46  ;;  %v5891_v18 = vld [vmem:[#allocation4 + $0x28] sm:$0xff]  ;;  %v8258_v1 = vmul.f32 %v8010_v4, %v6136_v36  ;;  %v8261_v44 = vmul.f32 %v8002_v32, %v6136_v36  ;;  %v2010_v29 = vrot.slane %v8242_v23, 1 }
 0x1d2   : > { %v8253_v13 = vmax.f32 %v2804_v54, %v2805_v58  ;;  %v8255_v40 = vmax.f32 %v2811_v62, %v2812_v28  ;;  %v1265_v63 = vmul.f32 %v8042_v59, %v6136_v36  ;;  %v1342_v55 = vmul.f32 %v8026_v21, %v6136_v36  ;;  %3558 = vmatpush.bf16.msra.mxu0 %v5891_v18  ;;  %v6140_v58 = vpop.permute.xlu1 %6139 }
 0x1d3   : > { %v1584_v34 = vmul.f32 %v7966_v61, %v6136_v36  ;;  %v1813_v62 = vmul.f32 %v8066_v12, %v6136_v36  ;;  %v8271_v37 = vmul.f32 %v7975_v22, %v6136_v36  ;;  %v8274_v28 = vmul.f32 %v8017_v52, %v6136_v36  ;;  %10000 = vst [vmem:[#allocation16_spill] sm:$0xff] %v9999_v51 }
 0x1d4   : > { %9992 = vst [vmem:[#allocation25_spill] sm:$0xff] %v8253_v13  ;;  %v1297_v53 = vadd.f32 %v1265_v63, %v1231_v42  ;;  %v8277_v35 = vmul.f32 %v7986_v7, %v6136_v36  ;;  %v1460_v18 = vrot.slane %v1342_v55, 1  ;;  %v8287_v5 = vunpack.i.h.bf16 %v6140_v58 }
 0x1d5   : > { %9993 = vst [vmem:[#allocation21_spill] sm:$0xff] %v8255_v40  ;;  %v1702_v39 = vrot.slane %v1584_v34, 2  ;;  %v8280_v33 = vadd.f32 %v1813_v62, %v1779_v56  ;;  %v2005_v54 = vrot.slane %v8271_v37, 1  ;;  %v8289_v42 = vunpack.i.l.bf16 %v6140_v58 }
 0x1d6   : > { %v9994_v36 = vrot.slane %v7905_v3, 2  ;;  %v9995_v63 = vrot.slane %v8021_v6, 2  ;;  %v2247_v55 = vrot.slane %v8277_v35, 2  ;;  %v9996_v62 = vrot.slane %v7921_v2, 2  ;;  %326 = vst.msk [vmem:[#allocation2 + $0x30] sm:$0xf] %vm9780_vm10, %v9781_v47 }
 0x1d7   : > { %v9997_v37 = vrot.slane %v8035_v20, 2  ;;  %v1816_v3 = vmul.f32 %v8066_v12, %v8287_v5  ;;  %v1893_v6 = vmul.f32 %v7975_v22, %v8287_v5  ;;  %v2135_v35 = vmul.f32 %v7986_v7, %v8287_v5  ;;  %328 = vst.msk [vmem:[#allocation2 + $0x38] sm:$0xf] %vm9780_vm10, %v9781_v47 }
 0x1d8   : > { %v1156_v56 = vsel %vm1096_vm1, %v9995_v63, %v9994_v36  ;;  %v1343_v2 = vmul.f32 %v8026_v21, %v8289_v42  ;;  %v1585_v20 = vmul.f32 %v7966_v61, %v8289_v42  ;;  %v1814_v63 = vmul.f32 %v8066_v12, %v8289_v42  ;;  %330 = vst.msk [vmem:[#allocation2 + $0x40] sm:$0xf] %vm9780_vm10, %v9781_v47 }
 0x1d9   : > { %v1232_v34 = vadd.f32 %v1156_v56, %v8070_v57  ;;  %v1701_v58 = vsel %vm1096_vm1, %v9997_v37, %v9996_v62  ;;  %v1266_v57 = vmul.f32 %v8042_v59, %v8289_v42  ;;  %v2011_v56 = vrot.slane %v1893_v6, 1  ;;  %332 = vst.msk [vmem:[#allocation2 + $0x48] sm:$0xf] %vm9780_vm10, %v9781_v47  ;;  %vm8413_vm10 = vmand %vm9790_vm13, %vm3305_vm14 }
 0x1da   : > { %v1780_v36 = vadd.f32 %v1701_v58, %v8150_v19  ;;  %v2253_v62 = vrot.slane %v2135_v35, 2  ;;  %v1890_v23 = vmul.f32 %v7975_v22, %v8289_v42  ;;  %v1461_v19 = vrot.slane %v1343_v2, 1  ;;  %v5899_v35 = vld [vmem:[#allocation4 + $0x68] sm:$0xff]  ;;  %315 = vst.msk [vmem:[#allocation2 + $0x4] sm:$0x1] %vm9790_vm13, %v9781_v47  ;;  %vm8435_vm14 = vmor %vm3674_vm15, %vm3675_vm11 }
 0x1db   : > { %v1298_v37 = vadd.f32 %v1266_v57, %v1232_v34  ;;  %v1703_v58 = vrot.slane %v1585_v20, 2  ;;  %v2132_v6 = vmul.f32 %v7986_v7, %v8289_v42  ;;  %v5890_v34 = vld [vmem:[#allocation4 + $0x20] sm:$0xff]  ;;  %v10001_v57 = vrot.slane %v8162_v11, 1  ;;  %3860 = vmatpush.bf16.msra.mxu3 %v5899_v35  ;;  %317 = vst.msk [vmem:[#allocation2 + $0xc] sm:$0x1] %vm9790_vm13, %v9781_v47 }
 0x1dc   : > { %v1846_v14 = vadd.f32 %v1814_v63, %v1780_v36  ;;  %v10002_v17 = vrot.slane %v8174_v26, 2  ;;  %v2006_v13 = vrot.slane %v1890_v23, 1  ;;  %v2012_v2 = vsel %vm853_vm0, %v2010_v29, %v2011_v56  ;;  %v3301_v20 = vld [vmem:[#allocation2 + $0x8] sm:$0xf]  ;;  %3559 = vmatpush.bf16.msra.mxu0 %v5890_v34  ;;  %319 = vst.msk [vmem:[#allocation2 + $0x14] sm:$0x1] %vm9790_vm13, %v9781_v47 }
 0x1dd   : > { %v2014_v46 = vsel %vm853_vm0, %v2011_v56, %v10001_v57  ;;  %v1462_v36 = vsel %vm853_vm0, %v1460_v18, %v1461_v19  ;;  %v10003_v63 = vrot.slane %v8183_v38, 1  ;;  %v1704_v11 = vsel %vm1096_vm1, %v1702_v39, %v1703_v58  ;;  %v5898_v26 = vld [vmem:[#allocation4 + $0x60] sm:$0xff]  ;;  %321 = vst.msk [vmem:[#allocation2 + $0x1c] sm:$0x1] %vm9790_vm13, %v9781_v47 }
 0x1de   : > { %v2256_v40 = vsel %vm1096_vm1, %v2253_v62, %v10002_v17  ;;  %v10004_v57 = vld [vmem:[#allocation17_spill] sm:$0xff]  ;;  %v1539_v23 = vadd.f32 %v1462_v36, %v1297_v53  ;;  %v10006_v38 = vrot.slane %v8188_v31, 2  ;;  %v2007_v39 = vsel %vm853_vm0, %v2005_v54, %v2006_v13  ;;  %323 = vst.msk [vmem:[#allocation2 + $0x24] sm:$0x1] %vm9790_vm13, %v9781_v47 }
 0x1df   : > { %v1464_v9 = vsel %vm853_vm0, %v1461_v19, %v10003_v63  ;;  %v10005_v17 = vpack.c.b16 %v10004_v57, %v10004_v57  ;;  %v10007_v19 = vrot.slane %v8191_v50, 1  ;;  %v2248_v63 = vrot.slane %v2132_v6, 2  ;;  %3861 = vmatpush.bf16.msra.mxu3 %v5898_v26  ;;  %325 = vst.msk [vmem:[#allocation2 + $0x2c] sm:$0x1] %vm9790_vm13, %v9781_v47 }
 0x1e0   : > { %v1540_v18 = vadd.f32 %v1464_v9, %v1298_v37  ;;  %v1706_v56 = vsel %vm1096_vm1, %v1703_v58, %v10006_v38  ;;  %v10008_v57 = vrot.slane %v8246_v60, 2  ;;  %v1781_v9 = vadd.f32 %v1704_v11, %v1539_v23  ;;  %327 = vst.msk [vmem:[#allocation2 + $0x34] sm:$0x1] %vm9790_vm13, %v9781_v47 }
 0x1e1   : > { %v3302_v29 = vsel %vm8330_vm12, %v10005_v17, %v3301_v20  ;;  %v2009_v35 = vsel %vm853_vm0, %v2006_v13, %v10007_v19  ;;  %v8371_v17 = vld [vmem:[#allocation2] sm:$0xf]  ;;  %v2087_v31 = vadd.f32 %v2007_v39, %v8280_v33  ;;  %v10009_v50 = vrot.slane %v8236_v25, 1  ;;  %329 = vst.msk [vmem:[#allocation2 + $0x3c] sm:$0x1] %vm9790_vm13, %v9781_v47 }
 0x1e2   : > { %3303 = vst [vmem:[#allocation2 + $0x8] sm:$0xf] %v3302_v29  ;;  %v2254_v20 = vsel %vm1096_vm1, %v10008_v57, %v2253_v62  ;;  %v1782_v53 = vadd.f32 %v1706_v56, %v1540_v18  ;;  %v2088_v37 = vadd.f32 %v2009_v35, %v1846_v14  ;;  %v2249_v54 = vsel %vm1096_vm1, %v2247_v55, %v2248_v63 }
 0x1e3   : > { %v8379_v13 = vmax.f32 %v8236_v25, %v10009_v50  ;;  %v10011_v62 = vrot.slane %v8206_v24, 2  ;;  %v1847_v14 = vadd.f32 %v8251_v41, %v1781_v9  ;;  %v2329_v6 = vadd.f32 %v2249_v54, %v2087_v31  ;;  %v6157_v25 = vpop.permute.xlu2 %6156  ;;  %331 = vst.msk [vmem:[#allocation2 + $0x44] sm:$0x1] %vm9790_vm13, %v9781_v47 }
 0x1e4   : > { %v1848_v33 = vadd.f32 %v1816_v3, %v1782_v53  ;;  %v3589_v36 = vunpack.c.l.b16 %v8371_v17  ;;  %v5573_v3 = vrot.slane %v8371_v17, 9  ;;  %v8401_v26 = vunpack.i.h.bf16 %v6157_v25  ;;  %v3307_v53 = vld [vmem:[#allocation2 + $0xc] sm:$0x1]  ;;  %333 = vst.msk [vmem:[#allocation2 + $0x4c] sm:$0x1] %vm9790_vm13, %v9781_v47 }
 0x1e5   : > { %10010 = vst [vmem:[#allocation34_spill] sm:$0xff] %v8379_v13  ;;  %v2251_v58 = vsel %vm1096_vm1, %v2248_v63, %v10011_v62  ;;  %v2089_v24 = vadd.f32 %v2012_v2, %v1847_v14  ;;  %v2365_v11 = vadd.f32 %v8169_v48, %v2329_v6  ;;  %v8403_v29 = vunpack.i.l.bf16 %v6157_v25  ;;  %v8424_v63 = vld [vmem:[#allocation2 + $0x4] sm:$0x1]  ;;  %v10018_v62 = vld [vmem:[#allocation26_spill] sm:$0xff] }
 0x1e6   : > { %v2330_v34 = vadd.f32 %v2251_v58, %v2088_v37  ;;  %v2090_v55 = vadd.f32 %v2014_v46, %v1848_v33  ;;  %10012 = vst [vmem:[#allocation32_spill] sm:$0xff] %v8401_v26  ;;  %v8407_v2 = vmul.f32 %v8002_v32, %v8289_v42  ;;  %v10013_v56 = vmov 0 }
 0x1e7   : > { %v2331_v23 = vadd.f32 %v2254_v20, %v2089_v24  ;;  %v2397_v38 = vmax.f32 %v2365_v11, 0.0  ;;  %v10014_v56 = vsel %vm8413_vm10, 4294967295, %v10013_v56  ;;  %v8421_v39 = vmul.f32 %v8002_v32, %v8287_v5 }
 0x1e8   : > { %v2366_v41 = vadd.f32 %v8169_v48, %v2330_v34  ;;  %v2332_v18 = vadd.f32 %v2256_v40, %v2090_v55  ;;  %10015 = vst [vmem:[#allocation28_spill] sm:$0xff] %v10014_v56  ;;  %v716_v40 = vmul.f32 %v8010_v4, %v8289_v42  ;;  %v9785_v57 = vrot.slane %v8407_v2, 1 }
 0x1e9   : > { %v8409_v46 = vld [vmem:[#allocation2 + $0x8] sm:$0xf]  ;;  %v2367_v20 = vadd.f32 %v8169_v48, %v2331_v23  ;;  %v718_v37 = vmul.f32 %v8010_v4, %v8287_v5  ;;  %v8445_v50 = vmul.f32 %v8010_v4, %v8403_v29  ;;  %v10019_v58 = vpack.c.b16 %v10018_v62, %v10018_v62 }
 0x1ea   : > { %v9783_v19 = vunpack.c.l.b16 %v8409_v46  ;;  %v2398_v35 = vmax.f32 %v2366_v41, 0.0  ;;  %v2368_v9 = vadd.f32 %v8169_v48, %v2332_v18  ;;  %v3679_v33 = vrot.slane %v8424_v63, 5 }
 0x1eb   : > { %v3308_v14 = vsel %vm8413_vm10, %v10019_v58, %v3307_v53  ;;  %v8459_v6 = vmul.f32 %v8002_v32, %v8403_v29  ;;  %v2399_v34 = vmax.f32 %v2367_v20, 0.0  ;;  %v2440_v24 = vsel %vm2409_vm2, %v2397_v38, -inf }
 0x1ec   : > { %v3597_v54 = vpack.c.b16 %v9783_v19, %v3589_v36  ;;  %v2400_v25 = vmax.f32 %v2368_v9, 0.0  ;;  %3309 = vst [vmem:[#allocation2 + $0xc] sm:$0x1] %v3308_v14  ;;  %v9784_v36 = vrot.slane %v8421_v39, 1  ;;  %v2443_v55 = vsel %vm2409_vm2, %v2398_v35, -inf }
 0x1ed   : > { %10020 = vst [vmem:[#allocation30_spill] sm:$0xff] %v8459_v6  ;;  %v3680_v11 = vsel %vm8435_vm14, %v5573_v3, %v3679_v33  ;;  %v10021_v41 = vrot.slane %v8177_v16, 1  ;;  %v8474_v18 = vmul.f32 %v8017_v52, %v8289_v42  ;;  %v2441_v38 = vsel %vm2409_vm2, %v2399_v34, -inf }
 0x1ee   : > { %5569 = vmatmul.msk.bf16.vlgmr.msra.gmra.mxu1 %vm2409_vm2, %v3597_v54  ;;  %v2444_v20 = vsel %vm2409_vm2, %v2400_v25, -inf  ;;  %v10022_v9 = vrot.slane %v8135_v8, 1  ;;  %v8485_v16 = vmul.f32 %v8017_v52, %v8287_v5  ;;  %v2442_v35 = vmax.f32 %v2440_v24, %v2441_v38 }
 0x1ef   : > { %v918_v23 = vsel %vm853_vm0, %v9785_v57, %v10021_v41  ;;  %v8487_v53 = vmax.f32 %v2443_v55, %v2444_v20  ;;  %v5574_v42 = vrot.slane %v8409_v46, 9  ;;  %v3718_v62 = vunpack.c.l.b16 %v3680_v11 }
 0x1f0   : > { %v923_v3 = vsel %vm853_vm0, %v9784_v36, %v10022_v9  ;;  %v991_v58 = vadd.f32 %v918_v23, %v716_v40  ;;  %v8493_v8 = vmul.f32 %v8017_v52, %v8403_v29  ;;  %v2504_v33 = vrot.slane %v2442_v35, 2 }
 0x1f1   : > { %10023 = vst [vmem:[#allocation35_spill] sm:$0xff] %v8487_v53  ;;  %v993_v14 = vadd.f32 %v923_v3, %v718_v37  ;;  %v2505_v34 = vrot.slane %v2442_v35, 4  ;;  %v2506_v25 = vrot.slane %v2442_v35, 6  ;;  %v1158_v41 = vrot.slane %v8474_v18, 2 }
 0x1f2   : > { %10024 = vst [vmem:[#allocation15_spill] sm:$0xff] %v8493_v8  ;;  %v2851_v24 = vsel %vm2570_vm3, %v2442_v35, -inf  ;;  %v2879_v55 = vsel %vm2570_vm3, %v8487_v53, -inf  ;;  %v1268_v40 = vmul.f32 %v8042_v59, %v8287_v5  ;;  %v2858_v11 = vsel %vm2570_vm3, %v2504_v33, -inf }
 0x1f3   : > { %v2852_v37 = vrot.slane %v2851_v24, 4  ;;  %v2865_v23 = vsel %vm2570_vm3, %v2505_v34, -inf  ;;  %v2872_v20 = vsel %vm2570_vm3, %v2506_v25, -inf  ;;  %v8505_v9 = vld [vmem:[#allocation2 + $0xc] sm:$0x1]  ;;  %v2859_v3 = vrot.slane %v2858_v11, 4 }
 0x1f4   : > { %v2866_v47 = vrot.slane %v2865_v23, 4  ;;  %v2873_v35 = vrot.slane %v2872_v20, 4  ;;  %v1270_v19 = vmul.f32 %v8042_v59, %v8403_v29  ;;  %v3683_v60 = vrot.slane %v8505_v9, 5 }
 0x1f5   : > { %v2853_v36 = vmax.f32 %v2851_v24, %v2852_v37  ;;  %v10025_v57 = vrot.slane %v8180_v0, 2  ;;  %v2860_v34 = vmax.f32 %v2858_v11, %v2859_v3  ;;  %v2880_v38 = vrot.slane %v2879_v55, 4 }
 0x1f6   : > { %v2867_v25 = vmax.f32 %v2865_v23, %v2866_v47  ;;  %v10026_v13 = vrot.slane %v8142_v45, 2  ;;  %v10027_v15 = vrot.slane %v8485_v16, 2  ;;  %v8521_v54 = vmax.f32 %v2872_v20, %v2873_v35 }
 0x1f7   : > { %v1161_v33 = vsel %vm1096_vm1, %v1158_v41, %v10025_v57  ;;  %v2854_v56 = vrot.slane %v2853_v36, 2  ;;  %v8525_v24 = vsel %vm8435_vm14, %v5574_v42, %v3683_v60  ;;  %v2861_v37 = vrot.slane %v2860_v34, 2 }
 0x1f8   : > { %v1166_v10 = vsel %vm1096_vm1, %v10027_v15, %v10026_v13  ;;  %10028 = vst [vmem:[#allocation36_spill] sm:$0xff] %v8521_v54  ;;  %v1234_v0 = vadd.f32 %v1161_v33, %v991_v58  ;;  %v2868_v26 = vrot.slane %v2867_v25, 2  ;;  %v9789_v57 = vunpack.c.l.b16 %v8525_v24 }
 0x1f9   : > { %10029 = vst [vmem:[#allocation14_spill] sm:$0xff] %v8525_v24  ;;  %v1236_v47 = vadd.f32 %v1166_v10, %v993_v14  ;;  %v8529_v45 = vmax.f32 %v2853_v36, %v2854_v56  ;;  %v9791_v23 = vrot.slane %v8493_v8, 2  ;;  %v1346_v15 = vmul.f32 %v8026_v21, %v8287_v5 }
 0x1fa   : > { %v8534_v13 = vmax.f32 %v2860_v34, %v2861_v37  ;;  %v3726_v60 = vpack.c.b16 %v9789_v57, %v3718_v62  ;;  %v1300_v42 = vadd.f32 %v1268_v40, %v1234_v0  ;;  %v8540_v58 = vmul.f32 %v8026_v21, %v8403_v29 }
 0x1fb   : > { %10030 = vst [vmem:[#allocation22_spill] sm:$0xff] %v8529_v45  ;;  %v8542_v10 = vmax.f32 %v2879_v55, %v2880_v38  ;;  %v1466_v14 = vrot.slane %v1346_v15, 1  ;;  %v1588_v56 = vmul.f32 %v7966_v61, %v8287_v5  ;;  %v8548_v36 = vmul.f32 %v7966_v61, %v8403_v29 }
 0x1fc   : > { %10031 = vst [vmem:[#allocation20_spill] sm:$0xff] %v8534_v13  ;;  %v8551_v3 = vmax.f32 %v2867_v25, %v2868_v26  ;;  %5597 = vmatmul.msk.bf16.vlgmr.msra.gmra.mxu2 %vm2409_vm2, %v3726_v60  ;;  %v1302_v40 = vadd.f32 %v1270_v19, %v1236_v47  ;;  %v10034_v38 = vrot.slane %v8145_v49, 1  ;;  %v1471_v5 = vrot.slane %v8540_v58, 1  ;;  %v631_v19 = vpop.permute.xlu0 %630 }
 0x1fd   : > { %10032 = vst [vmem:[#allocation23_spill] sm:$0xff] %v8542_v10  ;;  %v1708_v33 = vrot.slane %v1588_v56, 2  ;;  %v1818_v26 = vmul.f32 %v8066_v12, %v8403_v29  ;;  %v8565_v25 = vmul.f32 %v7975_v22, %v8403_v29  ;;  %v8569_v37 = vmul.f32 %v7986_v7, %v8403_v29 }
 0x1fe   : > { %10033 = vst [vmem:[#allocation17_spill] sm:$0xff] %v8551_v3  ;;  %v1469_v35 = vsel %vm853_vm0, %v1466_v14, %v10034_v38  ;;  %v796_v49 = vmul.f32 %v8002_v32, %v8229_v43  ;;  %v801_v47 = vmul.f32 %v8002_v32, %v631_v19  ;;  %v10035_v15 = vrot.slane %v8407_v2, 1 }
 0x1ff   : > { %v1542_v34 = vadd.f32 %v1469_v35, %v1300_v42  ;;  %v10036_v60 = vrot.slane %v8261_v44, 1  ;;  %v10037_v56 = vrot.slane %v8159_v27, 2  ;;  %v717_v35 = vmul.f32 %v8010_v4, %v8229_v43 }
 0x200   : > { %v1039_v57 = vmul.f32 %v8017_v52, %v8229_v43  ;;  %v919_v11 = vrot.slane %v796_v49, 1  ;;  %v927_v62 = vrot.slane %v801_v47, 1  ;;  %v1044_v2 = vmul.f32 %v8017_v52, %v631_v19 }
 0x201   : > { %v916_v42 = vsel %vm853_vm0, %v10036_v60, %v10035_v15  ;;  %v1711_v38 = vsel %vm1096_vm1, %v1708_v33, %v10037_v56  ;;  %v1157_v44 = vrot.slane %v8274_v28, 2  ;;  %v1267_v27 = vmul.f32 %v8042_v59, %v8229_v43 }
 0x202   : > { %v990_v29 = vadd.f32 %v916_v42, %v8258_v1  ;;  %v1784_v55 = vadd.f32 %v1711_v38, %v1542_v34  ;;  %v1162_v15 = vrot.slane %v1039_v57, 2  ;;  %v1345_v60 = vmul.f32 %v8026_v21, %v8229_v43 }
 0x203   : > { %v9793_v4 = vrot.slane %v8565_v25, 1  ;;  %v10038_v42 = vrot.slane %v8421_v39, 1  ;;  %v1159_v28 = vsel %vm1096_vm1, %v1157_v44, %v1158_v41  ;;  %v10039_v57 = vrot.slane %v8485_v16, 2 }
 0x204   : > { %v1170_v56 = vrot.slane %v1044_v2, 2  ;;  %v1233_v38 = vadd.f32 %v1159_v28, %v990_v29  ;;  %v10040_v20 = vrot.slane %v8459_v6, 1  ;;  %v1350_v1 = vmul.f32 %v8026_v21, %v631_v19 }
 0x205   : > { %v921_v49 = vsel %vm853_vm0, %v919_v11, %v10038_v42  ;;  %v1164_v47 = vsel %vm1096_vm1, %v1162_v15, %v10039_v57  ;;  %v1465_v39 = vrot.slane %v1345_v60, 1  ;;  %v1587_v11 = vmul.f32 %v7966_v61, %v8229_v43 }
 0x206   : > { %v992_v34 = vadd.f32 %v921_v49, %v717_v35  ;;  %v928_v0 = vsel %vm853_vm0, %v10040_v20, %v927_v62  ;;  %v1850_v18 = vadd.f32 %v1818_v26, %v1784_v55  ;;  %v1299_v41 = vadd.f32 %v1267_v27, %v1233_v38 }
 0x207   : > { %v1592_v16 = vmul.f32 %v7966_v61, %v631_v19  ;;  %v1467_v35 = vsel %vm853_vm0, %v1465_v39, %v1466_v14  ;;  %v1473_v2 = vrot.slane %v1350_v1, 1  ;;  %v1707_v29 = vrot.slane %v1587_v11, 2 }
 0x208   : > { %v8610_v42 = vadd.f32 %v1164_v47, %v992_v34  ;;  %v1897_v44 = vmul.f32 %v7975_v22, %v631_v19  ;;  %v995_v20 = vadd.f32 %v928_v0, %v8445_v50  ;;  %v1171_v62 = vsel %vm1096_vm1, %v9791_v23, %v1170_v56 }
 0x209   : > { %v1541_v15 = vadd.f32 %v1467_v35, %v1299_v41  ;;  %v2139_v43 = vmul.f32 %v7986_v7, %v631_v19  ;;  %v1474_v55 = vsel %vm853_vm0, %v1471_v5, %v1473_v2  ;;  %v1709_v26 = vsel %vm1096_vm1, %v1707_v29, %v1708_v33  ;;  %v3310_v29 = vld [vmem:[#allocation2 + $0x10] sm:$0xf] }
 0x20a   : > { %v1715_v14 = vrot.slane %v1592_v16, 2  ;;  %v2018_v27 = vrot.slane %v1897_v44, 1  ;;  %vm3380_vm15 = vsmask.f32 3328  ;;  %vm3381_vm11 = vsmask.f32 7440  ;;  %v6151_v16 = vpop.permute.xlu1 %6150 }
 0x20b   : > { %v8624_v60 = vadd.f32 %v1709_v26, %v1541_v15  ;;  %v2260_v1 = vrot.slane %v2139_v43, 2  ;;  %v3384_v0 = vshrl.u32 %v8371_v17, 16  ;;  %v3387_v19 = vshll.u32 %v8371_v17, 16  ;;  %v6165_v26 = vpop.permute.xlu2 %6164  ;;  %vm8649_vm13 = vmor %vm3380_vm15, %vm3381_vm11 }
 0x20c   : > { %v2019_v50 = vsel %vm853_vm0, %v9793_v4, %v2018_v27  ;;  %v3393_v49 = vshll.u32 %v8424_v63, 16  ;;  %v1544_v28 = vadd.f32 %v1474_v55, %v1302_v40  ;;  %v10041_v33 = vrot.slane %v8569_v37, 2  ;;  %v10043_v40 = vld [vmem:[#allocation19_spill] sm:$0xff] }
 0x20d   : > { %v2092_v34 = vadd.f32 %v2019_v50, %v1850_v18  ;;  %v3398_v47 = vshrl.u32 %v8409_v46, 16  ;;  %v10042_v56 = vrot.slane %v8548_v36, 2  ;;  %v3386_v39 = vrot.slane %v3384_v0, 4  ;;  %v10044_v18 = vld [vmem:[#allocation31_spill] sm:$0xff] }
 0x20e   : > { %v2261_v57 = vsel %vm1096_vm1, %v10041_v33, %v2260_v1  ;;  %v3389_v11 = vrot.slane %v3387_v19, 5  ;;  %v3401_v41 = vshll.u32 %v8409_v46, 16  ;;  %v3395_v35 = vrot.slane %v3393_v49, 5 }
 0x20f   : > { %v1716_v38 = vsel %vm1096_vm1, %v10042_v56, %v1715_v14  ;;  %v2334_v17 = vadd.f32 %v2261_v57, %v2092_v34  ;;  %v3400_v63 = vrot.slane %v3398_v47, 4  ;;  %v3228_v2 = vsel %vm3221_vm9, %v10044_v18, %v10043_v40 }
 0x210   : > { %v3390_v44 = vor.u32 %v3389_v11, %v3386_v39  ;;  %v3403_v15 = vrot.slane %v3401_v41, 5  ;;  %v3407_v43 = vshll.u32 %v8505_v9, 16  ;;  %v3267_v55 = vpack.c.b16 %v3228_v2, %v3228_v2 }
 0x211   : > { %v8644_v14 = vadd.f32 %v1171_v62, %v995_v20  ;;  %v2370_v27 = vadd.f32 %v8169_v48, %v2334_v17  ;;  %v8653_v50 = vunpack.i.l.bf16 %v6151_v16  ;;  %v6167_v0 = vunpack.i.h.bf16 %v6165_v26  ;;  %v688_v17 = vpop.permute.xlu0 %687 }
 0x212   : > { %v8655_v19 = vadd.f32 %v1716_v38, %v1544_v28  ;;  %v3391_v49 = vrot.slane %v3390_v44, 4  ;;  %v3404_v34 = vor.u32 %v3403_v15, %v3400_v63  ;;  %v3311_v9 = vsel %vm8330_vm12, %v3267_v55, %v3310_v29 }
 0x213   : > { %10045 = vst [vmem:[#allocation26_spill] sm:$0xff] %v8644_v14  ;;  %v2402_v20 = vmax.f32 %v2370_v27, 0.0  ;;  %v8659_v62 = vunpack.i.h.bf16 %v6151_v16  ;;  %v8663_v33 = vmul.f32 %v7975_v22, %v8653_v50  ;;  %v8667_v57 = vmul.f32 %v7986_v7, %v8653_v50 }
 0x214   : > { %3312 = vst [vmem:[#allocation2 + $0x10] sm:$0xf] %v3311_v9  ;;  %v3396_v28 = vsel %vm8649_vm13, %v3391_v49, %v3395_v35  ;;  %v3405_v47 = vrot.slane %v3404_v34, 4  ;;  %v3409_v56 = vrot.slane %v3407_v43, 5  ;;  %v8672_v38 = vmul.f32 %v7975_v22, %v6167_v0  ;;  %v650_v9 = vpop.permute.xlu1 %649 }
 0x215   : > { %v3504_v39 = vunpack.c.l.b16 %v3396_v28  ;;  %v1817_v11 = vmul.f32 %v8066_v12, %v8653_v50  ;;  %v8677_v41 = vmul.f32 %v8066_v12, %v6167_v0  ;;  %v8679_v16 = vunpack.i.l.bf16 %v6165_v26  ;;  %v8737_v28 = vld [vmem:[%s9705_s1 + $0x7] ss:$0 sm:$0xff] }
 0x216   : > { %v8682_v63 = vsel %vm2409_vm2, %v2402_v20, -inf  ;;  %v3410_v35 = vsel %vm8649_vm13, %v3405_v47, %v3409_v56  ;;  %v2015_v40 = vrot.slane %v8663_v33, 1  ;;  %v8688_v18 = vmul.f32 %v7986_v7, %v6167_v0  ;;  %v10052_v47 = vld [vmem:[#allocation37_spill] sm:$0xff] }
 0x217   : > { %10048 = vst [vmem:[#allocation19_spill] sm:$0xff] %v8677_v41  ;;  %v8690_v2 = vunpack.c.l.b16 %v3410_v35  ;;  %v8695_v44 = vmul.f32 %v8026_v21, %v8679_v16  ;;  %v8699_v15 = vmul.f32 %v7966_v61, %v8679_v16  ;;  %v8704_v55 = vmul.f32 %v7975_v22, %v8679_v16 }
 0x218   : > { %v8708_v26 = vmul.f32 %v7986_v7, %v8679_v16  ;;  %v8711_v27 = vmul.f32 %v7975_v22, %v688_v17  ;;  %v8717_v61 = vmul.f32 %v8042_v59, %v8679_v16  ;;  %v8725_v22 = vmul.f32 %v7986_v7, %v688_v17  ;;  %v10053_v17 = vld [vmem:[#allocation32_spill] sm:$0xff] }
 0x219   : > { %10049 = vst [vmem:[#allocation31_spill] sm:$0xff] %v8690_v2  ;;  %v3512_v0 = vpack.c.b16 %v8690_v2, %v3504_v39  ;;  %v3234_v56 = vsel %vm3221_vm9, %v10052_v47, %v7918_v30  ;;  %v3316_v39 = vld [vmem:[#allocation2 + $0x18] sm:$0xf]  ;;  %v1899_v33 = vmul.f32 %v8737_v28, %v10053_v17  ;;  %v8743_v30 = vmul.f32 %v7986_v7, %v10053_v17 }
 0x21a   : > { %10050 = vst [vmem:[#allocation40_spill] sm:$0xff] %v8704_v55  ;;  %v3269_v49 = vpack.c.b16 %v3234_v56, %v3234_v56  ;;  %v8749_v47 = vmul.f32 %v8017_v52, %v650_v9  ;;  %v10054_v56 = vunpack.c.l.b16 %v8409_v46  ;;  %v1269_v43 = vmul.f32 %v8042_v59, %v8653_v50 }
 0x21b   : > { %10051 = vst [vmem:[#allocation41_spill] sm:$0xff] %v8708_v26  ;;  %v8720_v20 = vld [vmem:[#allocation2 + $0x10] sm:$0xf]  ;;  %5549 = vmatmul.msk.bf16.vlgmr.msra.gmra.mxu0 %vm2409_vm2, %v3512_v0  ;;  %v8746_v0 = vmul.f32 %v8002_v32, %v650_v9  ;;  %v1348_v7 = vmul.f32 %v8026_v21, %v8653_v50  ;;  %v1820_v52 = vmul.f32 %v8066_v12, %v10053_v17  ;;  %v2021_v29 = vrot.slane %v1899_v33, 1  ;;  %v8771_v21 = vld [vmem:[%s9705_s1 + $0x5] ss:$0 sm:$0xff] }
 0x21c   : > { %v9792_v35 = vunpack.c.l.b16 %v8720_v20  ;;  %v3317_v34 = vsel %vm8330_vm12, %v3269_v49, %v3316_v39  ;;  %v2263_v46 = vrot.slane %v8743_v30, 2  ;;  %v1301_v49 = vadd.f32 %v1269_v43, %v8610_v42  ;;  %v8779_v33 = vld [vmem:[%s9705_s1 + $0x4] ss:$0 sm:$0xff] }
 0x21d   : > { %3318 = vst [vmem:[#allocation2 + $0x18] sm:$0xf] %v3317_v34  ;;  %v1470_v39 = vrot.slane %v1348_v7, 1  ;;  %v1590_v59 = vmul.f32 %v8771_v21, %v8653_v50  ;;  %v8785_v42 = vmul.f32 %v8771_v21, %v650_v9  ;;  %v1849_v43 = vadd.f32 %v1817_v11, %v8624_v60  ;;  %v3313_v11 = vld [vmem:[#allocation2 + $0x14] sm:$0x1] }
 0x21e   : > { %v3814_v23 = vpack.c.b16 %v9792_v35, %v10054_v56  ;;  %v1819_v34 = vmul.f32 %v8066_v12, %v8659_v62  ;;  %v1898_v56 = vmul.f32 %v8737_v28, %v8659_v62  ;;  %v1852_v35 = vadd.f32 %v1820_v52, %v8655_v19  ;;  %v8806_v12 = vld [vmem:[%s9705_s1 + $0x8] ss:$0 sm:$0xff] }
 0x21f   : > { %10056 = vst [vmem:[#allocation32_spill] sm:$0xff] %v8785_v42  ;;  %v1472_v30 = vsel %vm853_vm0, %v1470_v39, %v1471_v5  ;;  %v1712_v7 = vrot.slane %v1590_v59, 2  ;;  %v1900_v4 = vmul.f32 %v8737_v28, %v650_v9  ;;  %v10057_v2 = vrot.slane %v8565_v25, 1 }
 0x220   : > { %5617 = vmatmul.msk.bf16.vlgmr.msra.gmra.mxu3 %vm2409_vm2, %v3814_v23  ;;  %v8782_v23 = vmul.f32 %v8779_v33, %v650_v9  ;;  %v1543_v32 = vadd.f32 %v1472_v30, %v1301_v49  ;;  %v10058_v58 = vrot.slane %v8548_v36, 2  ;;  %v2020_v39 = vrot.slane %v1898_v56, 1  ;;  %v3319_v56 = vld [vmem:[#allocation2 + $0x1c] sm:$0x1] }
 0x221   : > { %v2017_v60 = vsel %vm853_vm0, %v2015_v40, %v10057_v2  ;;  %v2140_v19 = vmul.f32 %v8806_v12, %v8659_v62  ;;  %v2023_v49 = vrot.slane %v1900_v4, 1  ;;  %v2142_v25 = vmul.f32 %v8806_v12, %v650_v9 }
 0x222   : > { %10055 = vst [vmem:[#allocation37_spill] sm:$0xff] %v8782_v23  ;;  %v1714_v5 = vsel %vm1096_vm1, %v1712_v7, %v10058_v58  ;;  %v2091_v59 = vadd.f32 %v2017_v60, %v1849_v43  ;;  %v10059_v40 = vrot.slane %v8569_v37, 2  ;;  %v10060_v36 = vrot.slane %v8667_v57, 2  ;;  %v10061_v58 = vld [vmem:[#allocation24_spill] sm:$0xff] }
 0x223   : > { %v1785_v52 = vadd.f32 %v1714_v5, %v1543_v32  ;;  %v2262_v7 = vrot.slane %v2140_v19, 2  ;;  %v10062_v24 = vpack.c.b16 %v10061_v58, %v10061_v58  ;;  %v2024_v57 = vsel %vm853_vm0, %v2021_v29, %v2023_v49  ;;  %v10064_v19 = vld [vmem:[#allocation38_spill] sm:$0xff]  ;;  %v3322_v58 = vld [vmem:[#allocation2 + $0x20] sm:$0xf] }
 0x224   : > { %v2259_v2 = vsel %vm1096_vm1, %v10060_v36, %v10059_v40  ;;  %v8816_v43 = vld [vmem:[#allocation2 + $0x18] sm:$0xf]  ;;  %v2265_v5 = vrot.slane %v2142_v25, 2  ;;  %v2022_v40 = vsel %vm853_vm0, %v2020_v39, %v2021_v29  ;;  %v2094_v36 = vadd.f32 %v2024_v57, %v1852_v35  ;;  %v10068_v25 = vld [vmem:[#allocation29_spill] sm:$0xff] }
 0x225   : > { %v2333_v60 = vadd.f32 %v2259_v2, %v2091_v59  ;;  %v3314_v4 = vsel %vm8413_vm10, %v10062_v24, %v3313_v11  ;;  %v9796_v9 = vunpack.c.l.b16 %v8816_v43  ;;  %v1851_v37 = vadd.f32 %v1819_v34, %v1785_v52  ;;  %v5905_v11 = vld [vmem:[#allocation4 + $0x98] sm:$0xff] }
 0x226   : > { %3315 = vst [vmem:[#allocation2 + $0x14] sm:$0x1] %v3314_v4  ;;  %v10065_v59 = vpack.c.b16 %v10064_v19, %v10064_v19  ;;  %v10066_v24 = vunpack.c.l.b16 %v8720_v20  ;;  %v2266_v29 = vsel %vm1096_vm1, %v2263_v46, %v2265_v5  ;;  %v2264_v35 = vsel %vm1096_vm1, %v2262_v7, %v2263_v46  ;;  %3959 = vmatpush.bf16.msrb.mxu0 %v5905_v11 }
 0x227   : > { %v2369_v30 = vadd.f32 %v8169_v48, %v2333_v60  ;;  %v2093_v52 = vadd.f32 %v2022_v40, %v1851_v37  ;;  %v2336_v39 = vadd.f32 %v2266_v29, %v2094_v36  ;;  %v10069_v60 = vld [vmem:[#allocation27_spill] sm:$0xff]  ;;  %v3412_v19 = vshrl.u32 %v8720_v20, 16 }
 0x228   : > { %v3320_v2 = vsel %vm8413_vm10, %v10065_v59, %v3319_v56  ;;  %v8837_v34 = vpack.c.b16 %v9796_v9, %v10066_v24  ;;  %v3240_v56 = vsel %vm3221_vm9, %v10069_v60, %v10068_v25  ;;  %v3415_v37 = vshll.u32 %v8720_v20, 16  ;;  %v8859_v24 = vld [vmem:[%s9705_s1 + $0x6] ss:$0 sm:$0xff] }
 0x229   : > { %3321 = vst [vmem:[#allocation2 + $0x1c] sm:$0x1] %v3320_v2  ;;  %v2401_v49 = vmax.f32 %v2369_v30, 0.0  ;;  %v2335_v4 = vadd.f32 %v2264_v35, %v2093_v52  ;;  %v3271_v57 = vpack.c.b16 %v3240_v56, %v3240_v56  ;;  %v2372_v5 = vadd.f32 %v8169_v48, %v2336_v39 }
 0x22a   : > { %10067 = vst [vmem:[#allocation24_spill] sm:$0xff] %v8837_v34  ;;  %5570 = vmatmul.msk.bf16.gmra.mxu1 %vm2409_vm2, %v8837_v34  ;;  %v5575_v30 = vrot.slane %v8720_v20, 9  ;;  %v3414_v59 = vrot.slane %v3412_v19, 4  ;;  %v3417_v2 = vrot.slane %v3415_v37, 5  ;;  %v8863_v52 = vmul.f32 %v8859_v24, %v8679_v16  ;;  %v8884_v19 = vld [vmem:[%s9705_s1 + $0x2] ss:$0 sm:$0xff] }
 0x22b   : > { %v2446_v46 = vsel %vm2409_vm2, %v2401_v49, -inf  ;;  %v2371_v40 = vadd.f32 %v8169_v48, %v2335_v4  ;;  %v3323_v36 = vsel %vm8330_vm12, %v3271_v57, %v3322_v58  ;;  %v2404_v29 = vmax.f32 %v2372_v5, 0.0  ;;  %v8869_v48 = vld [vmem:[%s9705_s1 + $0x1] ss:$0 sm:$0xff] }
 0x22c   : > { %10070 = vst [vmem:[#allocation28_spill] sm:$0xff] %v8863_v52  ;;  %v3426_v35 = vshrl.u32 %v8816_v43, 16  ;;  %v8873_v39 = vmul.f32 %v8869_v48, %v10053_v17  ;;  %v3418_v60 = vor.u32 %v3417_v2, %v3414_v59  ;;  %v8888_v37 = vmul.f32 %v8884_v19, %v10053_v17 }
 0x22d   : > { %v3357_v20 = vld [vmem:[#allocation2 + $0x14] sm:$0x1]  ;;  %3324 = vst [vmem:[#allocation2 + $0x20] sm:$0xf] %v3323_v36  ;;  %v2403_v49 = vmax.f32 %v2371_v40, 0.0  ;;  %v2450_v16 = vsel %vm2409_vm2, %v2404_v29, -inf }
 0x22e   : > { %v3687_v25 = vrot.slane %v3357_v20, 5  ;;  %v3421_v56 = vshll.u32 %v3357_v20, 16  ;;  %v8878_v4 = vrot.slane %v3426_v35, 4  ;;  %v2451_v40 = vmax.f32 %v8682_v63, %v2450_v16 }
 0x22f   : > { %v2447_v5 = vsel %vm2409_vm2, %v2403_v49, -inf  ;;  %v8898_v20 = vrot.slane %v3418_v60, 4 }
 0x230   : > { %v8876_v58 = vld [vmem:[#allocation2 + $0x1c] sm:$0x1]  ;;  %v8894_v36 = vsel %vm8435_vm14, %v5575_v30, %v3687_v25  ;;  %v2448_v2 = vmax.f32 %v2446_v46, %v2447_v5  ;;  %v8900_v35 = vrot.slane %v3421_v56, 5  ;;  %v2513_v9 = vrot.slane %v2451_v40, 2 }
 0x231   : > { %v2514_v57 = vrot.slane %v2451_v40, 4  ;;  %v2515_v7 = vrot.slane %v2451_v40, 6  ;;  %v2935_v49 = vsel %vm2570_vm3, %v2451_v40, -inf }
 0x232   : > { %v2510_v63 = vrot.slane %v2448_v2, 2  ;;  %v2511_v16 = vrot.slane %v2448_v2, 4  ;;  %v2512_v34 = vrot.slane %v2448_v2, 6  ;;  %v2907_v30 = vsel %vm2570_vm3, %v2448_v2, -inf }
 0x233   : > { %v2908_v25 = vrot.slane %v2907_v30, 4  ;;  %v2936_v46 = vrot.slane %v2935_v49, 4  ;;  %v2942_v5 = vsel %vm2570_vm3, %v2513_v9, -inf  ;;  %v2949_v60 = vsel %vm2570_vm3, %v2514_v57, -inf }
 0x234   : > { %v2914_v56 = vsel %vm2570_vm3, %v2510_v63, -inf  ;;  %v2921_v29 = vsel %vm2570_vm3, %v2511_v16, -inf  ;;  %v2928_v59 = vsel %vm2570_vm3, %v2512_v34, -inf  ;;  %v2943_v53 = vrot.slane %v2942_v5, 4 }
 0x235   : > { %v2909_v40 = vmax.f32 %v2907_v30, %v2908_v25  ;;  %v2915_v10 = vrot.slane %v2914_v56, 4  ;;  %v2922_v54 = vrot.slane %v2921_v29, 4  ;;  %v2929_v3 = vrot.slane %v2928_v59, 4 }
 0x236   : > { %v2937_v51 = vmax.f32 %v2935_v49, %v2936_v46  ;;  %v2944_v2 = vmax.f32 %v2942_v5, %v2943_v53  ;;  %v2950_v11 = vrot.slane %v2949_v60, 4  ;;  %v2956_v13 = vsel %vm2570_vm3, %v2515_v7, -inf }
 0x237   : > { %v2910_v45 = vrot.slane %v2909_v40, 2  ;;  %v2916_v9 = vmax.f32 %v2914_v56, %v2915_v10  ;;  %v2923_v26 = vmax.f32 %v2921_v29, %v2922_v54  ;;  %v2930_v57 = vmax.f32 %v2928_v59, %v2929_v3 }
 0x238   : > { %v2938_v52 = vrot.slane %v2937_v51, 2  ;;  %v2945_v63 = vrot.slane %v2944_v2, 2  ;;  %v2951_v55 = vmax.f32 %v2949_v60, %v2950_v11  ;;  %v2957_v16 = vrot.slane %v2956_v13, 4 }
 0x239   : > { %v2911_v42 = vmax.f32 %v2909_v40, %v2910_v45  ;;  %v2917_v34 = vrot.slane %v2916_v9, 2  ;;  %v2924_v41 = vrot.slane %v2923_v26, 2  ;;  %v2931_v30 = vrot.slane %v2930_v57, 2 }
 0x23a   : > { %v2939_v25 = vmax.f32 %v2937_v51, %v2938_v52  ;;  %v2946_v23 = vmax.f32 %v2944_v2, %v2945_v63  ;;  %v2952_v8 = vrot.slane %v2951_v55, 2  ;;  %v2958_v49 = vmax.f32 %v2956_v13, %v2957_v16 }
 0x23b   : > { %v2912_v53 = vrot.slane %v2911_v42, 1  ;;  %v2918_v46 = vmax.f32 %v2916_v9, %v2917_v34  ;;  %v2925_v5 = vmax.f32 %v2923_v26, %v2924_v41  ;;  %v2932_v7 = vmax.f32 %v2930_v57, %v2931_v30 }
 0x23c   : > { %v2940_v14 = vrot.slane %v2939_v25, 1  ;;  %v2947_v10 = vrot.slane %v2946_v23, 1  ;;  %v2953_v54 = vmax.f32 %v2951_v55, %v2952_v8  ;;  %v2959_v3 = vrot.slane %v2958_v49, 2 }
 0x23d   : > { %v2913_v59 = vmax.f32 %v2911_v42, %v2912_v53  ;;  %v2919_v29 = vrot.slane %v2918_v46, 1  ;;  %v2926_v60 = vrot.slane %v2925_v5, 1  ;;  %v2933_v56 = vrot.slane %v2932_v7, 1  ;;  %v8910_v42 = vld [vmem:[#allocation2 + $0x20] sm:$0xf] }
 0x23e   : > { %v2941_v45 = vmax.f32 %v2939_v25, %v2940_v14  ;;  %v2948_v40 = vmax.f32 %v2946_v23, %v2947_v10  ;;  %v2954_v11 = vrot.slane %v2953_v54, 1  ;;  %v2960_v6 = vmax.f32 %v2958_v49, %v2959_v3 }
 0x23f   : > { %v2920_v51 = vmax.f32 %v2918_v46, %v2919_v29  ;;  %v2927_v52 = vmax.f32 %v2925_v5, %v2926_v60  ;;  %v2934_v2 = vmax.f32 %v2932_v7, %v2933_v56  ;;  %v3067_v13 = vpack.c.bf16 %v2913_v59, %v2913_v59 }
 0x240   : > { %v2955_v63 = vmax.f32 %v2953_v54, %v2954_v11  ;;  %v2961_v9 = vrot.slane %v2960_v6, 1  ;;  %v3071_v41 = vpack.c.bf16 %v2941_v45, %v2941_v45  ;;  %v3072_v26 = vpack.c.bf16 %v2948_v40, %v2948_v40  ;;  %v6171_v40 = vpop.permute.xlu1 %6170 }
 0x241   : > { %v3068_v57 = vpack.c.bf16 %v2920_v51, %v2920_v51  ;;  %v3069_v16 = vpack.c.bf16 %v2927_v52, %v2927_v52  ;;  %v3070_v8 = vpack.c.bf16 %v2934_v2, %v2934_v2  ;;  %v3195_v55 = vunpack.c.l.b16 %v3067_v13 }
 0x242   : > { %v2962_v34 = vmax.f32 %v2960_v6, %v2961_v9  ;;  %v3073_v30 = vpack.c.bf16 %v2955_v63, %v2955_v63  ;;  %v3199_v14 = vunpack.c.l.b16 %v3071_v41  ;;  %v3200_v23 = vunpack.c.l.b16 %v3072_v26  ;;  %v3343_v63 = vld [vmem:[#allocation2 + $0x3c] sm:$0x1] }
 0x243   : > { %v3196_v25 = vunpack.c.l.b16 %v3068_v57  ;;  %v3197_v49 = vunpack.c.l.b16 %v3069_v16  ;;  %v3198_v53 = vunpack.c.l.b16 %v3070_v8  ;;  %v10071_v46 = vrot.slane %v8876_v58, 5 }
 0x244   : > { %v10072_v5 = vrot.slane %v8816_v43, 9  ;;  %v3074_v10 = vpack.c.bf16 %v2962_v34, %v2962_v34  ;;  %v3201_v54 = vunpack.c.l.b16 %v3073_v30  ;;  %v3593_v6 = vunpack.c.l.b16 %v8910_v42 }
 0x245   : > { %v3253_v59 = vsel %vm3211_vm4, %v3196_v25, %v3195_v55  ;;  %v3424_v29 = vsel %vm8649_vm13, %v8898_v20, %v8900_v35  ;;  %v10073_v60 = vshll.u32 %v8816_v43, 16  ;;  %v3435_v45 = vshll.u32 %v8876_v58, 16  ;;  %v6214_v25 = vld [vmem:[%s9705_s1] ss:$0 sm:$0xff] }
 0x246   : > { %v8918_v7 = vsel %vm8435_vm14, %v10072_v5, %v10071_v46  ;;  %v3202_v11 = vunpack.c.l.b16 %v3074_v10  ;;  %v3254_v51 = vsel %vm3213_vm5, %v3197_v49, %v3253_v59  ;;  %v10074_v52 = vunpack.c.l.b16 %v8894_v36 }
 0x247   : > { %v3721_v3 = vunpack.c.l.b16 %v8918_v7  ;;  %v3431_v56 = vrot.slane %v10073_v60, 5  ;;  %v10075_v13 = vunpack.c.l.b16 %v8816_v43  ;;  %v3255_v35 = vsel %vm3215_vm6, %v3198_v53, %v3254_v51  ;;  %v5919_v7 = vld [vmem:[#allocation4 + $0x108] sm:$0xff] }
 0x248   : > { %v3437_v9 = vrot.slane %v3435_v45, 5  ;;  %v930_v41 = vrot.slane %v8873_v39, 1  ;;  %v3256_v26 = vsel %vm3217_vm7, %v3199_v14, %v3255_v35  ;;  %v3278_v57 = vpack.c.b16 %v3202_v11, %v3202_v11 }
 0x249   : > { %v8935_v2 = vpack.c.b16 %v3721_v3, %v10074_v52  ;;  %v3815_v20 = vpack.c.b16 %v3593_v6, %v10075_v13  ;;  %v3432_v58 = vor.u32 %v3431_v56, %v8878_v4  ;;  %v8948_v43 = vunpack.c.l.b16 %v3424_v29 }
 0x24a   : > { %v6173_v16 = vunpack.i.h.bf16 %v6171_v40  ;;  %v3257_v8 = vsel %vm3219_vm8, %v3200_v23, %v3256_v26  ;;  %v1173_v34 = vrot.slane %v8888_v37, 2  ;;  %v8952_v4 = vunpack.i.l.bf16 %v6171_v40 }
 0x24b   : > { %5598 = vmatmul.msk.bf16.gmra.mxu2 %vm2409_vm2, %v8935_v2  ;;  %5618 = vmatmul.msk.bf16.gmra.mxu3 %vm2409_vm2, %v3815_v20  ;;  %v3433_v55 = vrot.slane %v3432_v58, 4  ;;  %v8955_v39 = vsel %vm3221_vm9, %v3201_v54, %v3257_v8  ;;  %v3344_v30 = vsel %vm8413_vm10, %v3278_v57, %v3343_v63  ;;  %v721_v49 = vmul.f32 %v6214_v25, %v8659_v62 }
 0x24c   : > { %v1905_v14 = vmul.f32 %v8737_v28, %v6173_v16  ;;  %3345 = vst [vmem:[#allocation2 + $0x3c] sm:$0x1] %v3344_v30  ;;  %v8967_v23 = vmul.f32 %v8859_v24, %v6173_v16  ;;  %v2147_v53 = vmul.f32 %v8806_v12, %v6173_v16  ;;  %v802_v46 = vmul.f32 %v8869_v48, %v8659_v62 }
 0x24d   : > { %v3438_v37 = vsel %vm8649_vm13, %v3433_v55, %v3437_v9  ;;  %v1045_v54 = vmul.f32 %v8884_v19, %v8659_v62  ;;  %v1355_v59 = vmul.f32 %v8779_v33, %v8952_v4  ;;  %v8980_v56 = vmul.f32 %v8771_v21, %v8952_v4 }
 0x24e   : > { %v8972_v5 = vunpack.c.l.b16 %v3438_v37  ;;  %v2031_v10 = vrot.slane %v1905_v14, 1  ;;  %v2273_v29 = vrot.slane %v2147_v53, 2  ;;  %v929_v60 = vrot.slane %v802_v46, 1  ;;  %v669_v46 = vpop.permute.xlu2 %668 }
 0x24f   : > { %v719_v45 = vmul.f32 %v6214_v25, %v8653_v50  ;;  %v10076_v11 = vrot.slane %v8672_v38, 1  ;;  %v1172_v52 = vrot.slane %v1045_v54, 2  ;;  %v1481_v13 = vrot.slane %v1355_v59, 1 }
 0x250   : > { %v8985_v40 = vpack.c.b16 %v8972_v5, %v8948_v43  ;;  %v10077_v20 = vrot.slane %v8688_v18, 2  ;;  %v931_v63 = vsel %vm853_vm0, %v929_v60, %v930_v41  ;;  %v1723_v58 = vrot.slane %v8980_v56, 2 }
 0x251   : > { %v2032_v51 = vsel %vm853_vm0, %v10076_v11, %v2031_v10  ;;  %v10078_v9 = vrot.slane %v8711_v27, 1  ;;  %v996_v38 = vadd.f32 %v931_v63, %v721_v49  ;;  %v1174_v57 = vsel %vm1096_vm1, %v1172_v52, %v1173_v34  ;;  %v10086_v52 = vld [vmem:[#allocation26_spill] sm:$0xff] }
 0x252   : > { %v8993_v35 = vsel %vm1096_vm1, %v10077_v20, %v2273_v29  ;;  %5550 = vmatmul.msk.bf16.gmra.mxu0 %vm2409_vm2, %v8985_v40  ;;  %v10079_v18 = vrot.slane %v8695_v44, 1  ;;  %v10080_v8 = vrot.slane %v8725_v22, 2  ;;  %v10081_v27 = vrot.slane %v8699_v15, 2 }
 0x253   : > { %v9000_v26 = vsel %vm853_vm0, %v2031_v10, %v10078_v9  ;;  %v722_v14 = vmul.f32 %v6214_v25, %v10053_v17  ;;  %v799_v49 = vmul.f32 %v8869_v48, %v8653_v50  ;;  %v10082_v37 = vrot.slane %v8746_v0, 1  ;;  %v6215_v25 = vld [vmem:[%s9705_s1 + $0x3] ss:$0 sm:$0xff] }
 0x254   : > { %v1482_v16 = vsel %vm853_vm0, %v10079_v18, %v1481_v13  ;;  %v9011_v55 = vsel %vm1096_vm1, %v2273_v29, %v10080_v8  ;;  %v1724_v30 = vsel %vm1096_vm1, %v10081_v27, %v1723_v58  ;;  %v1239_v53 = vadd.f32 %v1174_v57, %v996_v38  ;;  %v10087_v57 = vld [vmem:[#allocation15_spill] sm:$0xff] }
 0x255   : > { %v933_v44 = vsel %vm853_vm0, %v930_v41, %v10082_v37  ;;  %v1042_v22 = vmul.f32 %v8884_v19, %v8653_v50  ;;  %v10083_v10 = vrot.slane %v8749_v47, 2  ;;  %v1271_v54 = vmul.f32 %v6215_v25, %v8659_v62  ;;  %v10084_v19 = vld [vmem:[#allocation30_spill] sm:$0xff] }
 0x256   : > { %v924_v48 = vrot.slane %v799_v49, 1  ;;  %v997_v59 = vadd.f32 %v933_v44, %v722_v14  ;;  %v1272_v0 = vmul.f32 %v6215_v25, %v10053_v17  ;;  %v1274_v41 = vmul.f32 %v6215_v25, %v8952_v4 }
 0x257   : > { %v1176_v15 = vsel %vm1096_vm1, %v1173_v34, %v10083_v10  ;;  %v1305_v29 = vadd.f32 %v8717_v61, %v1239_v53  ;;  %v1167_v60 = vrot.slane %v1042_v22, 2  ;;  %v1351_v50 = vmul.f32 %v8779_v33, %v8659_v62 }
 0x258   : > { %v1352_v47 = vmul.f32 %v8779_v33, %v10053_v17  ;;  %v10085_v34 = vrot.slane %v10084_v19, 1  ;;  %v1240_v11 = vadd.f32 %v1176_v15, %v997_v59  ;;  %v1304_v20 = vadd.f32 %v1272_v0, %v10086_v52  ;;  %v10091_v59 = vld [vmem:[#allocation19_spill] sm:$0xff] }
 0x259   : > { %v1356_v63 = vmul.f32 %v8779_v33, %v669_v46  ;;  %v1547_v9 = vadd.f32 %v1482_v16, %v1305_v29  ;;  %v10088_v61 = vrot.slane %v10087_v57, 2  ;;  %v1475_v8 = vrot.slane %v1351_v50, 1  ;;  %v10089_v16 = vld [vmem:[#allocation37_spill] sm:$0xff] }
 0x25a   : > { %v926_v56 = vsel %vm853_vm0, %v924_v48, %v10085_v34  ;;  %v1306_v27 = vadd.f32 %v1274_v41, %v1240_v11  ;;  %v1476_v14 = vrot.slane %v1352_v47, 1  ;;  %v1593_v37 = vmul.f32 %v8771_v21, %v8659_v62 }
 0x25b   : > { %v994_v38 = vadd.f32 %v926_v56, %v719_v45  ;;  %v1169_v18 = vsel %vm1096_vm1, %v1167_v60, %v10088_v61  ;;  %v1483_v49 = vrot.slane %v1356_v63, 1  ;;  %v1789_v44 = vadd.f32 %v1724_v30, %v1547_v9 }
 0x25c   : > { %v1594_v22 = vmul.f32 %v8771_v21, %v10053_v17  ;;  %v1598_v33 = vmul.f32 %v8771_v21, %v669_v46  ;;  %v1477_v45 = vsel %vm853_vm0, %v1475_v8, %v1476_v14  ;;  %v10090_v10 = vrot.slane %v10089_v16, 1  ;;  %v6216_v8 = vld [vmem:[%s9706_s2] ss:$0 sm:$0xff] }
 0x25d   : > { %v1237_v53 = vadd.f32 %v1169_v18, %v994_v38  ;;  %v1484_v25 = vsel %vm853_vm0, %v1481_v13, %v1483_v49  ;;  %v1717_v48 = vrot.slane %v1593_v37, 2  ;;  %v1855_v0 = vadd.f32 %v10091_v59, %v1789_v44  ;;  %v10094_v38 = vld [vmem:[#allocation40_spill] sm:$0xff]  ;;  %v10097_v44 = vld [vmem:[#allocation41_spill] sm:$0xff] }
 0x25e   : > { %v1479_v15 = vsel %vm853_vm0, %v1476_v14, %v10090_v10  ;;  %v1548_v30 = vadd.f32 %v1484_v25, %v1306_v27  ;;  %v1718_v29 = vrot.slane %v1594_v22, 2  ;;  %v1725_v60 = vrot.slane %v1598_v33, 2  ;;  %v10101_v59 = vld [vmem:[#allocation21_spill] sm:$0xff] }
 0x25f   : > { %v1303_v41 = vadd.f32 %v1271_v54, %v1237_v53  ;;  %v1546_v62 = vadd.f32 %v1479_v15, %v1304_v20  ;;  %v1822_v17 = vmul.f32 %v8859_v24, %v8952_v4  ;;  %v1902_v21 = vmul.f32 %v8737_v28, %v8952_v4  ;;  %v10092_v54 = vld [vmem:[#allocation32_spill] sm:$0xff] }
 0x260   : > { %v2097_v50 = vadd.f32 %v2032_v51, %v1855_v0  ;;  %v1903_v19 = vmul.f32 %v8737_v28, %v669_v46  ;;  %v2144_v13 = vmul.f32 %v8806_v12, %v8952_v4  ;;  %v1719_v34 = vsel %vm1096_vm1, %v1717_v48, %v1718_v29  ;;  %v10102_v0 = vld [vmem:[#allocation33_spill] sm:$0xff] }
 0x261   : > { %v1545_v47 = vadd.f32 %v1477_v45, %v1303_v41  ;;  %v10093_v56 = vrot.slane %v10092_v54, 2  ;;  %v1726_v52 = vsel %vm1096_vm1, %v1723_v58, %v1725_v60  ;;  %v2026_v20 = vrot.slane %v1902_v21, 1  ;;  %v10096_v58 = vld [vmem:[#allocation28_spill] sm:$0xff]  ;;  %v10099_v45 = vld [vmem:[#allocation25_spill] sm:$0xff] }
 0x262   : > { %v2339_v24 = vadd.f32 %v8993_v35, %v2097_v50  ;;  %v1790_v51 = vadd.f32 %v1726_v52, %v1548_v30  ;;  %v10095_v57 = vrot.slane %v10094_v38, 1  ;;  %v2028_v61 = vrot.slane %v1903_v19, 1  ;;  %v10104_v30 = vld [vmem:[#allocation13_spill] sm:$0xff] }
 0x263   : > { %v1721_v11 = vsel %vm1096_vm1, %v1718_v29, %v10093_v56  ;;  %v1787_v63 = vadd.f32 %v1719_v34, %v1545_v47  ;;  %v2145_v4 = vmul.f32 %v8806_v12, %v669_v46  ;;  %v2268_v18 = vrot.slane %v2144_v13, 2  ;;  %v10105_v13 = vld [vmem:[#allocation18_spill] sm:$0xff] }
 0x264   : > { %v1788_v9 = vadd.f32 %v1721_v11, %v1546_v62  ;;  %v2027_v28 = vsel %vm853_vm0, %v10095_v57, %v2026_v20  ;;  %v2375_v27 = vadd.f32 %v6216_v8, %v2339_v24  ;;  %v1856_v35 = vadd.f32 %v8967_v23, %v1790_v51  ;;  %v10108_v51 = vld [vmem:[#allocation34_spill] sm:$0xff] }
 0x265   : > { %v1853_v14 = vadd.f32 %v10096_v58, %v1787_v63  ;;  %v2029_v37 = vsel %vm853_vm0, %v2026_v20, %v2028_v61  ;;  %v10098_v53 = vrot.slane %v10097_v44, 2  ;;  %v2270_v33 = vrot.slane %v2145_v4, 2 }
 0x266   : > { %v1854_v49 = vadd.f32 %v1822_v17, %v1788_v9  ;;  %v10100_v12 = vrot.slane %v10099_v45, 1  ;;  %v2407_v16 = vmax.f32 %v2375_v27, 0.0  ;;  %v2098_v25 = vadd.f32 %v9000_v26, %v1856_v35 }
 0x267   : > { %v2269_v22 = vsel %vm1096_vm1, %v10098_v53, %v2268_v18  ;;  %v2095_v10 = vadd.f32 %v2027_v28, %v1853_v14  ;;  %v2271_v48 = vsel %vm1096_vm1, %v2268_v18, %v2270_v33  ;;  %v2814_v23 = vrot.slane %v10101_v59, 1 }
 0x268   : > { %v2808_v46 = vmax.f32 %v10099_v45, %v10100_v12  ;;  %v2096_v15 = vadd.f32 %v2029_v37, %v1854_v49  ;;  %v10103_v41 = vrot.slane %v10102_v0, 2  ;;  %v2826_v29 = vrot.slane %v10104_v30, 2 }
 0x269   : > { %v2453_v60 = vsel %vm2409_vm2, %v2407_v16, -inf  ;;  %v2337_v17 = vadd.f32 %v2269_v22, %v2095_v10  ;;  %v2340_v50 = vadd.f32 %v9011_v55, %v2098_v25  ;;  %v9096_v47 = vmax.f32 %v10101_v59, %v2814_v23 }
 0x26a   : > { %v2820_v62 = vmax.f32 %v10102_v0, %v10103_v41  ;;  %v2338_v21 = vadd.f32 %v2271_v48, %v2096_v15  ;;  %v2827_v19 = vmax.f32 %v10104_v30, %v2826_v29  ;;  %v10106_v34 = vrot.slane %v10105_v13, 2 }
 0x26b   : > { %v2373_v56 = vadd.f32 %v6216_v8, %v2337_v17  ;;  %v2376_v52 = vadd.f32 %v6216_v8, %v2340_v50  ;;  %v10107_v9 = vrot.slane %v10105_v13, 4  ;;  %v3051_v38 = vpack.c.bf16 %v10108_v51, %v10108_v51 }
 0x26c   : > { %v2821_v26 = vrot.slane %v2820_v62, 1  ;;  %v2830_v54 = vsel %vm2570_vm3, %v10106_v34, -inf  ;;  %v2374_v11 = vadd.f32 %v6216_v8, %v2338_v21  ;;  %v2828_v63 = vrot.slane %v2827_v19, 1 }
 0x26d   : > { %v2831_v20 = vrot.slane %v2830_v54, 4  ;;  %v2837_v55 = vsel %vm2570_vm3, %v10107_v9, -inf  ;;  %v2405_v57 = vmax.f32 %v2373_v56, 0.0  ;;  %v2408_v61 = vmax.f32 %v2376_v52, 0.0 }
 0x26e   : > { %v9102_v24 = vmax.f32 %v2820_v62, %v2821_v26  ;;  %v2406_v28 = vmax.f32 %v2374_v11, 0.0  ;;  %v9109_v18 = vmax.f32 %v2827_v19, %v2828_v63  ;;  %v2838_v27 = vrot.slane %v2837_v55, 4 }
 0x26f   : > { %v2832_v4 = vmax.f32 %v2830_v54, %v2831_v20  ;;  %v3052_v58 = vpack.c.bf16 %v2808_v46, %v2808_v46  ;;  %v3053_v8 = vpack.c.bf16 %v9096_v47, %v9096_v47  ;;  %v2452_v14 = vsel %vm2409_vm2, %v2405_v57, -inf }
 0x270   : > { %v2455_v49 = vsel %vm2409_vm2, %v2406_v28, -inf  ;;  %v2456_v35 = vsel %vm2409_vm2, %v2408_v61, -inf  ;;  %v2454_v44 = vmax.f32 %v2452_v14, %v2453_v60  ;;  %v9116_v22 = vmax.f32 %v2837_v55, %v2838_v27 }
 0x271   : > { %v2833_v37 = vrot.slane %v2832_v4, 2  ;;  %v2457_v53 = vmax.f32 %v2455_v49, %v2456_v35  ;;  %v3054_v33 = vpack.c.bf16 %v9102_v24, %v9102_v24  ;;  %v3055_v12 = vpack.c.bf16 %v9109_v18, %v9109_v18  ;;  %v3346_v18 = vld [vmem:[#allocation2 + $0x40] sm:$0xf] }
 0x272   : > { %v9124_v46 = vunpack.c.l.b16 %v3051_v38  ;;  %v9126_v16 = vunpack.c.l.b16 %v3052_v58  ;;  %v2516_v10 = vrot.slane %v2454_v44, 2  ;;  %v2517_v15 = vrot.slane %v2454_v44, 4 }
 0x273   : > { %v9120_v45 = vmax.f32 %v2832_v4, %v2833_v37  ;;  %v2518_v25 = vrot.slane %v2454_v44, 6  ;;  %v2519_v48 = vrot.slane %v2457_v53, 2  ;;  %v2520_v59 = vrot.slane %v2457_v53, 4 }
 0x274   : > { %v2521_v23 = vrot.slane %v2457_v53, 6  ;;  %v2963_v0 = vsel %vm2570_vm3, %v2454_v44, -inf  ;;  %v2991_v41 = vsel %vm2570_vm3, %v2457_v53, -inf  ;;  %v2970_v30 = vsel %vm2570_vm3, %v2516_v10, -inf }
 0x275   : > { %v2964_v62 = vrot.slane %v2963_v0, 4  ;;  %v2977_v29 = vsel %vm2570_vm3, %v2517_v15, -inf  ;;  %v2984_v60 = vsel %vm2570_vm3, %v2518_v25, -inf  ;;  %v2971_v17 = vrot.slane %v2970_v30, 4 }
 0x276   : > { %v2978_v21 = vrot.slane %v2977_v29, 4  ;;  %v2985_v50 = vrot.slane %v2984_v60, 4  ;;  %v2992_v26 = vrot.slane %v2991_v41, 4  ;;  %v2998_v34 = vsel %vm2570_vm3, %v2519_v48, -inf }
 0x277   : > { %v2965_v19 = vmax.f32 %v2963_v0, %v2964_v62  ;;  %v3005_v54 = vsel %vm2570_vm3, %v2520_v59, -inf  ;;  %v3012_v56 = vsel %vm2570_vm3, %v2521_v23, -inf  ;;  %v2972_v11 = vmax.f32 %v2970_v30, %v2971_v17 }
 0x278   : > { %v2979_v52 = vmax.f32 %v2977_v29, %v2978_v21  ;;  %v2986_v20 = vmax.f32 %v2984_v60, %v2985_v50  ;;  %v2993_v63 = vmax.f32 %v2991_v41, %v2992_v26  ;;  %v2999_v55 = vrot.slane %v2998_v34, 4 }
 0x279   : > { %v2966_v9 = vrot.slane %v2965_v19, 2  ;;  %v3006_v51 = vrot.slane %v3005_v54, 4  ;;  %v3013_v38 = vrot.slane %v3012_v56, 4  ;;  %v2973_v57 = vrot.slane %v2972_v11, 2 }
 0x27a   : > { %v2980_v28 = vrot.slane %v2979_v52, 2  ;;  %v2987_v61 = vrot.slane %v2986_v20, 2  ;;  %v2994_v4 = vrot.slane %v2993_v63, 2  ;;  %v3000_v58 = vmax.f32 %v2998_v34, %v2999_v55 }
 0x27b   : > { %v2967_v27 = vmax.f32 %v2965_v19, %v2966_v9  ;;  %v3007_v14 = vmax.f32 %v3005_v54, %v3006_v51  ;;  %v3014_v49 = vmax.f32 %v3012_v56, %v3013_v38  ;;  %v2974_v35 = vmax.f32 %v2972_v11, %v2973_v57 }
 0x27c   : > { %v2981_v37 = vmax.f32 %v2979_v52, %v2980_v28  ;;  %v2988_v44 = vmax.f32 %v2986_v20, %v2987_v61  ;;  %v2995_v53 = vmax.f32 %v2993_v63, %v2994_v4  ;;  %v3001_v15 = vrot.slane %v3000_v58, 2 }
 0x27d   : > { %v2968_v10 = vrot.slane %v2967_v27, 1  ;;  %v3008_v25 = vrot.slane %v3007_v14, 2  ;;  %v3015_v48 = vrot.slane %v3014_v49, 2  ;;  %v2975_v59 = vrot.slane %v2974_v35, 1 }
 0x27e   : > { %v2982_v23 = vrot.slane %v2981_v37, 1  ;;  %v2989_v0 = vrot.slane %v2988_v44, 1  ;;  %v2996_v41 = vrot.slane %v2995_v53, 1  ;;  %v3002_v30 = vmax.f32 %v3000_v58, %v3001_v15 }
 0x27f   : > { %v2969_v62 = vmax.f32 %v2967_v27, %v2968_v10  ;;  %v3009_v29 = vmax.f32 %v3007_v14, %v3008_v25  ;;  %v3016_v60 = vmax.f32 %v3014_v49, %v3015_v48  ;;  %v2976_v17 = vmax.f32 %v2974_v35, %v2975_v59 }
 0x280   : > { %v2983_v21 = vmax.f32 %v2981_v37, %v2982_v23  ;;  %v2990_v50 = vmax.f32 %v2988_v44, %v2989_v0  ;;  %v2997_v26 = vmax.f32 %v2995_v53, %v2996_v41  ;;  %v3003_v19 = vrot.slane %v3002_v30, 1  ;;  %v3349_v23 = vld [vmem:[#allocation2 + $0x44] sm:$0x1] }
 0x281   : > { %v3010_v34 = vrot.slane %v3009_v29, 1  ;;  %v3017_v54 = vrot.slane %v3016_v60, 1  ;;  %v3075_v56 = vpack.c.bf16 %v2969_v62, %v2969_v62  ;;  %v3076_v11 = vpack.c.bf16 %v2976_v17, %v2976_v17 }
 0x282   : > { %v3077_v52 = vpack.c.bf16 %v2983_v21, %v2983_v21  ;;  %v3078_v20 = vpack.c.bf16 %v2990_v50, %v2990_v50  ;;  %v3079_v63 = vpack.c.bf16 %v2997_v26, %v2997_v26  ;;  %v3004_v9 = vmax.f32 %v3002_v30, %v3003_v19  ;;  %v10109_v19 = vld [vmem:[#allocation22_spill] sm:$0xff] }
 0x283   : > { %v3011_v55 = vmax.f32 %v3009_v29, %v3010_v34  ;;  %v3018_v51 = vmax.f32 %v3016_v60, %v3017_v54  ;;  %v3203_v38 = vunpack.c.l.b16 %v3075_v56  ;;  %v3204_v57 = vunpack.c.l.b16 %v3076_v11  ;;  %v10111_v11 = vld [vmem:[#allocation39_spill] sm:$0xff] }
 0x284   : > { %v3205_v28 = vunpack.c.l.b16 %v3077_v52  ;;  %v3206_v61 = vunpack.c.l.b16 %v3078_v20  ;;  %v3207_v4 = vunpack.c.l.b16 %v3079_v63  ;;  %v3080_v27 = vpack.c.bf16 %v3004_v9, %v3004_v9  ;;  %v10113_v63 = vld [vmem:[#allocation20_spill] sm:$0xff] }
 0x285   : > { %v3081_v58 = vpack.c.bf16 %v3011_v55, %v3011_v55  ;;  %v3082_v14 = vpack.c.bf16 %v3018_v51, %v3018_v51  ;;  %v2835_v49 = vrot.slane %v9120_v45, 1  ;;  %v3259_v35 = vsel %vm3211_vm4, %v3204_v57, %v3203_v38 }
 0x286   : > { %v2840_v37 = vrot.slane %v9116_v22, 2  ;;  %v3181_v44 = vunpack.c.l.b16 %v3053_v8  ;;  %v3182_v53 = vunpack.c.l.b16 %v3054_v33  ;;  %v3208_v10 = vunpack.c.l.b16 %v3080_v27 }
 0x287   : > { %v3209_v15 = vunpack.c.l.b16 %v3081_v58  ;;  %v3210_v25 = vunpack.c.l.b16 %v3082_v14  ;;  %v3260_v48 = vsel %vm3213_vm5, %v3205_v28, %v3259_v35  ;;  %v2836_v0 = vmax.f32 %v9120_v45, %v2835_v49  ;;  %v5904_v58 = vld [vmem:[#allocation4 + $0x90] sm:$0xff]  ;;  %v10117_v14 = vld [vmem:[#allocation36_spill] sm:$0xff] }
 0x288   : > { %v3261_v59 = vsel %vm3215_vm6, %v3206_v61, %v3260_v48  ;;  %v2841_v41 = vmax.f32 %v9116_v22, %v2840_v37  ;;  %v3183_v47 = vunpack.c.l.b16 %v3055_v12  ;;  %v3241_v33 = vsel %vm3211_vm4, %v9126_v16, %v9124_v46  ;;  %v3325_v22 = vld [vmem:[#allocation2 + $0x24] sm:$0x1]  ;;  %v10116_v61 = vld [vmem:[#allocation17_spill] sm:$0xff]  ;;  %v10119_v37 = vld [vmem:[#allocation23_spill] sm:$0xff]  ;;  %3960 = vmatpush.bf16.msrb.mxu0 %v5904_v58 }
 0x289   : > { %v3262_v8 = vsel %vm3217_vm7, %v3207_v4, %v3261_v59  ;;  %v3280_v24 = vpack.c.b16 %v3210_v25, %v3210_v25  ;;  %v2503_v62 = vrot.slane %v10105_v13, 6  ;;  %v3056_v60 = vpack.c.bf16 %v2836_v0, %v2836_v0 }
 0x28a   : > { %v3263_v30 = vsel %vm3219_vm8, %v3208_v10, %v3262_v8  ;;  %v2842_v29 = vrot.slane %v2841_v41, 1  ;;  %v3242_v45 = vsel %vm3213_vm5, %v3181_v44, %v3241_v33  ;;  %v10110_v34 = vrot.slane %v10109_v19, 1 }
 0x28b   : > { %v3264_v17 = vsel %vm3221_vm9, %v3209_v15, %v3263_v30  ;;  %v3350_v12 = vsel %vm8413_vm10, %v3280_v24, %v3349_v23  ;;  %v3243_v21 = vsel %vm3215_vm6, %v3182_v53, %v3242_v45  ;;  %v2844_v50 = vsel %vm2570_vm3, %v2503_v62, -inf  ;;  %v10120_v53 = vld [vmem:[#allocation35_spill] sm:$0xff]  ;;  %v3328_v62 = vld [vmem:[#allocation2 + $0x28] sm:$0xf]  ;;  %v5903_v45 = vld [vmem:[#allocation4 + $0x88] sm:$0xff] }
 0x28c   : > { %v3279_v46 = vpack.c.b16 %v3264_v17, %v3264_v17  ;;  %3351 = vst [vmem:[#allocation2 + $0x44] sm:$0x1] %v3350_v12  ;;  %v2843_v13 = vmax.f32 %v2841_v41, %v2842_v29  ;;  %v3184_v16 = vunpack.c.l.b16 %v3056_v60  ;;  %v3244_v26 = vsel %vm3217_vm7, %v3183_v47, %v3243_v21  ;;  %3961 = vmatpush.bf16.msrb.mxu0 %v5903_v45 }
 0x28d   : > { %v2857_v54 = vmax.f32 %v10109_v19, %v10110_v34  ;;  %v2845_v56 = vrot.slane %v2844_v50, 4  ;;  %v10112_v52 = vpack.c.b16 %v10111_v11, %v10111_v11  ;;  %v10114_v9 = vrot.slane %v10113_v63, 1 }
 0x28e   : > { %v3347_v38 = vsel %vm8330_vm12, %v3279_v46, %v3346_v18  ;;  %v3057_v57 = vpack.c.bf16 %v2843_v13, %v2843_v13  ;;  %v3245_v28 = vsel %vm3219_vm8, %v3184_v16, %v3244_v26  ;;  %v2870_v4 = vrot.slane %v10116_v61, 1 }
 0x28f   : > { %v3326_v20 = vsel %vm8413_vm10, %v10112_v52, %v3325_v22  ;;  %v2864_v55 = vmax.f32 %v10113_v63, %v10114_v9  ;;  %3348 = vst [vmem:[#allocation2 + $0x40] sm:$0xf] %v3347_v38  ;;  %v2846_v27 = vmax.f32 %v2844_v50, %v2845_v56  ;;  %v10118_v49 = vrot.slane %v10117_v14, 2  ;;  %v5909_v22 = vld [vmem:[#allocation4 + $0xb8] sm:$0xff] }
 0x290   : > { %3327 = vst [vmem:[#allocation2 + $0x24] sm:$0x1] %v3326_v20  ;;  %v2882_v44 = vrot.slane %v10119_v37, 2  ;;  %v10121_v10 = vrot.slane %v10120_v53, 2  ;;  %v3185_v25 = vunpack.c.l.b16 %v3057_v57  ;;  %v2871_v48 = vmax.f32 %v10116_v61, %v2870_v4  ;;  %4051 = vmatpush.bf16.msrb.mxu1 %v5909_v22 }
 0x291   : > { %v2876_v35 = vmax.f32 %v10117_v14, %v10118_v49  ;;  %v10122_v23 = vrot.slane %v10120_v53, 4  ;;  %v2847_v41 = vrot.slane %v2846_v27, 2  ;;  %v3059_v29 = vpack.c.bf16 %v2857_v54, %v2857_v54  ;;  %v3340_v14 = vld [vmem:[#allocation2 + $0x38] sm:$0xf] }
 0x292   : > { %v2886_v15 = vsel %vm2570_vm3, %v10121_v10, -inf  ;;  %v2883_v8 = vmax.f32 %v10119_v37, %v2882_v44  ;;  %v3246_v33 = vsel %vm3221_vm9, %v3185_v25, %v3245_v28  ;;  %v3060_v60 = vpack.c.bf16 %v2864_v55, %v2864_v55  ;;  %v3331_v25 = vld [vmem:[#allocation2 + $0x2c] sm:$0x1] }
 0x293   : > { %v2887_v59 = vrot.slane %v2886_v15, 4  ;;  %v2893_v0 = vsel %vm2570_vm3, %v10122_v23, -inf  ;;  %v2877_v47 = vrot.slane %v2876_v35, 1  ;;  %v3273_v17 = vpack.c.b16 %v3246_v33, %v3246_v33 }
 0x294   : > { %v2894_v24 = vrot.slane %v2893_v0, 4  ;;  %v2848_v18 = vmax.f32 %v2846_v27, %v2847_v41  ;;  %v2884_v21 = vrot.slane %v2883_v8, 1  ;;  %v3061_v13 = vpack.c.bf16 %v2871_v48, %v2871_v48 }
 0x295   : > { %v2888_v30 = vmax.f32 %v2886_v15, %v2887_v59  ;;  %v2878_v12 = vmax.f32 %v2876_v35, %v2877_v47  ;;  %v3329_v16 = vsel %vm8330_vm12, %v3273_v17, %v3328_v62  ;;  %v3187_v11 = vunpack.c.l.b16 %v3059_v29 }
 0x296   : > { %v2895_v46 = vmax.f32 %v2893_v0, %v2894_v24  ;;  %v2849_v26 = vrot.slane %v2848_v18, 1  ;;  %v2885_v19 = vmax.f32 %v2883_v8, %v2884_v21  ;;  %3330 = vst [vmem:[#allocation2 + $0x28] sm:$0xf] %v3329_v16  ;;  %v3188_v52 = vunpack.c.l.b16 %v3060_v60  ;;  %v3334_v16 = vld [vmem:[#allocation2 + $0x30] sm:$0xf] }
 0x297   : > { %v2889_v50 = vrot.slane %v2888_v30, 2  ;;  %v3062_v34 = vpack.c.bf16 %v2878_v12, %v2878_v12  ;;  %v3277_v20 = vpack.c.b16 %v8955_v39, %v8955_v39  ;;  %v3189_v55 = vunpack.c.l.b16 %v3061_v13  ;;  %v3361_v22 = vld [vmem:[#allocation2 + $0x24] sm:$0x1] }
 0x298   : > { %v2896_v56 = vrot.slane %v2895_v46, 2  ;;  %v2850_v63 = vmax.f32 %v2848_v18, %v2849_v26  ;;  %v3063_v9 = vpack.c.bf16 %v2885_v19, %v2885_v19  ;;  %v3247_v61 = vsel %vm3211_vm4, %v3188_v52, %v3187_v11 }
 0x299   : > { %v2890_v54 = vmax.f32 %v2888_v30, %v2889_v50  ;;  %v3190_v28 = vunpack.c.l.b16 %v3062_v34  ;;  %v3248_v58 = vsel %vm3213_vm5, %v3189_v55, %v3247_v61  ;;  %v3440_v44 = vshrl.u32 %v8910_v42, 16 }
 0x29a   : > { %v2897_v57 = vmax.f32 %v2895_v46, %v2896_v56  ;;  %v3058_v4 = vpack.c.bf16 %v2850_v63, %v2850_v63  ;;  %v3191_v27 = vunpack.c.l.b16 %v3063_v9  ;;  %v3443_v15 = vshll.u32 %v8910_v42, 16  ;;  %v5908_v63 = vld [vmem:[#allocation4 + $0xb0] sm:$0xff] }
 0x29b   : > { %v2891_v38 = vrot.slane %v2890_v54, 1  ;;  %v3249_v37 = vsel %vm3215_vm6, %v3190_v28, %v3248_v58  ;;  %v3341_v23 = vsel %vm8330_vm12, %v3277_v20, %v3340_v14  ;;  %v3442_v47 = vrot.slane %v3440_v44, 4  ;;  %v5913_v20 = vld [vmem:[#allocation4 + $0xd8] sm:$0xff]  ;;  %4052 = vmatpush.bf16.msrb.mxu1 %v5908_v63 }
 0x29c   : > { %v2898_v35 = vrot.slane %v2897_v57, 1  ;;  %v3186_v39 = vunpack.c.l.b16 %v3058_v4  ;;  %v3250_v10 = vsel %vm3217_vm7, %v3191_v27, %v3249_v37  ;;  %v3445_v8 = vrot.slane %v3443_v15, 5  ;;  %3342 = vst [vmem:[#allocation2 + $0x38] sm:$0xf] %v3341_v23  ;;  %4127 = vmatpush.bf16.msrb.mxu2 %v5913_v20  ;;  %v5902_v4 = vld [vmem:[#allocation4 + $0x80] sm:$0xff]  ;;  %v5917_v44 = vld [vmem:[#allocation4 + $0xf8] sm:$0xff] }
 0x29d   : > { %v2892_v49 = vmax.f32 %v2890_v54, %v2891_v38  ;;  %v9205_v0 = vld [vmem:[#allocation2 + $0x28] sm:$0xf]  ;;  %v2509_v12 = vrot.slane %v10120_v53, 6  ;;  %v3449_v19 = vshll.u32 %v3361_v22, 16  ;;  %v5577_v54 = vrot.slane %v8910_v42, 9  ;;  %v5912_v38 = vld [vmem:[#allocation4 + $0xd0] sm:$0xff]  ;;  %3962 = vmatpush.bf16.msrb.mxu0 %v5902_v4  ;;  %4216 = vmatpush.bf16.msrb.mxu3 %v5917_v44 }
 0x29e   : > { %v2899_v48 = vmax.f32 %v2897_v57, %v2898_v35  ;;  %v3274_v41 = vpack.c.b16 %v3186_v39, %v3186_v39  ;;  %v3594_v24 = vunpack.c.l.b16 %v9205_v0  ;;  %v3454_v29 = vshrl.u32 %v9205_v0, 16  ;;  %v5907_v42 = vld [vmem:[#allocation4 + $0xa8] sm:$0xff]  ;;  %v5921_v20 = vld [vmem:[#allocation4 + $0x118] sm:$0xff] }
 0x29f   : > { %v3064_v59 = vpack.c.bf16 %v2892_v49, %v2892_v49  ;;  %v3457_v60 = vshll.u32 %v9205_v0, 16  ;;  %v3446_v21 = vor.u32 %v3445_v8, %v3442_v47  ;;  %v2900_v26 = vsel %vm2570_vm3, %v2509_v12, -inf  ;;  %4053 = vmatpush.bf16.msrb.mxu1 %v5907_v42  ;;  %v9274_v63 = vld [vmem:[#allocation2 + $0x40] sm:$0xf] }
 0x2a0   : > { %v3065_v33 = vpack.c.bf16 %v2899_v48, %v2899_v48  ;;  %v3332_v30 = vsel %vm8413_vm10, %v3274_v41, %v3331_v25  ;;  %v9216_v45 = vpack.c.b16 %v3594_v24, %v3593_v6  ;;  %v3456_v50 = vrot.slane %v3454_v29, 4  ;;  %4128 = vmatpush.bf16.msrb.mxu2 %v5912_v38 }
 0x2a1   : > { %v3192_v62 = vunpack.c.l.b16 %v3064_v59  ;;  %3333 = vst [vmem:[#allocation2 + $0x2c] sm:$0x1] %v3332_v30  ;;  %v3459_v46 = vrot.slane %v3457_v60, 5  ;;  %v2901_v34 = vrot.slane %v2900_v26, 4  ;;  %v3447_v11 = vrot.slane %v3446_v21, 4  ;;  %v5906_v59 = vld [vmem:[#allocation4 + $0xa0] sm:$0xff]  ;;  %4296 = vmatpush.bf16.msra.mxu0 %v5921_v20 }
 0x2a2   : > { %v3193_v17 = vunpack.c.l.b16 %v3065_v33  ;;  %5571 = vmatmul.msk.bf16.gmra.mxu1 %vm2409_vm2, %v9216_v45  ;;  %v3695_v9 = vrot.slane %v3361_v22, 5  ;;  %v5578_v55 = vrot.slane %v9205_v0, 9  ;;  %v3451_v28 = vrot.slane %v3449_v19, 5  ;;  %v5911_v33 = vld [vmem:[#allocation4 + $0xc8] sm:$0xff] }
 0x2a3   : > { %v3251_v18 = vsel %vm3219_vm8, %v3192_v62, %v3250_v10  ;;  %v3460_v56 = vor.u32 %v3459_v46, %v3456_v50  ;;  %v2902_v52 = vmax.f32 %v2900_v26, %v2901_v34  ;;  %v9234_v35 = vld [vmem:[#allocation2 + $0x38] sm:$0xf]  ;;  %4054 = vmatpush.bf16.msrb.mxu1 %v5906_v59  ;;  %v5910_v46 = vld [vmem:[#allocation4 + $0xc0] sm:$0xff]  ;;  %v3895_v31 = vshll.u32 %v9274_v63, 16 }
 0x2a4   : > { %v3252_v13 = vsel %vm3221_vm9, %v3193_v17, %v3251_v18  ;;  %v9230_v51 = vsel %vm8435_vm14, %v5577_v54, %v3695_v9  ;;  %v3452_v49 = vsel %vm8649_vm13, %v3447_v11, %v3451_v28  ;;  %v3596_v47 = vunpack.c.l.b16 %v9234_v35  ;;  %4129 = vmatpush.bf16.msrb.mxu2 %v5911_v33  ;;  %v5916_v9 = vld [vmem:[#allocation4 + $0xf0] sm:$0xff] }
 0x2a5   : > { %v3275_v6 = vpack.c.b16 %v3252_v13, %v3252_v13  ;;  %v2903_v61 = vrot.slane %v2902_v52, 2  ;;  %v3461_v58 = vrot.slane %v3460_v56, 4  ;;  %v3722_v15 = vunpack.c.l.b16 %v9230_v51  ;;  %4217 = vmatpush.bf16.msrb.mxu3 %v5916_v9  ;;  %v10123_v59 = vld [vmem:[#allocation14_spill] sm:$0xff]  ;;  %v3369_v51 = vld [vmem:[#allocation2 + $0x44] sm:$0x1] }
 0x2a6   : > { %v9244_v41 = vunpack.c.l.b16 %v3452_v49  ;;  %v3482_v8 = vshrl.u32 %v9234_v35, 16  ;;  %v3485_v22 = vshll.u32 %v9234_v35, 16  ;;  %v3371_v9 = vld [vmem:[#allocation2 + $0x4c] sm:$0x1]  ;;  %vm334_vm0 = vcmask 518144  }
 0x2a7   : > { %v3335_v53 = vsel %vm8330_vm12, %v3275_v6, %v3334_v16  ;;  %v2904_v37 = vmax.f32 %v2902_v52, %v2903_v61  ;;  %v3337_v6 = vld [vmem:[#allocation2 + $0x34] sm:$0x1]  ;;  %v3813_v61 = vunpack.c.l.b16 %v9274_v63  ;;  %vm9816_vm1 = vcmask 1040384  }
 0x2a8   : > { %3336 = vst [vmem:[#allocation2 + $0x30] sm:$0xf] %v3335_v53  ;;  %v3363_v57 = vld [vmem:[#allocation2 + $0x2c] sm:$0x1]  ;;  %v3484_v16 = vrot.slane %v3482_v8, 4  ;;  %v3487_v26 = vrot.slane %v3485_v22, 5  ;;  %4130 = vmatpush.bf16.msrb.mxu2 %v5910_v46  ;;  %v10125_v8 = vunpack.c.l.b16 %v8894_v36 }
 0x2a9   : > { %v3699_v27 = vrot.slane %v3363_v57, 5  ;;  %v3463_v14 = vshll.u32 %v3363_v57, 16  ;;  %v2905_v48 = vrot.slane %v2904_v37, 1  ;;  %v5914_v46 = vld [vmem:[#allocation4 + $0xe0] sm:$0xff]  ;;  %vm4607_vm7 = vcmask 1041408  }
 0x2aa   : > { %v3488_v56 = vor.u32 %v3487_v26, %v3484_v16  ;;  %v3561_v16 = vpop.f32.mrf.mxu0  ;;  %vm9817_vm9 = vcmask 1043458   ;;  %vm4634_vm12 = vsmask.f32 3336 }
 0x2ab   : > { %v9238_v39 = vsel %vm8435_vm14, %v5578_v55, %v3699_v27  ;;  %v3465_v10 = vrot.slane %v3463_v14, 5  ;;  %v2906_v60 = vmax.f32 %v2904_v37, %v2905_v48  ;;  %v5580_v55 = vrot.slane %v9234_v35, 9 }
 0x2ac   : > { %v3723_v25 = vunpack.c.l.b16 %v9238_v39  ;;  %v3489_v38 = vrot.slane %v3488_v56, 4  ;;  %v3817_v37 = vpack.c.b16 %v3813_v61, %v3596_v47  ;;  %v3863_v56 = vpop.f32.mrf.mxu3  ;;  %v3916_v39 = vpack.c.b16 %v9244_v41, %v8972_v5 }
 0x2ad   : > { %v3466_v23 = vsel %vm8649_vm13, %v3461_v58, %v3465_v10  ;;  %v3066_v12 = vpack.c.bf16 %v2906_v60, %v2906_v60 }
 0x2ae   : > { %v9252_v62 = vpack.c.b16 %v3723_v25, %v3722_v15  ;;  %v9254_v29 = vunpack.c.l.b16 %v3466_v23  ;;  %v10124_v23 = vunpack.c.l.b16 %v10123_v59 }
 0x2af   : > { %v3364_v30 = vld [vmem:[#allocation2 + $0x30] sm:$0xf]  ;;  %v3194_v13 = vunpack.c.l.b16 %v3066_v12 }
 0x2b0   : > { %v3595_v17 = vunpack.c.l.b16 %v3364_v30  ;;  %5599 = vmatmul.msk.bf16.gmra.mxu2 %vm2409_vm2, %v9252_v62  ;;  %v9261_v18 = vpack.c.b16 %v9254_v29, %v9244_v41  ;;  %v3468_v19 = vshrl.u32 %v3364_v30, 16  ;;  %v3471_v34 = vshll.u32 %v3364_v30, 16  ;;  %v5915_v12 = vld [vmem:[#allocation4 + $0xe8] sm:$0xff] }
 0x2b1   : > { %v3276_v0 = vpack.c.b16 %v3194_v13, %v3194_v13  ;;  %v5579_v4 = vrot.slane %v3364_v30, 9  ;;  %v4007_v33 = vpack.c.b16 %v10125_v8, %v10124_v23  ;;  %4218 = vmatpush.bf16.msrb.mxu3 %v5915_v12  ;;  %v5920_v13 = vld [vmem:[#allocation4 + $0x110] sm:$0xff]  ;;  %v3897_v23 = vrot.slane %v3895_v31, 5 }
 0x2b2   : > { %v3816_v21 = vpack.c.b16 %v3595_v17, %v3594_v24  ;;  %v9265_v50 = vpack.c.b16 %v3596_v47, %v3595_v17  ;;  %5551 = vmatmul.msk.bf16.gmra.mxu0 %vm2409_vm2, %v9261_v18  ;;  %v3367_v24 = vld [vmem:[#allocation2 + $0x3c] sm:$0x1]  ;;  %v3470_v53 = vrot.slane %v3468_v19, 4  ;;  %v3473_v11 = vrot.slane %v3471_v34, 5 }
 0x2b3   : > { %v3338_v54 = vsel %vm8413_vm10, %v3276_v0, %v3337_v6  ;;  %v3491_v52 = vshll.u32 %v3367_v24, 16  ;;  %v3707_v57 = vrot.slane %v3367_v24, 5  ;;  %4297 = vmatpush.bf16.msra.mxu0 %v5920_v13  ;;  %v3775_v6 = vpop.f32.mrf.mxu2  ;;  %v4008_v34 = vpack.c.b16 %v3722_v15, %v3721_v3  ;;  %v10126_v0 = vld [vmem:[#allocation24_spill] sm:$0xff]  ;;  %v10127_v24 = vld [vmem:[#allocation31_spill] sm:$0xff] }
 0x2b4   : > { %5619 = vmatmul.msk.bf16.gmra.mxu3 %vm2409_vm2, %v3816_v21  ;;  %5572 = vmatmul.msk.bf16.gmra.mxu1 %vm2409_vm2, %v9265_v50  ;;  %3339 = vst [vmem:[#allocation2 + $0x34] sm:$0x1] %v3338_v54  ;;  %v3474_v28 = vor.u32 %v3473_v11, %v3470_v53  ;;  %v3646_v21 = vpop.f32.mrf.mxu1  ;;  %v3915_v54 = vpack.c.b16 %v8948_v43, %v10127_v24  ;;  %v5641_v3 = vrot.slane %v9274_v63, 9  ;;  %v3995_v11 = vrot.slane %v3369_v51, 5 }
 0x2b5   : > { %v3493_v32 = vrot.slane %v3491_v52, 5  ;;  %v9280_v42 = vsel %vm8435_vm14, %v5580_v55, %v3707_v57  ;;  %v3647_v26 = vadd.f32 %v3646_v21, %v3561_v16  ;;  %4219 = vmatpush.bf16.msrb.mxu3 %v5914_v46  ;;  %v9332_v52 = vpop.f32.mrf.mxu0  ;;  %vm4633_vm10 = vsmask.f32 1280 }
 0x2b6   : > { %v3475_v49 = vrot.slane %v3474_v28, 4  ;;  %v3725_v44 = vunpack.c.l.b16 %v9280_v42  ;;  %v3996_v43 = vsel %vm8435_vm14, %v5641_v3, %v3995_v11  ;;  %v4252_v28 = vrot.slane %v3371_v9, 5  ;;  %vm4635_vm15 = vmor %vm4633_vm10, %vm4634_vm12 }
 0x2b7   : > { %v3494_v58 = vsel %vm8649_vm13, %v3489_v38, %v3493_v32  ;;  %v3795_v19 = vadd.f32 %v3775_v6, %v3647_v26  ;;  %4298 = vmatpush.bf16.msra.mxu0 %v5919_v7  ;;  %v9340_v38 = vpop.f32.mrf.mxu3  ;;  %v4006_v32 = vunpack.c.l.b16 %v3996_v43  ;;  %v4170_v26 = vshll.u32 %v3371_v9, 16 }
 0x2b8   : > { %v9293_v60 = vunpack.c.l.b16 %v3494_v58 }
 0x2b9   : > { %v9324_v53 = vadd.f32 %v3863_v56, %v3795_v19  ;;  %v4010_v12 = vpack.c.b16 %v4006_v32, %v3725_v44  ;;  %v3901_v19 = vshll.u32 %v3369_v51, 16 }
 0x2bb   : > { %v3365_v27 = vld [vmem:[#allocation2 + $0x34] sm:$0x1]  ;;  %v9334_v20 = vpop.f32.mrf.mxu2  ;;  %v3903_v24 = vrot.slane %v3901_v19, 5 }
 0x2bc   : > { %v3703_v14 = vrot.slane %v3365_v27, 5  ;;  %v3477_v35 = vshll.u32 %v3365_v27, 16  ;;  %v9328_v15 = vpop.f32.mrf.mxu1 }
 0x2be   : > { %v3704_v10 = vsel %vm8435_vm14, %v5579_v4, %v3703_v14  ;;  %v3479_v48 = vrot.slane %v3477_v35, 5  ;;  %v5918_v14 = vld [vmem:[#allocation4 + $0x100] sm:$0xff] }
 0x2bf   : > { %v3724_v30 = vunpack.c.l.b16 %v3704_v10  ;;  %4299 = vmatpush.bf16.msra.mxu0 %v5918_v14 }
 0x2c0   : > { %v3480_v22 = vsel %vm8649_vm13, %v3475_v49, %v3479_v48 }
 0x2c1   : > { %v9301_v47 = vpack.c.b16 %v3725_v44, %v3724_v30  ;;  %v9303_v17 = vunpack.c.l.b16 %v3480_v22  ;;  %v4009_v55 = vpack.c.b16 %v3724_v30, %v3723_v25 }
 0x2c3   : > { %5600 = vmatmul.msk.bf16.gmra.mxu2 %vm2409_vm2, %v9301_v47  ;;  %v9309_v36 = vpack.c.b16 %v9293_v60, %v9303_v17 }
 0x2c4   : > { %5658 = vmatmul.msk.bf16.vlgmr.msrb.gmra.mxu1 %vm2409_vm2, %v4007_v33  ;;  %5620 = vmatmul.msk.bf16.gmra.mxu3 %vm2409_vm2, %v3817_v37  ;;  %v3651_v25 = vpop.f32.mrf.mxu1  ;;  %v3892_v37 = vshrl.u32 %v9274_v63, 16 }
 0x2c5   : > { %5552 = vmatmul.msk.bf16.gmra.mxu0 %vm2409_vm2, %v9309_v36 }
 0x2c6   : > { %v3894_v59 = vrot.slane %v3892_v37, 4 }
 0x2c8   : > { %v3898_v46 = vor.u32 %v3897_v23, %v3894_v59 }
 0x2ca   : > { %v3899_v42 = vrot.slane %v3898_v46, 4 }
 0x2cc   : > { %v3653_v30 = vpop.f32.mrf.mxu1  ;;  %v3904_v7 = vsel %vm8649_vm13, %v3899_v42, %v3903_v24 }
 0x2cd   : > { %v3914_v51 = vunpack.c.l.b16 %v3904_v7 }
 0x2ce   : > { %v3780_v35 = vpop.f32.mrf.mxu2  ;;  %v3868_v10 = vpop.f32.mrf.mxu3 }
 0x2cf   : > { %v3566_v49 = vpop.f32.mrf.mxu0 }
 0x2d3   : > { %5678 = vmatmul.msk.bf16.vlgmr.msrb.gmra.mxu2 %vm2409_vm2, %v10126_v0  ;;  %v4172_v0 = vrot.slane %v4170_v26, 5 }
 0x2d4   : > { %5659 = vmatmul.msk.bf16.gmra.mxu1 %vm2409_vm2, %v4008_v34  ;;  %5698 = vmatmul.msk.bf16.vlgmr.msrb.gmra.mxu3 %vm2409_vm2, %v8985_v40  ;;  %v9330_v40 = vld [vmem:[#allocation2 + $0x48] sm:$0xf]  ;;  %v3917_v34 = vpack.c.b16 %v9303_v17, %v9254_v29  ;;  %v3918_v17 = vpack.c.b16 %v3914_v51, %v9293_v60 }
 0x2d5   : > { %5637 = vmatmul.msk.bf16.vlgmr.msrb.gmra.mxu0 %vm2409_vm2, %v3915_v54  ;;  %v5702_v57 = vrot.slane %v9330_v40, 9  ;;  %v4164_v48 = vshll.u32 %v9330_v40, 16 }
 0x2d6   : > { %v3782_v13 = vpop.f32.mrf.mxu2  ;;  %v3870_v54 = vpop.f32.mrf.mxu3 }
 0x2d7   : > { %v4253_v4 = vsel %vm8435_vm14, %v5702_v57, %v4252_v28  ;;  %v4166_v33 = vrot.slane %v4164_v48, 5  ;;  %v3568_v22 = vpop.f32.mrf.mxu0  ;;  %vm4636_vm14 = vsmask.f32 5392 }
 0x2d8   : > { %v4263_v27 = vunpack.c.l.b16 %v4253_v4  ;;  %v3654_v21 = vadd.f32 %v3653_v30, %v3568_v22 }
 0x2da   : > { %v9352_v58 = vpack.c.b16 %v4263_v27, %v4006_v32  ;;  %v3798_v6 = vadd.f32 %v3782_v13, %v3654_v21  ;;  %v10128_v13 = vmov 0  }
 0x2db   : > { %335 = vst.msk [vmem:[#allocation3] sm:$0x7] %vm334_vm0, %v10128_v13 }
 0x2dc   : > { %v3886_v56 = vadd.f32 %v3870_v54, %v3798_v6  ;;  %336 = vst.msk [vmem:[#allocation3 + $0x4] sm:$0x7] %vm334_vm0, %v10128_v13  ;;  %v3649_v6 = vadd.f32 %v9328_v15, %v9332_v52  ;;  %v9421_v15 = vld [vmem:[%s9708_s4] ss:$0 sm:$0xff] }
 0x2dd   : > { %340 = vst.msk [vmem:[#allocation3 + $0x14] sm:$0x7] %vm334_vm0, %v10128_v13 }
 0x2de   : > { %337 = vst.msk [vmem:[#allocation3 + $0x8] sm:$0x7] %vm334_vm0, %v10128_v13  ;;  %v3796_v42 = vadd.f32 %v9334_v20, %v3649_v6 }
 0x2df   : > { %338 = vst.msk [vmem:[#allocation3 + $0xc] sm:$0x7] %vm334_vm0, %v10128_v13 }
 0x2e0   : > { %339 = vst.msk [vmem:[#allocation3 + $0x10] sm:$0x7] %vm334_vm0, %v10128_v13  ;;  %v3884_v24 = vadd.f32 %v9340_v38, %v3796_v42 }
 0x2e3   : > { %5679 = vmatmul.msk.bf16.gmra.mxu2 %vm2409_vm2, %v9216_v45  ;;  %v4161_v45 = vshrl.u32 %v9330_v40, 16 }
 0x2e4   : > { %5660 = vmatmul.msk.bf16.gmra.mxu1 %vm2409_vm2, %v4009_v55  ;;  %5699 = vmatmul.msk.bf16.gmra.mxu3 %vm2409_vm2, %v9261_v18  ;;  %v3652_v18 = vadd.f32 %v3651_v25, %v3566_v49 }
 0x2e5   : > { %5638 = vmatmul.msk.bf16.gmra.mxu0 %vm2409_vm2, %v3916_v39  ;;  %v4163_v8 = vrot.slane %v4161_v45, 4 }
 0x2e6   : > { %v3797_v5 = vadd.f32 %v3780_v35, %v3652_v18 }
 0x2e7   : > { %v4167_v16 = vor.u32 %v4166_v33, %v4163_v8 }
 0x2e8   : > { %v9359_v41 = vadd.f32 %v3868_v10, %v3797_v5 }
 0x2e9   : > { %v4168_v44 = vrot.slane %v4167_v16, 4 }
 0x2f3   : > { %5680 = vmatmul.msk.bf16.gmra.mxu2 %vm2409_vm2, %v9265_v50  ;;  %v4094_v50 = vunpack.c.l.b16 %v9330_v40 }
 0x2f4   : > { %5661 = vmatmul.msk.bf16.gmra.mxu1 %vm2409_vm2, %v4010_v12  ;;  %5700 = vmatmul.msk.bf16.gmra.mxu3 %vm2409_vm2, %v9309_v36  ;;  %v4173_v36 = vsel %vm8649_vm13, %v4168_v44, %v4172_v0  ;;  %vm4807_vm13 = vmor %vm9816_vm1, %vm3211_vm4 }
 0x2f5   : > { %5639 = vmatmul.msk.bf16.gmra.mxu0 %vm2409_vm2, %v3917_v34  ;;  %v4183_v3 = vunpack.c.l.b16 %v4173_v36  ;;  %v4095_v29 = vpack.c.b16 %v4094_v50, %v3813_v61  ;;  %vm9444_vm11 = vmor %vm4807_vm13, %vm3215_vm6 }
 0x2f6   : > { %vm9449_vm1 = vmor %vm4635_vm15, %vm4636_vm14 }
 0x2f7   : > { %v4184_v11 = vpack.c.b16 %v4183_v3, %v3914_v51  ;;  %vm9456_vm10 = vmor %vm9444_vm11, %vm3219_vm8  ;;  %vm4571_vm8 = vsmask.f32 2306 }
 0x303   : > { %5681 = vmatmul.msk.bf16.gmra.mxu2 %vm2409_vm2, %v4095_v29 }
 0x304   : > { %5701 = vmatmul.msk.bf16.gmra.mxu3 %vm2409_vm2, %v4184_v11 }
 0x305   : > { %5640 = vmatmul.msk.bf16.gmra.mxu0 %vm2409_vm2, %v3918_v17 }
 0x315   : > { %5719 = vmatmul.msk.bf16.vlgmr.msra.gmra.mxu0 %vm2409_vm2, %v8935_v2 }
 0x31f   : > { %v3656_v1 = vpop.f32.mrf.mxu1 }
 0x325   : > { %5720 = vmatmul.msk.bf16.gmra.mxu0 %vm2409_vm2, %v9252_v62 }
 0x327   : > { %v3658_v63 = vpop.f32.mrf.mxu1 }
 0x32f   : > { %v3571_v40 = vpop.f32.mrf.mxu0 }
 0x330   : > { %v3657_v43 = vadd.f32 %v3656_v1, %v3571_v40 }
 0x331   : > { %v3661_v39 = vpop.f32.mrf.mxu1 }
 0x333   : > { %v3785_v9 = vpop.f32.mrf.mxu2 }
 0x334   : > { %v3799_v55 = vadd.f32 %v3785_v9, %v3657_v43 }
 0x335   : > { %5721 = vmatmul.msk.bf16.gmra.mxu0 %vm2409_vm2, %v9301_v47 }
 0x337   : > { %v3873_v57 = vpop.f32.mrf.mxu3  ;;  %v3573_v28 = vpop.f32.mrf.mxu0 }
 0x338   : > { %v3887_v61 = vadd.f32 %v3873_v57, %v3799_v55  ;;  %v3659_v32 = vadd.f32 %v3658_v63, %v3573_v28 }
 0x339   : > { %v3663_v37 = vpop.f32.mrf.mxu1 }
 0x33b   : > { %v3787_v60 = vpop.f32.mrf.mxu2 }
 0x33c   : > { %v3800_v4 = vadd.f32 %v3787_v60, %v3659_v32 }
 0x33f   : > { %v3875_v27 = vpop.f32.mrf.mxu3 }
 0x340   : > { %v3888_v2 = vadd.f32 %v3875_v27, %v3800_v4  ;;  %v9427_v27 = vld [vmem:[#allocation3] sm:$0x7] }
 0x341   : > { %v4056_v26 = vpop.f32.mrf.mxu1 }
 0x342   : > { %v3576_v25 = vpop.f32.mrf.mxu0 }
 0x343   : > { %v3662_v62 = vadd.f32 %v3661_v39, %v3576_v25 }
 0x345   : > { %5722 = vmatmul.msk.bf16.gmra.mxu0 %vm2409_vm2, %v9352_v58 }
 0x346   : > { %v3790_v49 = vpop.f32.mrf.mxu2 }
 0x347   : > { %v3878_v14 = vpop.f32.mrf.mxu3  ;;  %v3801_v35 = vadd.f32 %v3790_v49, %v3662_v62 }
 0x349   : > { %v3889_v18 = vadd.f32 %v3878_v14, %v3801_v35 }
 0x34a   : > { %v3578_v31 = vpop.f32.mrf.mxu0 }
 0x34b   : > { %v3664_v10 = vadd.f32 %v3663_v37, %v3578_v31 }
 0x34e   : > { %v3792_v45 = vpop.f32.mrf.mxu2 }
 0x34f   : > { %v3880_v48 = vpop.f32.mrf.mxu3  ;;  %v3802_v47 = vadd.f32 %v3792_v45, %v3664_v10 }
 0x351   : > { %v3890_v5 = vadd.f32 %v3880_v48, %v3802_v47 }
 0x352   : > { %v3964_v59 = vpop.f32.mrf.mxu0 }
 0x353   : > { %v3984_v23 = vadd.f32 %v3964_v59, %v9324_v53 }
 0x355   : > { %v4076_v54 = vadd.f32 %v4056_v26, %v3984_v23 }
 0x356   : > { %v4132_v19 = vpop.f32.mrf.mxu2 }
 0x357   : > { %v4221_v44 = vpop.f32.mrf.mxu3  ;;  %v4152_v36 = vadd.f32 %v4132_v19, %v4076_v54 }
 0x359   : > { %v4241_v11 = vadd.f32 %v4221_v44, %v4152_v36 }
 0x35a   : > { %v3966_v8 = vpop.f32.mrf.mxu0 }
 0x35b   : > { %v3985_v7 = vadd.f32 %v3966_v8, %v3884_v24 }
 0x35e   : > { %v4134_v50 = vpop.f32.mrf.mxu2 }
 0x35f   : > { %v4223_v29 = vpop.f32.mrf.mxu3 }
 0x362   : > { %v3969_v33 = vpop.f32.mrf.mxu0 }
 0x363   : > { %v3986_v30 = vadd.f32 %v3969_v33, %v9359_v41 }
 0x366   : > { %v4137_v9 = vpop.f32.mrf.mxu2 }
 0x367   : > { %v4226_v63 = vpop.f32.mrf.mxu3 }
 0x36a   : > { %v3971_v22 = vpop.f32.mrf.mxu0 }
 0x36b   : > { %v9392_v12 = vadd.f32 %v3971_v22, %v3886_v56  ;;  %v4058_v56 = vpop.f32.mrf.mxu1 }
 0x36c   : > { %v4077_v3 = vadd.f32 %v4058_v56, %v3985_v7 }
 0x36e   : > { %v4153_v52 = vadd.f32 %v4134_v50, %v4077_v3  ;;  %v4139_v45 = vpop.f32.mrf.mxu2 }
 0x36f   : > { %v4228_v22 = vpop.f32.mrf.mxu3 }
 0x370   : > { %v4242_v1 = vadd.f32 %v4223_v29, %v4153_v52 }
 0x372   : > { %v3974_v58 = vpop.f32.mrf.mxu0 }
 0x373   : > { %v9394_v21 = vadd.f32 %v3974_v58, %v3887_v61  ;;  %v4061_v20 = vpop.f32.mrf.mxu1 }
 0x374   : > { %v4078_v28 = vadd.f32 %v4061_v20, %v3986_v30 }
 0x376   : > { %v4154_v49 = vadd.f32 %v4137_v9, %v4078_v28 }
 0x378   : > { %v4243_v8 = vadd.f32 %v4226_v63, %v4154_v49 }
 0x37a   : > { %v3976_v46 = vpop.f32.mrf.mxu0 }
 0x37b   : > { %v9398_v16 = vadd.f32 %v3976_v46, %v3888_v2  ;;  %v4063_v2 = vpop.f32.mrf.mxu1 }
 0x37c   : > { %v4079_v23 = vadd.f32 %v4063_v2, %v9392_v12 }
 0x382   : > { %v3979_v53 = vpop.f32.mrf.mxu0 }
 0x383   : > { %v9410_v41 = vadd.f32 %v3979_v53, %v3889_v18  ;;  %v4603_v18 = vrot.slane %v9427_v27, 2  ;;  %v4066_v7 = vpop.f32.mrf.mxu1 }
 0x385   : > { %v4610_v33 = vsel %vm4607_vm7, %v9427_v27, %v4603_v18  ;;  %v4612_v30 = vsel %vm9817_vm9, %v9427_v27, %v4603_v18  ;;  %vm4638_vm9 = vsmask.f32 7448 }
 0x386   : > { %v4614_v26 = vrot.slane %v4612_v30, 2  ;;  %v4640_v6 = vshrl.u32 %v4610_v33, 16  ;;  %v4643_v24 = vshll.u32 %v4610_v33, 16  ;;  %vm9463_vm12 = vmor %vm9449_vm1, %vm4638_vm9 }
 0x387   : > { %vm9480_vm1 = vmand %vm334_vm0, %vm4571_vm8  ;;  %vm10139_vm0 = vcmask 1043458  }
 0x388   : > { %v4642_v44 = vrot.slane %v4640_v6, 6  ;;  %v4649_v54 = vshll.u32 %v4614_v26, 16  ;;  %vm10140_vm9 = vmmov %vm10139_vm0 }
 0x389   : > { %vm10141_vm13 = vmmov %vm10139_vm0 }
 0x38a   : > { %v3981_v34 = vpop.f32.mrf.mxu0  ;;  %vm10146_vm14 = vmmov %vm10139_vm0 }
 0x38b   : > { %v9415_v0 = vadd.f32 %v3981_v34, %v3890_v5 }
 0x392   : > { %v4301_v51 = vpop.f32.mrf.mxu0 }
 0x393   : > { %v4321_v17 = vadd.f32 %v4301_v51, %v4241_v11  ;;  %v4645_v11 = vrot.slane %v4643_v24, 7 }
 0x395   : > { %v4333_v38 = vadd.f32 %v9421_v15, %v4321_v17  ;;  %v4646_v9 = vor.u32 %v4645_v11, %v4642_v44 }
 0x397   : > { %v4341_v55 = vmax.f32 %v4333_v38, 0.0  ;;  %v4647_v2 = vrot.slane %v4646_v9, 2 }
 0x399   : > { %v4349_v32 = vsel %vm2409_vm2, %v4341_v55, -inf  ;;  %v4651_v55 = vrot.slane %v4649_v54, 7 }
 0x39a   : > { %v4303_v40 = vpop.f32.mrf.mxu0 }
 0x39b   : > { %v4322_v43 = vadd.f32 %v4303_v40, %v4242_v1  ;;  %v4155_v40 = vadd.f32 %v4139_v45, %v4079_v23  ;;  %v4068_v23 = vpop.f32.mrf.mxu1 }
 0x39d   : > { %v4334_v57 = vadd.f32 %v9421_v15, %v4322_v43 }
 0x39f   : > { %v4342_v61 = vmax.f32 %v4334_v57, 0.0  ;;  %v4142_v57 = vpop.f32.mrf.mxu2 }
 0x3a1   : > { %v4350_v60 = vsel %vm2409_vm2, %v4342_v61, -inf }
 0x3a2   : > { %v4351_v4 = vmax.f32 %v4349_v32, %v4350_v60  ;;  %v4306_v56 = vpop.f32.mrf.mxu0 }
 0x3a3   : > { %v4323_v29 = vadd.f32 %v4306_v56, %v4243_v8  ;;  %v4081_v56 = vadd.f32 %v4068_v23, %v9398_v16 }
 0x3a4   : > { %v4365_v39 = vrot.slane %v4351_v4, 2  ;;  %v4366_v25 = vrot.slane %v4351_v4, 4  ;;  %v4367_v62 = vrot.slane %v4351_v4, 6  ;;  %v4389_v14 = vsel %vm2570_vm3, %v4351_v4, -inf }
 0x3a5   : > { %v4390_v35 = vrot.slane %v4389_v14, 4  ;;  %v4244_v4 = vadd.f32 %v4228_v22, %v4155_v40 }
 0x3a6   : > { %v4396_v37 = vsel %vm2570_vm3, %v4365_v39, -inf  ;;  %v4403_v31 = vsel %vm2570_vm3, %v4366_v25, -inf  ;;  %v4410_v10 = vsel %vm2570_vm3, %v4367_v62, -inf  ;;  %v5757_v39 = vrot.slane %v4610_v33, 9  ;;  %v4231_v62 = vpop.f32.mrf.mxu3 }
 0x3a7   : > { %v4391_v48 = vmax.f32 %v4389_v14, %v4390_v35  ;;  %v4397_v47 = vrot.slane %v4396_v37, 4  ;;  %v4404_v5 = vrot.slane %v4403_v31, 4  ;;  %v4411_v59 = vrot.slane %v4410_v10, 4 }
 0x3a8   : > { %v4814_v25 = vrot.slane %v4614_v26, 7  ;;  %v4573_v26 = vld [vmem:[#allocation3 + $0x4] sm:$0x7] }
 0x3a9   : > { %v4392_v58 = vrot.slane %v4391_v48, 2  ;;  %v4398_v46 = vmax.f32 %v4396_v37, %v4397_v47  ;;  %v4405_v13 = vmax.f32 %v4403_v31, %v4404_v5  ;;  %v4412_v53 = vmax.f32 %v4410_v10, %v4411_v59 }
 0x3aa   : > { %v4335_v37 = vadd.f32 %v9421_v15, %v4323_v29  ;;  %v4652_v31 = vsel %vm9463_vm12, %v4647_v2, %v4651_v55  ;;  %v9472_v10 = vsel %vm9456_vm10, %v5757_v39, %v4814_v25  ;;  %v4308_v45 = vpop.f32.mrf.mxu0 }
 0x3ab   : > { %v4393_v19 = vmax.f32 %v4391_v48, %v4392_v58  ;;  %v4399_v34 = vrot.slane %v4398_v46, 2  ;;  %v4406_v42 = vrot.slane %v4405_v13, 2  ;;  %v4413_v12 = vrot.slane %v4412_v53, 2  ;;  %4702 = vst [vmem:[#allocation1] ss:$4 sm:$0xff] %v4652_v31 }
 0x3ac   : > { %v4324_v59 = vadd.f32 %v4308_v45, %v4244_v4  ;;  %v4343_v30 = vmax.f32 %v4335_v37, 0.0 }
 0x3ad   : > { %v4394_v36 = vrot.slane %v4393_v19, 1  ;;  %v4400_v51 = vmax.f32 %v4398_v46, %v4399_v34  ;;  %v4407_v3 = vmax.f32 %v4405_v13, %v4406_v42  ;;  %v4414_v50 = vmax.f32 %v4412_v53, %v4413_v12  ;;  %v4144_v34 = vpop.f32.mrf.mxu2  ;;  %v5931_v53 = vld [vmem:[#allocation7 + $0x48] sm:$0xff] }
 0x3ae   : > { %v4336_v22 = vadd.f32 %v9421_v15, %v4324_v59  ;;  %v4080_v46 = vadd.f32 %v4066_v7, %v9394_v21  ;;  %v4352_v42 = vsel %vm2409_vm2, %v4343_v30, -inf  ;;  %v4233_v7 = vpop.f32.mrf.mxu3  ;;  %v4157_v9 = vadd.f32 %v4144_v34, %v4081_v56 }
 0x3af   : > { %v4395_v52 = vmax.f32 %v4393_v19, %v4394_v36  ;;  %v4401_v20 = vrot.slane %v4400_v51, 1  ;;  %v4408_v1 = vrot.slane %v4407_v3, 1  ;;  %v4415_v38 = vrot.slane %v4414_v50, 1 }
 0x3b0   : > { %v4344_v6 = vmax.f32 %v4336_v22, 0.0  ;;  %v4156_v54 = vadd.f32 %v4142_v57, %v4080_v46  ;;  %v4246_v4 = vadd.f32 %v4233_v7, %v4157_v9 }
 0x3b1   : > { %v4402_v63 = vmax.f32 %v4400_v51, %v4401_v20  ;;  %v4409_v61 = vmax.f32 %v4407_v3, %v4408_v1  ;;  %v4416_v28 = vmax.f32 %v4414_v50, %v4415_v38  ;;  %v4501_v32 = vpack.c.bf16 %v4395_v52, %v4395_v52  ;;  %v4071_v1 = vpop.f32.mrf.mxu1 }
 0x3b2   : > { %v4353_v12 = vsel %vm2409_vm2, %v4344_v6, -inf  ;;  %v4311_v21 = vpop.f32.mrf.mxu0  ;;  %v4245_v29 = vadd.f32 %v4231_v62, %v4156_v54  ;;  %v4082_v55 = vadd.f32 %v4071_v1, %v9410_v41 }
 0x3b3   : > { %v4502_v14 = vpack.c.bf16 %v4402_v63, %v4402_v63  ;;  %v4503_v49 = vpack.c.bf16 %v4409_v61, %v4409_v61  ;;  %v4504_v35 = vpack.c.bf16 %v4416_v28, %v4416_v28  ;;  %v4533_v48 = vunpack.c.l.b16 %v4501_v32 }
 0x3b4   : > { %v4354_v24 = vmax.f32 %v4352_v42, %v4353_v12  ;;  %v4325_v57 = vadd.f32 %v4311_v21, %v4245_v29 }
 0x3b5   : > { %v4534_v47 = vunpack.c.l.b16 %v4502_v14  ;;  %v4535_v5 = vunpack.c.l.b16 %v4503_v49  ;;  %v4536_v8 = vunpack.c.l.b16 %v4504_v35  ;;  %v4147_v25 = vpop.f32.mrf.mxu2 }
 0x3b6   : > { %v4368_v36 = vrot.slane %v4354_v24, 2  ;;  %v4369_v51 = vrot.slane %v4354_v24, 4  ;;  %v4370_v3 = vrot.slane %v4354_v24, 6  ;;  %v4417_v50 = vsel %vm2570_vm3, %v4354_v24, -inf }
 0x3b7   : > { %v4549_v33 = vsel %vm3211_vm4, %v4534_v47, %v4533_v48  ;;  %v4418_v11 = vrot.slane %v4417_v50, 4  ;;  %v4158_v37 = vadd.f32 %v4147_v25, %v4082_v55  ;;  %v4337_v45 = vadd.f32 %v9421_v15, %v4325_v57 }
 0x3b8   : > { %v4550_v58 = vsel %vm3213_vm5, %v4535_v5, %v4549_v33  ;;  %v4424_v17 = vsel %vm2570_vm3, %v4368_v36, -inf  ;;  %v4431_v52 = vsel %vm2570_vm3, %v4369_v51, -inf  ;;  %v4438_v20 = vsel %vm2570_vm3, %v4370_v3, -inf  ;;  %v4236_v5 = vpop.f32.mrf.mxu3 }
 0x3b9   : > { %v4551_v13 = vsel %vm3215_vm6, %v4536_v8, %v4550_v58  ;;  %v4419_v38 = vmax.f32 %v4417_v50, %v4418_v11  ;;  %v4425_v40 = vrot.slane %v4424_v17, 4  ;;  %v4432_v43 = vrot.slane %v4431_v52, 4  ;;  %v4073_v54 = vpop.f32.mrf.mxu1 }
 0x3ba   : > { %v4561_v19 = vpack.c.b16 %v4551_v13, %v4551_v13  ;;  %v4439_v16 = vrot.slane %v4438_v20, 4  ;;  %v4313_v39 = vpop.f32.mrf.mxu0  ;;  %v4345_v36 = vmax.f32 %v4337_v45, 0.0  ;;  %v4083_v50 = vadd.f32 %v4073_v54, %v9415_v0 }
 0x3bb   : > { %v4420_v63 = vrot.slane %v4419_v38, 2  ;;  %v4426_v61 = vmax.f32 %v4424_v17, %v4425_v40  ;;  %v4433_v28 = vmax.f32 %v4431_v52, %v4432_v43  ;;  %v4326_v41 = vadd.f32 %v4313_v39, %v4246_v4 }
 0x3bc   : > { %v4574_v44 = vsel %vm9480_vm1, %v4561_v19, %v4573_v26  ;;  %v4440_v32 = vmax.f32 %v4438_v20, %v4439_v16  ;;  %v4247_v1 = vadd.f32 %v4236_v5, %v4158_v37  ;;  %v4355_v57 = vsel %vm2409_vm2, %v4345_v36, -inf }
 0x3bd   : > { %4575 = vst [vmem:[#allocation3 + $0x4] sm:$0x7] %v4574_v44  ;;  %v4421_v14 = vmax.f32 %v4419_v38, %v4420_v63  ;;  %v4427_v49 = vrot.slane %v4426_v61, 2  ;;  %v4434_v35 = vrot.slane %v4433_v28, 2  ;;  %v4338_v51 = vadd.f32 %v9421_v15, %v4326_v41  ;;  %v4576_v41 = vld [vmem:[#allocation3 + $0x8] sm:$0x7] }
 0x3be   : > { %v4441_v31 = vrot.slane %v4440_v32, 2 }
 0x3bf   : > { %v4422_v59 = vrot.slane %v4421_v14, 1  ;;  %v4428_v23 = vmax.f32 %v4426_v61, %v4427_v49  ;;  %v4435_v13 = vmax.f32 %v4433_v28, %v4434_v35  ;;  %v4346_v38 = vmax.f32 %v4338_v51, 0.0  ;;  %v4149_v61 = vpop.f32.mrf.mxu2 }
 0x3c0   : > { %v4442_v26 = vmax.f32 %v4440_v32, %v4441_v31  ;;  %v4238_v28 = vpop.f32.mrf.mxu3  ;;  %v4159_v25 = vadd.f32 %v4149_v61, %v4083_v50 }
 0x3c1   : > { %v4423_v58 = vmax.f32 %v4421_v14, %v4422_v59  ;;  %v4429_v46 = vrot.slane %v4428_v23, 1  ;;  %v4436_v44 = vrot.slane %v4435_v13, 1  ;;  %v4356_v63 = vsel %vm2409_vm2, %v4346_v38, -inf }
 0x3c2   : > { %v4443_v24 = vrot.slane %v4442_v26, 1  ;;  %v4316_v3 = vpop.f32.mrf.mxu0  ;;  %v4357_v39 = vmax.f32 %v4355_v57, %v4356_v63  ;;  %v4248_v31 = vadd.f32 %v4238_v28, %v4159_v25 }
 0x3c3   : > { %v4430_v12 = vmax.f32 %v4428_v23, %v4429_v46  ;;  %v4505_v21 = vpack.c.bf16 %v4423_v58, %v4423_v58  ;;  %v4437_v11 = vmax.f32 %v4435_v13, %v4436_v44  ;;  %v4327_v0 = vadd.f32 %v4316_v3, %v4247_v1 }
 0x3c4   : > { %v9494_v2 = vld [vmem:[#allocation3 + $0x4] sm:$0x7]  ;;  %v4444_v29 = vmax.f32 %v4442_v26, %v4443_v24  ;;  %v4371_v49 = vrot.slane %v4357_v39, 2  ;;  %v4372_v35 = vrot.slane %v4357_v39, 4  ;;  %v4373_v37 = vrot.slane %v4357_v39, 6 }
 0x3c5   : > { %v4604_v62 = vrot.slane %v9494_v2, 2  ;;  %v4506_v17 = vpack.c.bf16 %v4430_v12, %v4430_v12  ;;  %v4507_v40 = vpack.c.bf16 %v4437_v11, %v4437_v11  ;;  %v4537_v16 = vunpack.c.l.b16 %v4505_v21 }
 0x3c6   : > { %v4508_v43 = vpack.c.bf16 %v4444_v29, %v4444_v29  ;;  %v4466_v58 = vsel %vm2570_vm3, %v4373_v37, -inf }
 0x3c7   : > { %v4617_v48 = vsel %vm4607_vm7, %v9494_v2, %v4604_v62  ;;  %v4618_v47 = vsel %vm10139_vm0, %v9494_v2, %v4604_v62  ;;  %v4538_v9 = vunpack.c.l.b16 %v4506_v17  ;;  %v4539_v32 = vunpack.c.l.b16 %v4507_v40 }
 0x3c8   : > { %v4620_v8 = vrot.slane %v4618_v47, 2  ;;  %v4653_v33 = vshrl.u32 %v4617_v48, 16  ;;  %v4656_v30 = vshll.u32 %v4617_v48, 16  ;;  %v5758_v22 = vrot.slane %v4617_v48, 9 }
 0x3c9   : > { %v4552_v4 = vsel %vm3211_vm4, %v4538_v9, %v4537_v16  ;;  %v4540_v62 = vunpack.c.l.b16 %v4508_v43  ;;  %v4445_v48 = vsel %vm2570_vm3, %v4357_v39, -inf  ;;  %v4339_v47 = vadd.f32 %v9421_v15, %v4327_v0 }
 0x3ca   : > { %v4655_v6 = vrot.slane %v4653_v33, 6  ;;  %v4658_v19 = vrot.slane %v4656_v30, 7  ;;  %v4662_v34 = vshll.u32 %v4620_v8, 16  ;;  %v4818_v42 = vrot.slane %v4620_v8, 7  ;;  %v4318_v5 = vpop.f32.mrf.mxu0 }
 0x3cb   : > { %v4553_v14 = vsel %vm3213_vm5, %v4539_v32, %v4552_v4  ;;  %v4446_v23 = vrot.slane %v4445_v48, 4  ;;  %v4452_v8 = vsel %vm2570_vm3, %v4371_v49, -inf  ;;  %v4459_v33 = vsel %vm2570_vm3, %v4372_v35, -inf }
 0x3cc   : > { %v4659_v56 = vor.u32 %v4658_v19, %v4655_v6  ;;  %v9504_v7 = vsel %vm9456_vm10, %v5758_v22, %v4818_v42  ;;  %v4664_v20 = vrot.slane %v4662_v34, 7  ;;  %v4554_v45 = vsel %vm3215_vm6, %v4540_v62, %v4553_v14 }
 0x3cd   : > { %v4562_v59 = vpack.c.b16 %v4554_v45, %v4554_v45  ;;  %v4453_v30 = vrot.slane %v4452_v8, 4  ;;  %v4460_v22 = vrot.slane %v4459_v33, 4  ;;  %v4328_v46 = vadd.f32 %v4318_v5, %v4248_v31 }
 0x3ce   : > { %v4660_v52 = vrot.slane %v4659_v56, 2  ;;  %v4447_v26 = vmax.f32 %v4445_v48, %v4446_v23  ;;  %v4467_v6 = vrot.slane %v4466_v58, 4  ;;  %v4347_v42 = vmax.f32 %v4339_v47, 0.0 }
 0x3cf   : > { %v4577_v13 = vsel %vm9480_vm1, %v4562_v59, %v4576_v41  ;;  %v4454_v19 = vmax.f32 %v4452_v8, %v4453_v30  ;;  %v4461_v34 = vmax.f32 %v4459_v33, %v4460_v22  ;;  %v4340_v12 = vadd.f32 %v9421_v15, %v4328_v46 }
 0x3d0   : > { %v9510_v55 = vsel %vm9463_vm12, %v4660_v52, %v4664_v20  ;;  %4578 = vst [vmem:[#allocation3 + $0x8] sm:$0x7] %v4577_v13  ;;  %v4448_v44 = vrot.slane %v4447_v26, 2  ;;  %v4468_v24 = vmax.f32 %v4466_v58, %v4467_v6  ;;  %v4358_v11 = vsel %vm2409_vm2, %v4347_v42, -inf  ;;  %v4579_v6 = vld [vmem:[#allocation3 + $0xc] sm:$0x7] }
 0x3d1   : > { %4705 = vst [vmem:[#allocation1 + $0x1] ss:$4 sm:$0xff] %v9510_v55  ;;  %v4455_v21 = vrot.slane %v4454_v19, 2  ;;  %v4462_v54 = vrot.slane %v4461_v34, 2  ;;  %v4348_v56 = vmax.f32 %v4340_v12, 0.0 }
 0x3d2   : > { %v4449_v36 = vmax.f32 %v4447_v26, %v4448_v44  ;;  %v4469_v51 = vrot.slane %v4468_v24, 2 }
 0x3d3   : > { %v4456_v3 = vmax.f32 %v4454_v19, %v4455_v21  ;;  %v4463_v50 = vmax.f32 %v4461_v34, %v4462_v54  ;;  %v4359_v29 = vsel %vm2409_vm2, %v4348_v56, -inf }
 0x3d4   : > { %v4450_v17 = vrot.slane %v4449_v36, 1  ;;  %v4470_v52 = vmax.f32 %v4468_v24, %v4469_v51  ;;  %v4360_v20 = vmax.f32 %v4358_v11, %v4359_v29 }
 0x3d5   : > { %v4457_v1 = vrot.slane %v4456_v3, 1  ;;  %v4464_v38 = vrot.slane %v4463_v50, 1 }
 0x3d6   : > { %v4451_v15 = vmax.f32 %v4449_v36, %v4450_v17  ;;  %v4471_v43 = vrot.slane %v4470_v52, 1  ;;  %v4374_v16 = vrot.slane %v4360_v20, 2  ;;  %v4375_v28 = vrot.slane %v4360_v20, 4 }
 0x3d7   : > { %v9528_v40 = vld [vmem:[#allocation3 + $0x8] sm:$0x7]  ;;  %v4458_v57 = vmax.f32 %v4456_v3, %v4457_v1  ;;  %v4465_v63 = vmax.f32 %v4463_v50, %v4464_v38  ;;  %v4473_v32 = vsel %vm2570_vm3, %v4360_v20, -inf  ;;  %v4376_v23 = vrot.slane %v4360_v20, 6 }
 0x3d8   : > { %v4605_v9 = vrot.slane %v9528_v40, 2  ;;  %v4472_v0 = vmax.f32 %v4470_v52, %v4471_v43  ;;  %v4509_v61 = vpack.c.bf16 %v4451_v15, %v4451_v15  ;;  %v4480_v37 = vsel %vm2570_vm3, %v4374_v16, -inf }
 0x3d9   : > { %v4510_v25 = vpack.c.bf16 %v4458_v57, %v4458_v57  ;;  %v4511_v62 = vpack.c.bf16 %v4465_v63, %v4465_v63  ;;  %v4474_v30 = vrot.slane %v4473_v32, 4  ;;  %v4481_v22 = vrot.slane %v4480_v37, 4 }
 0x3da   : > { %v9534_v4 = vsel %vm4607_vm7, %v9528_v40, %v4605_v9  ;;  %v9538_v39 = vsel %vm10140_vm9, %v9528_v40, %v4605_v9  ;;  %v4512_v31 = vpack.c.bf16 %v4472_v0, %v4472_v0  ;;  %v4541_v45 = vunpack.c.l.b16 %v4509_v61 }
 0x3db   : > { %v4626_v14 = vrot.slane %v9538_v39, 2  ;;  %v4666_v49 = vshrl.u32 %v9534_v4, 16  ;;  %v4669_v35 = vshll.u32 %v9534_v4, 16  ;;  %v4542_v41 = vunpack.c.l.b16 %v4510_v25 }
 0x3dc   : > { %v4543_v48 = vunpack.c.l.b16 %v4511_v62  ;;  %v4544_v8 = vunpack.c.l.b16 %v4512_v31  ;;  %v4475_v19 = vmax.f32 %v4473_v32, %v4474_v30  ;;  %v4482_v34 = vmax.f32 %v4480_v37, %v4481_v22 }
 0x3dd   : > { %v4668_v47 = vrot.slane %v4666_v49, 6  ;;  %v4671_v5 = vrot.slane %v4669_v35, 7  ;;  %v4675_v59 = vshll.u32 %v4626_v14, 16  ;;  %v4555_v33 = vsel %vm3211_vm4, %v4542_v41, %v4541_v45 }
 0x3de   : > { %v4556_v13 = vsel %vm3213_vm5, %v4543_v48, %v4555_v33  ;;  %v4487_v42 = vsel %vm2570_vm3, %v4375_v28, -inf  ;;  %v4494_v21 = vsel %vm2570_vm3, %v4376_v23, -inf  ;;  %v4476_v54 = vrot.slane %v4475_v19, 2  ;;  %v5929_v28 = vld [vmem:[#allocation7 + $0x38] sm:$0xff]  ;;  %v5928_v48 = vld [vmem:[#allocation7 + $0x30] sm:$0xff] }
 0x3df   : > { %v4672_v58 = vor.u32 %v4671_v5, %v4668_v47  ;;  %v4677_v46 = vrot.slane %v4675_v59, 7  ;;  %v4557_v26 = vsel %vm3215_vm6, %v4544_v8, %v4556_v13  ;;  %v4488_v24 = vrot.slane %v4487_v42, 4  ;;  %4743 = vmatpush.bf16.msra.mxu1 %v5929_v28 }
 0x3e0   : > { %v4563_v44 = vpack.c.b16 %v4557_v26, %v4557_v26  ;;  %v4483_v56 = vrot.slane %v4482_v34, 2  ;;  %v4495_v36 = vrot.slane %v4494_v21, 4  ;;  %v4477_v11 = vmax.f32 %v4475_v19, %v4476_v54  ;;  %v5925_v26 = vld [vmem:[#allocation7 + $0x18] sm:$0xff]  ;;  %v5924_v54 = vld [vmem:[#allocation7 + $0x10] sm:$0xff] }
 0x3e1   : > { %v4673_v12 = vrot.slane %v4672_v58, 2  ;;  %v4489_v50 = vmax.f32 %v4487_v42, %v4488_v24  ;;  %4791 = vmatpush.bf16.msra.mxu2 %v5925_v26  ;;  %vm10155_vm9 = vcmask 516096  }
 0x3e2   : > { %v4580_v3 = vsel %vm9480_vm1, %v4563_v44, %v4579_v6  ;;  %v4484_v29 = vmax.f32 %v4482_v34, %v4483_v56  ;;  %v4496_v17 = vmax.f32 %v4494_v21, %v4495_v36  ;;  %v4478_v20 = vrot.slane %v4477_v11, 1  ;;  %v5927_v6 = vld [vmem:[#allocation7 + $0x28] sm:$0xff]  ;;  %v4582_v34 = vld [vmem:[#allocation3 + $0x10] sm:$0x7]  ;;  %v5926_v56 = vld [vmem:[#allocation7 + $0x20] sm:$0xff] }
 0x3e3   : > { %v9553_v51 = vsel %vm9463_vm12, %v4673_v12, %v4677_v46  ;;  %4581 = vst [vmem:[#allocation3 + $0xc] sm:$0x7] %v4580_v3  ;;  %v4490_v52 = vrot.slane %v4489_v50, 2  ;;  %4744 = vmatpush.bf16.msra.mxu1 %v5928_v48  ;;  %v5933_v3 = vld [vmem:[#allocation7 + $0x58] sm:$0xff]  ;;  %v5948_v48 = vld [vmem:[#allocation7 + $0xd0] sm:$0xff] }
 0x3e4   : > { %4708 = vst [vmem:[#allocation1 + $0x2] ss:$4 sm:$0xff] %v9553_v51  ;;  %v4485_v1 = vrot.slane %v4484_v29, 1  ;;  %v4497_v38 = vrot.slane %v4496_v17, 2  ;;  %v4479_v43 = vmax.f32 %v4477_v11, %v4478_v20  ;;  %4879 = vmatpush.bf16.msra.mxu3 %v5933_v3  ;;  %v5932_v11 = vld [vmem:[#allocation7 + $0x50] sm:$0xff]  ;;  %v5930_v20 = vld [vmem:[#allocation7 + $0x40] sm:$0xff] }
 0x3e5   : > { %v4491_v15 = vmax.f32 %v4489_v50, %v4490_v52  ;;  %4792 = vmatpush.bf16.msra.mxu2 %v5924_v54  ;;  %v5923_v50 = vld [vmem:[#allocation7 + $0x8] sm:$0xff]  ;;  %v5937_v52 = vld [vmem:[#allocation7 + $0x78] sm:$0xff] }
 0x3e6   : > { %v4486_v16 = vmax.f32 %v4484_v29, %v4485_v1  ;;  %v4498_v9 = vmax.f32 %v4496_v17, %v4497_v38  ;;  %v4513_v0 = vpack.c.bf16 %v4479_v43, %v4479_v43  ;;  %v5922_v29 = vld [vmem:[#allocation7] sm:$0xff]  ;;  %v5936_v1 = vld [vmem:[#allocation7 + $0x70] sm:$0xff]  ;;  %v5941_v38 = vld [vmem:[#allocation7 + $0x98] sm:$0xff] }
 0x3e7   : > { %v4492_v57 = vrot.slane %v4491_v15, 1  ;;  %4745 = vmatpush.bf16.msra.mxu1 %v5927_v6  ;;  %v5945_v43 = vld [vmem:[#allocation7 + $0xb8] sm:$0xff] }
 0x3e8   : > { %v4499_v63 = vrot.slane %v4498_v9, 1  ;;  %v4514_v61 = vpack.c.bf16 %v4486_v16, %v4486_v16  ;;  %v4545_v49 = vunpack.c.l.b16 %v4513_v0  ;;  %4880 = vmatpush.bf16.msra.mxu3 %v5932_v11  ;;  %v5935_v16 = vld [vmem:[#allocation7 + $0x68] sm:$0xff]  ;;  %v5944_v0 = vld [vmem:[#allocation7 + $0xb0] sm:$0xff] }
 0x3e9   : > { %v4493_v32 = vmax.f32 %v4491_v15, %v4492_v57  ;;  %4793 = vmatpush.bf16.msra.mxu2 %v5923_v50  ;;  %v5955_v11 = vld [vmem:[#allocation7 + $0x108] sm:$0xff] }
 0x3ea   : > { %v9558_v25 = vld [vmem:[#allocation3 + $0xc] sm:$0x7]  ;;  %v4500_v62 = vmax.f32 %v4498_v9, %v4499_v63  ;;  %v4546_v35 = vunpack.c.l.b16 %v4514_v61  ;;  %v5759_v61 = vrot.slane %v9534_v4, 9 }
 0x3eb   : > { %v4606_v37 = vrot.slane %v9558_v25, 2  ;;  %v4515_v31 = vpack.c.bf16 %v4493_v32, %v4493_v32  ;;  %4746 = vmatpush.bf16.msra.mxu1 %v5926_v56  ;;  %v5940_v9 = vld [vmem:[#allocation7 + $0x90] sm:$0xff] }
 0x3ec   : > { %v4516_v45 = vpack.c.bf16 %v4500_v62, %v4500_v62  ;;  %v4558_v41 = vsel %vm3211_vm4, %v4546_v35, %v4545_v49  ;;  %4881 = vmatpush.bf16.msra.mxu3 %v5931_v53  ;;  %v5939_v62 = vld [vmem:[#allocation7 + $0x88] sm:$0xff]  ;;  %v5949_v35 = vld [vmem:[#allocation7 + $0xd8] sm:$0xff]  ;;  %vm10142_vm4 = vmmov %vm10139_vm0 }
 0x3ed   : > { %v9564_v47 = vsel %vm4607_vm7, %v9558_v25, %v4606_v37  ;;  %v4630_v5 = vsel %vm10141_vm13, %v9558_v25, %v4606_v37  ;;  %v4547_v59 = vunpack.c.l.b16 %v4515_v31  ;;  %4794 = vmatpush.bf16.msra.mxu2 %v5922_v29  ;;  %v5943_v49 = vld [vmem:[#allocation7 + $0xa8] sm:$0xff]  ;;  %v5954_v29 = vld [vmem:[#allocation7 + $0x100] sm:$0xff] }
 0x3ee   : > { %v4632_v23 = vrot.slane %v4630_v5, 2  ;;  %v4679_v8 = vshrl.u32 %v9564_v47, 16  ;;  %v4682_v33 = vshll.u32 %v9564_v47, 16  ;;  %v4548_v30 = vunpack.c.l.b16 %v4516_v45  ;;  %v5938_v45 = vld [vmem:[#allocation7 + $0x80] sm:$0xff] }
 0x3ef   : > { %v4559_v22 = vsel %vm3213_vm5, %v4547_v59, %v4558_v41  ;;  %4939 = vmatpush.bf16.msrb.mxu1 %v5937_v52  ;;  %v5760_v32 = vrot.slane %v9564_v47, 9  ;;  %v5942_v41 = vld [vmem:[#allocation7 + $0xa0] sm:$0xff]  ;;  %vm10143_vm5 = vmmov %vm10139_vm0 }
 0x3f0   : > { %v4681_v58 = vrot.slane %v4679_v8, 6  ;;  %v4684_v46 = vrot.slane %v4682_v33, 7  ;;  %v4688_v13 = vshll.u32 %v4632_v23, 16  ;;  %v4560_v19 = vsel %vm3215_vm6, %v4548_v30, %v4559_v22  ;;  %4882 = vmatpush.bf16.msra.mxu3 %v5930_v20  ;;  %v5947_v30 = vld [vmem:[#allocation7 + $0xc8] sm:$0xff]  ;;  %v5953_v22 = vld [vmem:[#allocation7 + $0xf8] sm:$0xff] }
 0x3f1   : > { %v4564_v12 = vpack.c.b16 %v4560_v19, %v4560_v19  ;;  %5019 = vmatpush.bf16.msrb.mxu2 %v5941_v38  ;;  %v4826_v57 = vrot.slane %v4632_v23, 7 }
 0x3f2   : > { %v4685_v42 = vor.u32 %v4684_v46, %v4681_v58  ;;  %v4690_v24 = vrot.slane %v4688_v13, 7  ;;  %v5946_v46 = vld [vmem:[#allocation7 + $0xc0] sm:$0xff]  ;;  %v5952_v13 = vld [vmem:[#allocation7 + $0xf0] sm:$0xff] }
 0x3f3   : > { %v4583_v21 = vsel %vm9480_vm1, %v4564_v12, %v4582_v34  ;;  %4940 = vmatpush.bf16.msrb.mxu1 %v5936_v1  ;;  %v9600_v4 = vsel %vm9456_vm10, %v5760_v32, %v4826_v57  ;;  %v5957_v34 = vld [vmem:[#allocation7 + $0x118] sm:$0xff]  ;;  %v5956_v12 = vld [vmem:[#allocation7 + $0x110] sm:$0xff]  ;;  %vm5406_vm1 = vcmask 1041409  }
 0x3f4   : > { %v4686_v44 = vrot.slane %v4685_v42, 2  ;;  %4584 = vst [vmem:[#allocation3 + $0x10] sm:$0x7] %v4583_v21  ;;  %5084 = vmatpush.bf16.msrb.mxu3 %v5945_v43  ;;  %v5951_v42 = vld [vmem:[#allocation7 + $0xe8] sm:$0xff] }
 0x3f5   : > { %5020 = vmatpush.bf16.msrb.mxu2 %v5940_v9 }
 0x3f6   : > { %v9576_v36 = vsel %vm9463_vm12, %v4686_v44, %v4690_v24  ;;  %v5950_v44 = vld [vmem:[#allocation7 + $0xe0] sm:$0xff]  ;;  %v4590_v24 = vld [vmem:[#allocation3 + $0x14] sm:$0x7] }
 0x3f7   : > { %4711 = vst [vmem:[#allocation1 + $0x3] ss:$4 sm:$0xff] %v9576_v36  ;;  %4941 = vmatpush.bf16.msrb.mxu1 %v5935_v16  ;;  %v5157_v56 = vrot.slane %v4590_v24, 2 }
 0x3f8   : > { %5085 = vmatpush.bf16.msrb.mxu3 %v5944_v0 }
 0x3f9   : > { %5021 = vmatpush.bf16.msrb.mxu2 %v5939_v62  ;;  %v5159_v50 = vsel %vm4607_vm7, %v4590_v24, %v5157_v56  ;;  %v5160_v52 = vsel %vm10143_vm5, %v4590_v24, %v5157_v56 }
 0x3fa   : > { %v5166_v53 = vshll.u32 %v5159_v50, 16 }
 0x3fb   : > { %v9584_v15 = vld [vmem:[#allocation3 + $0x10] sm:$0x7] }
 0x3fc   : > { %v4952_v63 = vrot.slane %v9584_v15, 2  ;;  %5086 = vmatpush.bf16.msrb.mxu3 %v5943_v49  ;;  %v5168_v38 = vrot.slane %v5166_v53, 7 }
 0x3fd   : > { %5022 = vmatpush.bf16.msrb.mxu2 %v5938_v45 }
 0x3fe   : > { %v4712_v17 = vld.sshfl [vmem:[#allocation1] sm:$0xff pattern:$0x73625140]  ;;  %v4955_v47 = vsel %vm10142_vm4, %v9584_v15, %v4952_v63  ;;  %vm10157_vm4 = vmmov %vm10155_vm9 }
 0x3ff   : > { %4753 = vst [vmem:[#allocation1] ss:$4 sm:$0xff] %v9427_v27  ;;  %5739 = vmatmul.msk.bf16.vlgmr.msra.gmra.mxu1 %vm2409_vm2, %v4712_v17  ;;  %v4822_v27 = vrot.slane %v4626_v14, 7  ;;  %v5934_v14 = vld [vmem:[#allocation7 + $0x60] sm:$0xff]  ;;  %v4957_v8 = vrot.slane %v4955_v47, 2  ;;  %v5163_v17 = vshrl.u32 %v5159_v50, 16 }
 0x400   : > { %4755 = vst [vmem:[#allocation1 + $0x1] ss:$4 sm:$0xff] %v9494_v2  ;;  %4942 = vmatpush.bf16.msrb.mxu1 %v5934_v14  ;;  %5087 = vmatpush.bf16.msrb.mxu3 %v5942_v41 }
 0x401   : > { %4757 = vst [vmem:[#allocation1 + $0x2] ss:$4 sm:$0xff] %v9528_v40  ;;  %v9595_v39 = vsel %vm9456_vm10, %v5759_v61, %v4822_v27  ;;  %v4967_v58 = vshll.u32 %v4957_v8, 16  ;;  %v5034_v21 = vrot.slane %v4957_v8, 7  ;;  %v5165_v1 = vrot.slane %v5163_v17, 6 }
 0x402   : > { %4759 = vst [vmem:[#allocation1 + $0x3] ss:$4 sm:$0xff] %v9558_v25 }
 0x403   : > { %v4969_v6 = vrot.slane %v4967_v58, 7  ;;  %v5169_v43 = vor.u32 %v5168_v38, %v5165_v1 }
 0x404   : > { %5144 = vmatpush.bf16.msra.mxu1 %v5949_v35 }
 0x405   : > { %v5170_v16 = vrot.slane %v5169_v43, 2 }
 0x408   : > { %5145 = vmatpush.bf16.msra.mxu1 %v5948_v48 }
 0x409   : > { %v4760_v28 = vld.sshfl [vmem:[#allocation1] sm:$0xff pattern:$0x73625140] }
 0x40a   : > { %4838 = vst [vmem:[#allocation1] ss:$4 sm:$0xff] %v9472_v10  ;;  %5756 = vmatmul.msk.bf16.vlgmr.msra.gmra.mxu2 %vm2409_vm2, %v4760_v28  ;;  %v9605_v10 = vsel %vm4607_vm7, %v9584_v15, %v4952_v63 }
 0x40b   : > { %4841 = vst [vmem:[#allocation1 + $0x1] ss:$4 sm:$0xff] %v9504_v7  ;;  %v4958_v37 = vshrl.u32 %v9605_v10, 16  ;;  %v4961_v31 = vshll.u32 %v9605_v10, 16  ;;  %5224 = vmatpush.bf16.msra.mxu2 %v5953_v22  ;;  %v5812_v3 = vrot.slane %v9605_v10, 9 }
 0x40c   : > { %4844 = vst [vmem:[#allocation1 + $0x2] ss:$4 sm:$0xff] %v9595_v39  ;;  %5146 = vmatpush.bf16.msra.mxu1 %v5947_v30  ;;  %v6186_v22 = vld [vmem:[%s9710_s6] ss:$0 sm:$0xff] }
 0x40d   : > { %4847 = vst [vmem:[#allocation1 + $0x3] ss:$4 sm:$0xff] %v9600_v4  ;;  %v4960_v5 = vrot.slane %v4958_v37, 6  ;;  %v4963_v59 = vrot.slane %v4961_v31, 7 }
 0x40f   : > { %v4964_v33 = vor.u32 %v4963_v59, %v4960_v5  ;;  %5225 = vmatpush.bf16.msra.mxu2 %v5952_v13 }
 0x410   : > { %5147 = vmatpush.bf16.msra.mxu1 %v5946_v46 }
 0x411   : > { %v4965_v26 = vrot.slane %v4964_v33, 2 }
 0x413   : > { %5226 = vmatpush.bf16.msra.mxu2 %v5951_v42 }
 0x414   : > { %v4848_v23 = vld.sshfl [vmem:[#allocation1] sm:$0xff pattern:$0x73625140] }
 0x415   : > { %4904 = vst [vmem:[#allocation1 + $0x2] ss:$4 sm:$0xff] %v9558_v25  ;;  %5777 = vmatmul.msk.bf16.vlgmr.msra.gmra.mxu3 %vm2409_vm2, %v4848_v23 }
 0x416   : > { %4900 = vst [vmem:[#allocation1] ss:$4 sm:$0xff] %v9494_v2  ;;  %v4970_v2 = vsel %vm9463_vm12, %v4965_v26, %v4969_v6  ;;  %5289 = vmatpush.bf16.msra.mxu3 %v5957_v34 }
 0x417   : > { %4902 = vst [vmem:[#allocation1 + $0x1] ss:$4 sm:$0xff] %v9528_v40  ;;  %5227 = vmatpush.bf16.msra.mxu2 %v5950_v44 }
 0x418   : > { %4907 = vst [vmem:[#allocation1 + $0x3] ss:$4 sm:$0xff] %v9584_v15 }
 0x41a   : > { %5290 = vmatpush.bf16.msra.mxu3 %v5956_v12 }
 0x41e   : > { %5291 = vmatpush.bf16.msra.mxu3 %v5955_v11 }
 0x41f   : > { %v4908_v19 = vld.sshfl [vmem:[#allocation1] sm:$0xff pattern:$0x73625140] }
 0x420   : > { %4987 = vst [vmem:[#allocation1 + $0x3] ss:$4 sm:$0xff] %v4970_v2  ;;  %5794 = vmatmul.msk.bf16.vlgmr.msrb.gmra.mxu1 %vm2409_vm2, %v4908_v19 }
 0x421   : > { %4980 = vst [vmem:[#allocation1] ss:$4 sm:$0xff] %v9510_v55  ;;  %v5035_v55 = vsel %vm9456_vm10, %v5812_v3, %v5034_v21 }
 0x422   : > { %4982 = vst [vmem:[#allocation1 + $0x1] ss:$4 sm:$0xff] %v9553_v51  ;;  %5292 = vmatpush.bf16.msra.mxu3 %v5954_v29 }
 0x423   : > { %4984 = vst [vmem:[#allocation1 + $0x2] ss:$4 sm:$0xff] %v9576_v36 }
 0x42a   : > { %v4988_v54 = vld.sshfl [vmem:[#allocation1] sm:$0xff pattern:$0x73625140] }
 0x42b   : > { %5811 = vmatmul.msk.bf16.vlgmr.msrb.gmra.mxu2 %vm2409_vm2, %v4988_v54  ;;  %5045 = vst [vmem:[#allocation1] ss:$4 sm:$0xff] %v9504_v7  ;;  %v5162_v7 = vrot.slane %v5160_v52, 2 }
 0x42c   : > { %5047 = vst [vmem:[#allocation1 + $0x1] ss:$4 sm:$0xff] %v9595_v39 }
 0x42d   : > { %5049 = vst [vmem:[#allocation1 + $0x2] ss:$4 sm:$0xff] %v9600_v4  ;;  %v5172_v27 = vshll.u32 %v5162_v7, 16 }
 0x42e   : > { %5052 = vst [vmem:[#allocation1 + $0x3] ss:$4 sm:$0xff] %v5035_v55 }
 0x42f   : > { %v5174_v9 = vrot.slane %v5172_v27, 7 }
 0x431   : > { %v5175_v63 = vsel %vm9463_vm12, %v5170_v16, %v5174_v9 }
 0x435   : > { %v5053_v20 = vld.sshfl [vmem:[#allocation1] sm:$0xff pattern:$0x73625140] }
 0x436   : > { %5829 = vmatmul.msk.bf16.vlgmr.msrb.gmra.mxu3 %vm2409_vm2, %v5053_v20  ;;  %5105 = vst [vmem:[#allocation1] ss:$4 sm:$0xff] %v9528_v40  ;;  %v5864_v40 = vrot.slane %v5159_v50, 9 }
 0x437   : > { %5107 = vst [vmem:[#allocation1 + $0x1] ss:$4 sm:$0xff] %v9558_v25  ;;  %v5239_v25 = vrot.slane %v5162_v7, 7 }
 0x438   : > { %5109 = vst [vmem:[#allocation1 + $0x2] ss:$4 sm:$0xff] %v9584_v15 }
 0x439   : > { %5112 = vst [vmem:[#allocation1 + $0x3] ss:$4 sm:$0xff] %v4590_v24  ;;  %v5240_v0 = vsel %vm9456_vm10, %v5864_v40, %v5239_v25  ;;  %vm10149_vm10 = vmmov %vm10139_vm0 }
 0x440   : > { %v5113_v57 = vld.sshfl [vmem:[#allocation1] sm:$0xff pattern:$0x73625140] }
 0x441   : > { %5846 = vmatmul.msk.bf16.vlgmr.msra.gmra.mxu1 %vm2409_vm2, %v5113_v57  ;;  %5185 = vst [vmem:[#allocation1] ss:$4 sm:$0xff] %v9553_v51 }
 0x442   : > { %5187 = vst [vmem:[#allocation1 + $0x1] ss:$4 sm:$0xff] %v9576_v36 }
 0x443   : > { %5189 = vst [vmem:[#allocation1 + $0x2] ss:$4 sm:$0xff] %v4970_v2 }
 0x444   : > { %5192 = vst [vmem:[#allocation1 + $0x3] ss:$4 sm:$0xff] %v5175_v63 }
 0x44b   : > { %v5193_v15 = vld.sshfl [vmem:[#allocation1] sm:$0xff pattern:$0x73625140] }
 0x44c   : > { %5863 = vmatmul.msk.bf16.vlgmr.msra.gmra.mxu2 %vm2409_vm2, %v5193_v15  ;;  %5250 = vst [vmem:[#allocation1] ss:$4 sm:$0xff] %v9595_v39 }
 0x44d   : > { %5252 = vst [vmem:[#allocation1 + $0x1] ss:$4 sm:$0xff] %v9600_v4 }
 0x44e   : > { %5254 = vst [vmem:[#allocation1 + $0x2] ss:$4 sm:$0xff] %v5035_v55 }
 0x44f   : > { %5257 = vst [vmem:[#allocation1 + $0x3] ss:$4 sm:$0xff] %v5240_v0 }
 0x456   : > { %v5258_v18 = vld.sshfl [vmem:[#allocation1] sm:$0xff pattern:$0x73625140] }
 0x457   : > { %5881 = vmatmul.msk.bf16.vlgmr.msra.gmra.mxu3 %vm2409_vm2, %v5258_v18  ;;  %vm10144_vm2 = vcmask 519168  }
 0x458   : > { %vm10145_vm6 = vmmov %vm10144_vm2 }
 0x459   : > { %vm10147_vm15 = vmmov %vm10144_vm2 }
 0x45a   : > { %vm10148_vm11 = vmmov %vm10144_vm2 }
 0x47c   : > { %v4748_v51 = vpop.f32.mrf.mxu1 }
 0x484   : > { %v4750_v28 = vpop.f32.mrf.mxu1 }
 0x48d   : > { %v4796_v36 = vpop.f32.mrf.mxu2 }
 0x48e   : > { %v4797_v39 = vadd.f32 %v4796_v36, %v4748_v51 }
 0x495   : > { %v4798_v32 = vpop.f32.mrf.mxu2 }
 0x496   : > { %v4799_v4 = vadd.f32 %v4798_v32, %v4750_v28 }
 0x498   : > { %v4884_v61 = vpop.f32.mrf.mxu3 }
 0x499   : > { %v4889_v60 = vadd.f32 %v4884_v61, %v4797_v39 }
 0x49d   : > { %v4944_v14 = vpop.f32.mrf.mxu1 }
 0x49e   : > { %v4949_v31 = vadd.f32 %v4944_v14, %v4889_v60 }
 0x4a0   : > { %v4886_v62 = vpop.f32.mrf.mxu3 }
 0x4a1   : > { %v4890_v47 = vadd.f32 %v4886_v62, %v4799_v4 }
 0x4a5   : > { %v4946_v35 = vpop.f32.mrf.mxu1 }
 0x4a6   : > { %v4950_v23 = vadd.f32 %v4946_v35, %v4890_v47 }
 0x4ae   : > { %v5024_v10 = vpop.f32.mrf.mxu2 }
 0x4af   : > { %v5029_v45 = vadd.f32 %v5024_v10, %v4949_v31 }
 0x4b6   : > { %v5026_v37 = vpop.f32.mrf.mxu2 }
 0x4b7   : > { %v5030_v33 = vadd.f32 %v5026_v37, %v4950_v23 }
 0x4b9   : > { %v5089_v49 = vpop.f32.mrf.mxu3 }
 0x4ba   : > { %v5094_v5 = vadd.f32 %v5089_v49, %v5029_v45 }
 0x4be   : > { %v5149_v41 = vpop.f32.mrf.mxu1 }
 0x4bf   : > { %v5154_v8 = vadd.f32 %v5149_v41, %v5094_v5 }
 0x4c1   : > { %v5091_v48 = vpop.f32.mrf.mxu3 }
 0x4c2   : > { %v5095_v46 = vadd.f32 %v5091_v48, %v5030_v33 }
 0x4c6   : > { %v5151_v26 = vpop.f32.mrf.mxu1 }
 0x4c7   : > { %v5155_v2 = vadd.f32 %v5151_v26, %v5095_v46 }
 0x4cf   : > { %v5229_v59 = vpop.f32.mrf.mxu2 }
 0x4d0   : > { %v5234_v30 = vadd.f32 %v5229_v59, %v5154_v8 }
 0x4d7   : > { %v5231_v19 = vpop.f32.mrf.mxu2 }
 0x4d8   : > { %v5235_v42 = vadd.f32 %v5231_v19, %v5155_v2 }
 0x4da   : > { %v5294_v58 = vpop.f32.mrf.mxu3 }
 0x4db   : > { %v5299_v13 = vadd.f32 %v5294_v58, %v5234_v30 }
 0x4dd   : > { %v5305_v6 = vadd.f32 %v6186_v22, %v5299_v13 }
 0x4df   : > { %v5307_v34 = vmax.f32 %v5305_v6, 0.0 }
 0x4e1   : > { %v5311_v12 = vrot.slane %v5307_v34, 4  ;;  %v5315_v24 = vsel %vm10144_vm2, %v5307_v34, -inf }
 0x4e2   : > { %v5296_v44 = vpop.f32.mrf.mxu3 }
 0x4e3   : > { %v5316_v21 = vsel %vm10145_vm6, %v5311_v12, -inf  ;;  %v5300_v54 = vadd.f32 %v5296_v44, %v5235_v42 }
 0x4e4   : > { %v5317_v56 = vmax.f32 %v5315_v24, %v5316_v21 }
 0x4e5   : > { %v5306_v3 = vadd.f32 %v6186_v22, %v5300_v54 }
 0x4e6   : > { %v5323_v55 = vrot.slane %v5317_v56, 2 }
 0x4e7   : > { %v5308_v50 = vmax.f32 %v5306_v3, 0.0 }
 0x4e8   : > { %v5325_v11 = vsel %vm4607_vm7, %v5317_v56, %v5323_v55  ;;  %v5326_v29 = vsel %vm10146_vm14, %v5317_v56, %v5323_v55 }
 0x4e9   : > { %v5327_v17 = vrot.slane %v5326_v29, 2  ;;  %v5335_v53 = vsel %vm2570_vm3, %v5325_v11, -inf  ;;  %v5312_v52 = vrot.slane %v5308_v50, 4  ;;  %v5318_v1 = vsel %vm10147_vm15, %v5308_v50, -inf }
 0x4ea   : > { %v5336_v20 = vrot.slane %v5335_v53, 4 }
 0x4eb   : > { %v5342_v7 = vsel %vm2570_vm3, %v5327_v17, -inf  ;;  %v5319_v38 = vsel %vm10148_vm11, %v5312_v52, -inf }
 0x4ec   : > { %v5337_v43 = vmax.f32 %v5335_v53, %v5336_v20  ;;  %v5343_v27 = vrot.slane %v5342_v7, 4  ;;  %v5320_v16 = vmax.f32 %v5318_v1, %v5319_v38 }
 0x4ee   : > { %v5338_v9 = vrot.slane %v5337_v43, 2  ;;  %v5344_v57 = vmax.f32 %v5342_v7, %v5343_v27  ;;  %v5324_v63 = vrot.slane %v5320_v16, 2 }
 0x4f0   : > { %v5339_v40 = vmax.f32 %v5337_v43, %v5338_v9  ;;  %v5345_v25 = vrot.slane %v5344_v57, 2  ;;  %v5328_v15 = vsel %vm4607_vm7, %v5320_v16, %v5324_v63  ;;  %v5329_v0 = vsel %vm10149_vm10, %v5320_v16, %v5324_v63 }
 0x4f1   : > { %v5330_v18 = vrot.slane %v5329_v0, 2  ;;  %v5349_v51 = vsel %vm2570_vm3, %v5328_v15, -inf  ;;  %vm10150_vm7 = vcmask 1040384  }
 0x4f2   : > { %v5340_v36 = vrot.slane %v5339_v40, 1  ;;  %v5346_v61 = vmax.f32 %v5344_v57, %v5345_v25  ;;  %v5350_v28 = vrot.slane %v5349_v51, 4  ;;  %vm10151_vm12 = vmmov %vm10150_vm7 }
 0x4f3   : > { %v5356_v32 = vsel %vm2570_vm3, %v5330_v18, -inf  ;;  %vm10152_vm3 = vmmov %vm10150_vm7 }
 0x4f4   : > { %v5341_v14 = vmax.f32 %v5339_v40, %v5340_v36  ;;  %v5347_v62 = vrot.slane %v5346_v61, 1  ;;  %v5351_v10 = vmax.f32 %v5349_v51, %v5350_v28  ;;  %v5357_v49 = vrot.slane %v5356_v32, 4  ;;  %vm10153_vm8 = vmmov %vm10152_vm3 }
 0x4f5   : > { %vm10154_vm0 = vmmov %vm10152_vm3 }
 0x4f6   : > { %v5348_v39 = vmax.f32 %v5346_v61, %v5347_v62  ;;  %v5363_v35 = vpack.c.bf16 %v5341_v14, %v5341_v14  ;;  %v5352_v60 = vrot.slane %v5351_v10, 2  ;;  %v5358_v37 = vmax.f32 %v5356_v32, %v5357_v49  ;;  %vm10156_vm13 = vmmov %vm10154_vm0 }
 0x4f8   : > { %v5364_v31 = vpack.c.bf16 %v5348_v39, %v5348_v39  ;;  %v5371_v4 = vrot.slane %v5363_v35, 3  ;;  %v5353_v45 = vmax.f32 %v5351_v10, %v5352_v60  ;;  %v5359_v41 = vrot.slane %v5358_v37, 2 }
 0x4fa   : > { %v5372_v48 = vrot.slane %v5364_v31, 3  ;;  %v5378_v47 = vsel %vm10150_vm7, %v5363_v35, %v5371_v4  ;;  %v5354_v5 = vrot.slane %v5353_v45, 1  ;;  %v5360_v59 = vmax.f32 %v5358_v37, %v5359_v41 }
 0x4fb   : > { %5388 = vst [vmem:[#allocation1] ss:$4 sm:$0xff] %v5378_v47 }
 0x4fc   : > { %v5381_v23 = vsel %vm10151_vm12, %v5364_v31, %v5372_v48  ;;  %v5355_v8 = vmax.f32 %v5353_v45, %v5354_v5  ;;  %v5361_v33 = vrot.slane %v5360_v59, 1 }
 0x4fd   : > { %5392 = vst [vmem:[#allocation1 + $0x20] ss:$4 sm:$0xff] %v5381_v23 }
 0x4fe   : > { %v5362_v30 = vmax.f32 %v5360_v59, %v5361_v33  ;;  %v5365_v22 = vpack.c.bf16 %v5355_v8, %v5355_v8 }
 0x500   : > { %v5366_v58 = vpack.c.bf16 %v5362_v30, %v5362_v30  ;;  %v5373_v46 = vrot.slane %v5365_v22, 3 }
 0x502   : > { %v5374_v13 = vrot.slane %v5366_v58, 3  ;;  %v5384_v26 = vsel %vm10152_vm3, %v5365_v22, %v5373_v46  ;;  %v5389_v6 = vld [vmem:[#allocation1] sm:$0xf] }
 0x503   : > { %5395 = vst [vmem:[#allocation1] ss:$4 sm:$0xff] %v5384_v26  ;;  %v5401_v42 = vunpack.c.l.b16 %v5389_v6 }
 0x504   : > { %v5387_v19 = vsel %vm10153_vm8, %v5366_v58, %v5374_v13  ;;  %v5393_v2 = vld [vmem:[#allocation1 + $0x20] sm:$0xf] }
 0x505   : > { %5398 = vst [vmem:[#allocation1 + $0x20] ss:$4 sm:$0xff] %v5387_v19  ;;  %v5402_v34 = vunpack.c.l.b16 %v5393_v2 }
 0x507   : > { %v5405_v12 = vrot.slane %v5402_v34, 7 }
 0x509   : > { %v5407_v44 = vsel %vm5406_vm1, %v5405_v12, %v5401_v42 }
 0x50a   : > { %v5410_v24 = vpack.c.b16 %v5407_v44, %v5407_v44  ;;  %v5396_v21 = vld [vmem:[#allocation1] sm:$0xf] }
 0x50b   : > { %v5403_v50 = vunpack.c.l.b16 %v5396_v21 }
 0x50c   : > { %v5399_v54 = vld [vmem:[#allocation1 + $0x20] sm:$0xf]  ;;  %v5412_v56 = vrot.slane %v5410_v24, 3 }
 0x50d   : > { %v5404_v3 = vunpack.c.l.b16 %v5399_v54 }
 0x50e   : > { %v5416_v55 = vsel %vm10154_vm0, %v5410_v24, %v5412_v56 }
 0x50f   : > { %v5408_v11 = vrot.slane %v5404_v3, 7  ;;  %5422 = vst.msk [vmem:[%s305_s23] sm:$0x1] %vm10155_vm9, %v5416_v55 }
 0x511   : > { %v5409_v29 = vsel %vm5406_vm1, %v5408_v11, %v5403_v50 }
 0x512   : > { %v5411_v17 = vpack.c.b16 %v5409_v29, %v5409_v29 }
 0x514   : > { %v5413_v53 = vrot.slane %v5411_v17, 3 }
 0x516   : > { %v5419_v52 = vsel %vm10156_vm13, %v5411_v17, %v5413_v53 }
 0x517   : > { %5423 = vst.msk [vmem:[%s305_s23 + $0x1] sm:$0x1] %vm10157_vm4, %v5419_v52 }
 0x518   : > { %6304 = shalt.err (!%p6301_p8)
}
 0x519   : > { %s6354_s17 = smov 16   ;;  %s6355_s20 = smov 1  }
 0x51a   : > { %5971 = dma.vmem_to_hbm [thread:$0]  (%p6434_p5), %s5437_s29, 32, %s5439_s28, %s5425_s8, %s6354_s17, %s6354_s17, %s6355_s20  }
 0x51b PF: > { %p5988_p9 = scmp.ge.s32.totalorder %s6347_s27, 2  ;;  %s5453_s21 = sand.u32 1, %s6335_s24  }
 0x51c   : > { %s5454_s22 = scalar_lea.sflag [#allocation6], %s5453_s21 }
 0x51d   : > { %p5981_p10 = pnand %p5988_p9, %p6438_p6 }
 0x51f   : > { %p5982_p11 = pneg %p5981_p10 }
 0x521   : > { %6330 = dma.done.wait (%p5982_p11), %s5454_s22, 32  }
 0x522   : > { %6332 = vsyncadd (%p5982_p11), %s5454_s22, 4294967264  ;;  %p19_p12 = scmp.ge.s32.totalorder %s6421_s30, 4   ;;  %s10158_s24 = smov %s6339_s25 }
 0x523   : > { %s10159_s25 = smov %s6343_s26  ;;  %s10160_s26 = smov %s6432_s10 }
 0x524   : > { %s10161_s27 = smov %s6421_s30  ;;  %21 = sbr.rel (!%p19_p12) target bundleno = 5 (0x5), region = 138 }
 0x529   :  { %5460 = vsyncpa [#allocation5], 1 }
 0x52a   :  { %5462 = vsyncpa [#allocation5 + $0x1], 1 }
 0x52b   :  { %5463 = vsyncpa [#allocation8], 1 }
 0x52c   :  { %5464 = vsyncpa [#allocation6], 1 }
 0x52d   :  { %5466 = vsyncpa [#allocation6 + $0x1], 1 }

</bundles_post_ra>
